<compile_context>
chip_gen: v7x
topology: tpu7x:2x2x1
jax: 0.10.0
libtpu: 0.0.40
codegen_flags: <defaults>
</compile_context>

<pallas_src>
import functools
import math

import jax
import jax.numpy as jnp
from jax import lax
from jax.experimental import pallas as pl
from jax.experimental.pallas import tpu as pltpu


def _encoder_layer_kernel(x_ref, mask_ref,
                          a1_ref, g1_ref,
                          wqkv_ref, bqkv_ref,
                          wo_ref, bo_ref,
                          a2_ref, g2_ref,
                          w1_ref, b1_ref, w2_ref, b2_ref,
                          o_ref,
                          concat_ref,
                          *, heads, d_k, eps, dff_chunk, mxu_dtype):
    f32 = jnp.float32
    D = heads * d_k
    x = x_ref[0].astype(f32)          # (S, D)
    mask = mask_ref[0].astype(f32)    # (1, S)  -- padding mask over keys

    def norm(v, alpha_ref, beta_ref):
        d = v.shape[-1]
        mean = jnp.mean(v, axis=-1, keepdims=True)
        c = v - mean
        # torch.std default: unbiased (divide by N-1); eps added to std (not var).
        var = jnp.sum(c * c, axis=-1, keepdims=True) * (1.0 / (d - 1))
        inv = pl.reciprocal(jnp.sqrt(var) + eps, approx=True)   # EUP slot
        return alpha_ref[...].astype(f32) * c * inv + beta_ref[...].astype(f32)

    # ---------------- multi-head self-attention (residual) ----------------
    x2 = norm(x, a1_ref, g1_ref).astype(mxu_dtype)
    # Fused QKV projection: one MXU matmul with N = 3D.
    qkv = jnp.dot(x2, wqkv_ref[...], preferred_element_type=f32) + bqkv_ref[...]
    q = qkv[:, 0:D].astype(mxu_dtype)
    k = qkv[:, D:2 * D].astype(mxu_dtype)
    v = qkv[:, 2 * D:3 * D].astype(mxu_dtype)

    scale = 1.0 / math.sqrt(d_k)
    # Mask hoisted out of the head loop as an additive bias (one compare total).
    neg_bias = jnp.where(mask == 0.0, jnp.float32(-1e9), jnp.float32(0.0))  # (1, S)

    for h in range(heads):                                    # static unrolled
        lo = h * d_k
        qh = q[:, lo:lo + d_k]                                # (S, d_k)
        kh = k[:, lo:lo + d_k]
        vh = v[:, lo:lo + d_k]
        s = lax.dot_general(qh, kh, (((1,), (1,)), ((), ())),
                            preferred_element_type=f32) * scale + neg_bias  # (S,S)
        s = s - jnp.max(s, axis=-1, keepdims=True)
        p = jnp.exp(s)                                        # unnormalized probs
        denom = jnp.sum(p, axis=-1, keepdims=True)
        oh = jnp.dot(p.astype(mxu_dtype), vh, preferred_element_type=f32)   # (S,d_k)
        # Deferred softmax normalization: scale the (S, d_k) output, not (S, S) probs.
        concat_ref[:, lo:lo + d_k] = oh * pl.reciprocal(denom, approx=True)

    # Single full-K output projection (== concat @ Wo).
    attn = jnp.dot(concat_ref[...].astype(mxu_dtype), wo_ref[...],
                   preferred_element_type=f32) + bo_ref[...]
    x = x + attn                                              # dropout_1 = identity

    # ---------------------- feed-forward (residual) ------------------------
    x2 = norm(x, a2_ref, g2_ref).astype(mxu_dtype)
    DFF = w1_ref.shape[1]
    ff = jnp.zeros_like(x)
    for c0 in range(0, DFF, dff_chunk):                       # bound (S, DFF) interm.
        h1 = jnp.dot(x2, w1_ref[:, c0:c0 + dff_chunk], preferred_element_type=f32)
        h1 = jnp.maximum(h1 + b1_ref[:, c0:c0 + dff_chunk], 0.0)
        ff = ff + jnp.dot(h1.astype(mxu_dtype), w2_ref[c0:c0 + dff_chunk, :],
                          preferred_element_type=f32)
    o_ref[0] = (x + ff + b2_ref[...]).astype(o_ref.dtype)     # dropout_2 = identity


def encoder_layer(x, mask, params, *, heads, eps=1e-6, mxu_dtype=jnp.bfloat16):
    """x: (B, S, D) ; mask: (B, 1, S) ; params: dict of weights in (in, out) layout."""
    B, S, D = x.shape
    d_k = D // heads
    DFF = params["w1"].shape[1]
    dff_chunk = 512 if DFF % 512 == 0 else DFF
    f32 = jnp.float32

    # Fuse QKV weights in the wrapper; store matmul weights in the MXU dtype.
    wqkv = jnp.concatenate([params["wq"], params["wk"], params["wv"]],
                           axis=1).astype(mxu_dtype)
    bqkv = jnp.concatenate([params["bq"], params["bk"], params["bv"]],
                           axis=1).astype(f32)
    args = (x, mask,
            params["a1"].astype(f32), params["g1"].astype(f32),
            wqkv, bqkv,
            params["wo"].astype(mxu_dtype), params["bo"].astype(f32),
            params["a2"].astype(f32), params["g2"].astype(f32),
            params["w1"].astype(mxu_dtype), params["b1"].astype(f32),
            params["w2"].astype(mxu_dtype), params["b2"].astype(f32))

    # Scoped-VMEM budget per generation (~3/4 of capacity, capped at 100 MiB).
    try:
        vmem_cap = pltpu.get_tpu_info().vmem_capacity_bytes
    except Exception:
        vmem_cap = 64 * 1024 * 1024
    vmem_limit = int(min(vmem_cap * 3 // 4, 100 * 1024 * 1024))

    wbytes = jnp.dtype(mxu_dtype).itemsize
    cost = pl.CostEstimate(
        flops=int(B * (8 * S * D * D + 4 * S * S * D + 4 * S * D * DFF)),
        transcendentals=int(B * (heads * S * S + 4 * S)),
        bytes_accessed=int(2 * B * S * D * 4 + B * S * 4
                           + (4 * D * D + 2 * D * DFF) * wbytes
                           + (9 * D + DFF) * 4),
    )

    kernel = functools.partial(_encoder_layer_kernel, heads=heads, d_k=d_k,
                               eps=eps, dff_chunk=dff_chunk, mxu_dtype=mxu_dtype)

    def build(single_buffer_weights):
        def const(shape):
            kw = ({"pipeline_mode": pl.Buffered(1)}
                  if single_buffer_weights else {})
            return pl.BlockSpec(shape, lambda b: (0, 0), **kw)

        return pl.pallas_call(
            kernel,
            out_shape=jax.ShapeDtypeStruct((B, S, D), x.dtype),
            grid_spec=pltpu.PrefetchScalarGridSpec(
                num_scalar_prefetch=0,
                grid=(B,),
                in_specs=[
                    pl.BlockSpec((1, S, D), lambda b: (b, 0, 0)),   # x
                    pl.BlockSpec((1, 1, S), lambda b: (b, 0, 0)),   # mask
                    const((1, D)), const((1, D)),                   # norm1 alpha, bias
                    const((D, 3 * D)), const((1, 3 * D)),           # fused Wqkv, bqkv
                    const((D, D)), const((1, D)),                   # Wo, bo
                    const((1, D)), const((1, D)),                   # norm2 alpha, bias
                    const((D, DFF)), const((1, DFF)),               # W1, b1
                    const((DFF, D)), const((1, D)),                 # W2, b2
                ],
                out_specs=pl.BlockSpec((1, S, D), lambda b: (b, 0, 0)),
                scratch_shapes=[pltpu.VMEM((S, D), jnp.float32)],   # head concat
            ),
            compiler_params=pltpu.CompilerParams(
                dimension_semantics=("parallel",),
                vmem_limit_bytes=vmem_limit),
            cost_estimate=cost,
        )

    try:
        return build(True)(*args)
    except Exception:
        # Fallback if pipeline_mode=pl.Buffered(1) is unsupported by this build.
        return build(False)(*args)


def encoder_layer_ref(x, mask, params, *, heads, eps=1e-6):
    """Pure-JAX f32 reference mirroring the PyTorch module (eval mode)."""
    B, S, D = x.shape
    d_k = D // heads

    def norm(v, a, b):
        mean = jnp.mean(v, axis=-1, keepdims=True)
        c = v - mean
        var = jnp.sum(c * c, axis=-1, keepdims=True) / (v.shape[-1] - 1)
        return a * c / (jnp.sqrt(var) + eps) + b

    x2 = norm(x, params["a1"], params["g1"])
    q = x2 @ params["wq"] + params["bq"]
    k = x2 @ params["wk"] + params["bk"]
    v = x2 @ params["wv"] + params["bv"]
    split = lambda t: t.reshape(B, S, heads, d_k).transpose(0, 2, 1, 3)
    qh, kh, vh = split(q), split(k), split(v)
    scores = jnp.einsum("bhqd,bhkd->bhqk", qh, kh) / math.sqrt(d_k)
    scores = jnp.where(mask[:, None, :, :] == 0.0, -1e9, scores)
    p = jax.nn.softmax(scores, axis=-1)
    attn = jnp.einsum("bhqk,bhkd->bhqd", p, vh)
    concat = attn.transpose(0, 2, 1, 3).reshape(B, S, D)
    x = x + concat @ params["wo"] + params["bo"]
    x2 = norm(x, params["a2"], params["g2"])
    ff = jnp.maximum(x2 @ params["w1"] + params["b1"], 0.0) @ params["w2"] + params["b2"]
    return x + ff


if __name__ == "__main__":
    B, S, D, H, DFF = 2, 8, 32, 4, 2048

    key = jax.random.PRNGKey(0)
    ks = jax.random.split(key, 8)

    def linear(kk, fan_in, fan_out):
        k1, k2 = jax.random.split(kk)
        bound = 1.0 / math.sqrt(fan_in)
        w = jax.random.uniform(k1, (fan_in, fan_out), jnp.float32, -bound, bound)
        b = jax.random.uniform(k2, (1, fan_out), jnp.float32, -bound, bound)
        return w, b

    x = jax.random.normal(ks[0], (B, S, D), dtype=jnp.float32)
    # padding mask: mask out the last two key positions of batch element 0
    mask = jnp.ones((B, 1, S), dtype=jnp.float32).at[0, 0, S - 2:].set(0.0)

    wq, bq = linear(ks[1], D, D)
    wk, bk = linear(ks[2], D, D)
    wv, bv = linear(ks[3], D, D)
    wo, bo = linear(ks[4], D, D)
    w1, b1 = linear(ks[5], D, DFF)
    w2, b2 = linear(ks[6], DFF, D)

    params = dict(
        a1=jnp.ones((1, D), jnp.float32), g1=jnp.zeros((1, D), jnp.float32),
        a2=jnp.ones((1, D), jnp.float32), g2=jnp.zeros((1, D), jnp.float32),
        wq=wq, bq=bq, wk=wk, bk=bk, wv=wv, bv=bv, wo=wo, bo=bo,
        w1=w1, b1=b1, w2=w2, b2=b2)

    y = encoder_layer(x, mask, params, heads=H)
    y = jax.block_until_ready(y)

    ref = encoder_layer_ref(x, mask, params, heads=H)
    err = jnp.max(jnp.abs(y - ref))
    # bf16 MXU operands + approx reciprocal -> slightly looser tolerance than pure f32.
    assert jnp.allclose(y, ref, atol=5e-2, rtol=5e-2), (
        f"mismatch vs reference: max abs err = {err}")

    print("KERNEL_OK")
</pallas_src>

<mosaic_0001>
module attributes {stable_mosaic.version = 11 : i64} {
  func.func @_encoder_layer_kernel(%arg0: i32, %arg1: memref<1x8x32xf32, #tpu.memory_space<vmem>>, %arg2: memref<1x1x8xf32, #tpu.memory_space<vmem>>, %arg3: memref<1x32xf32, #tpu.memory_space<vmem>>, %arg4: memref<1x32xf32, #tpu.memory_space<vmem>>, %arg5: memref<32x96xbf16, #tpu.memory_space<vmem>>, %arg6: memref<1x96xf32, #tpu.memory_space<vmem>>, %arg7: memref<32x32xbf16, #tpu.memory_space<vmem>>, %arg8: memref<1x32xf32, #tpu.memory_space<vmem>>, %arg9: memref<1x32xf32, #tpu.memory_space<vmem>>, %arg10: memref<1x32xf32, #tpu.memory_space<vmem>>, %arg11: memref<32x2048xbf16, #tpu.memory_space<vmem>>, %arg12: memref<1x2048xf32, #tpu.memory_space<vmem>>, %arg13: memref<2048x32xbf16, #tpu.memory_space<vmem>>, %arg14: memref<1x32xf32, #tpu.memory_space<vmem>>, %arg15: memref<1x8x32xf32, #tpu.memory_space<vmem>>, %arg16: memref<8x32xf32, #tpu.memory_space<vmem>>) attributes {dimension_semantics = [#tpu.dimension_semantics<parallel>], iteration_bounds = array<i64: 2>, scalar_prefetch = 0 : i64, scratch_operands = 1 : i64, tpu.core_type = #tpu.core_type<tc>, window_params = [{transform_indices = @transform_0, window_bounds = array<i64: 1, 8, 32>}, {transform_indices = @transform_1, window_bounds = array<i64: 1, 1, 8>}, {pipeline_mode = #tpu.pipeline_mode<synchronous>, transform_indices = @transform_2, window_bounds = array<i64: 1, 32>}, {pipeline_mode = #tpu.pipeline_mode<synchronous>, transform_indices = @transform_3, window_bounds = array<i64: 1, 32>}, {pipeline_mode = #tpu.pipeline_mode<synchronous>, transform_indices = @transform_4, window_bounds = array<i64: 32, 96>}, {pipeline_mode = #tpu.pipeline_mode<synchronous>, transform_indices = @transform_5, window_bounds = array<i64: 1, 96>}, {pipeline_mode = #tpu.pipeline_mode<synchronous>, transform_indices = @transform_6, window_bounds = array<i64: 32, 32>}, {pipeline_mode = #tpu.pipeline_mode<synchronous>, transform_indices = @transform_7, window_bounds = array<i64: 1, 32>}, {pipeline_mode = #tpu.pipeline_mode<synchronous>, transform_indices = @transform_8, window_bounds = array<i64: 1, 32>}, {pipeline_mode = #tpu.pipeline_mode<synchronous>, transform_indices = @transform_9, window_bounds = array<i64: 1, 32>}, {pipeline_mode = #tpu.pipeline_mode<synchronous>, transform_indices = @transform_10, window_bounds = array<i64: 32, 2048>}, {pipeline_mode = #tpu.pipeline_mode<synchronous>, transform_indices = @transform_11, window_bounds = array<i64: 1, 2048>}, {pipeline_mode = #tpu.pipeline_mode<synchronous>, transform_indices = @transform_12, window_bounds = array<i64: 2048, 32>}, {pipeline_mode = #tpu.pipeline_mode<synchronous>, transform_indices = @transform_13, window_bounds = array<i64: 1, 32>}, {transform_indices = @transform_14, window_bounds = array<i64: 1, 8, 32>}]} {
    %c0 = arith.constant 0 : index
    %c0_0 = arith.constant 0 : index
    %c0_1 = arith.constant 0 : index
    %0 = vector.load %arg1[%c0, %c0_0, %c0_1] : memref<1x8x32xf32, #tpu.memory_space<vmem>>, vector<1x8x32xf32>
    %1 = vector.shape_cast %0 : vector<1x8x32xf32> to vector<8x32xf32>
    %c0_2 = arith.constant 0 : index
    %c0_3 = arith.constant 0 : index
    %c0_4 = arith.constant 0 : index
    %2 = vector.load %arg2[%c0_2, %c0_3, %c0_4] : memref<1x1x8xf32, #tpu.memory_space<vmem>>, vector<1x1x8xf32>
    %3 = vector.shape_cast %2 : vector<1x1x8xf32> to vector<1x8xf32>
    %cst = arith.constant dense<0.000000e+00> : vector<8xf32>
    %4 = vector.multi_reduction <add>, %1, %cst [1] : vector<8x32xf32> to vector<8xf32>
    %5 = vector.shape_cast %4 : vector<8xf32> to vector<8x1xf32>
    %cst_5 = arith.constant 3.200000e+01 : f32
    %6 = vector.broadcast %cst_5 : f32 to vector<8x1xf32>
    %7 = arith.divf %5, %6 : vector<8x1xf32>
    %8 = vector.broadcast %7 : vector<8x1xf32> to vector<8x32xf32>
    %9 = arith.subf %1, %8 : vector<8x32xf32>
    %10 = arith.mulf %9, %9 : vector<8x32xf32>
    %cst_6 = arith.constant dense<0.000000e+00> : vector<8xf32>
    %11 = vector.multi_reduction <add>, %10, %cst_6 [1] : vector<8x32xf32> to vector<8xf32>
    %12 = vector.shape_cast %11 : vector<8xf32> to vector<8x1xf32>
    %cst_7 = arith.constant 0.0322580636 : f32
    %13 = vector.broadcast %cst_7 : f32 to vector<8x1xf32>
    %14 = arith.mulf %12, %13 : vector<8x1xf32>
    %15 = math.sqrt %14 : vector<8x1xf32>
    %cst_8 = arith.constant 9.99999997E-7 : f32
    %16 = vector.broadcast %cst_8 : f32 to vector<8x1xf32>
    %17 = arith.addf %15, %16 : vector<8x1xf32>
    %18 = tpu.reciprocal %17 {approx = true} : vector<8x1xf32> -> vector<8x1xf32>
    %c0_9 = arith.constant 0 : index
    %c0_10 = arith.constant 0 : index
    %19 = vector.load %arg3[%c0_9, %c0_10] : memref<1x32xf32, #tpu.memory_space<vmem>>, vector<1x32xf32>
    %20 = vector.broadcast %19 : vector<1x32xf32> to vector<8x32xf32>
    %21 = arith.mulf %20, %9 : vector<8x32xf32>
    %22 = vector.broadcast %18 : vector<8x1xf32> to vector<8x32xf32>
    %23 = arith.mulf %21, %22 : vector<8x32xf32>
    %c0_11 = arith.constant 0 : index
    %c0_12 = arith.constant 0 : index
    %24 = vector.load %arg4[%c0_11, %c0_12] : memref<1x32xf32, #tpu.memory_space<vmem>>, vector<1x32xf32>
    %25 = vector.broadcast %24 : vector<1x32xf32> to vector<8x32xf32>
    %26 = arith.addf %23, %25 : vector<8x32xf32>
    %27 = arith.truncf %26 : vector<8x32xf32> to vector<8x32xbf16>
    %c0_13 = arith.constant 0 : index
    %c0_14 = arith.constant 0 : index
    %28 = vector.load %arg5[%c0_13, %c0_14] : memref<32x96xbf16, #tpu.memory_space<vmem>>, vector<32x96xbf16>
    %cst_15 = arith.constant dense<0.000000e+00> : vector<8x96xf32>
    %29 = tpu.matmul %27, %28, %cst_15 {dimension_numbers = #tpu.dot_dimension_numbers<[1], [0], [0], [1], [0, 0, 1, 1], [], []>} : vector<8x32xbf16>, vector<32x96xbf16>, vector<8x96xf32> -> vector<8x96xf32>
    %c0_16 = arith.constant 0 : index
    %c0_17 = arith.constant 0 : index
    %30 = vector.load %arg6[%c0_16, %c0_17] : memref<1x96xf32, #tpu.memory_space<vmem>>, vector<1x96xf32>
    %31 = vector.broadcast %30 : vector<1x96xf32> to vector<8x96xf32>
    %32 = arith.addf %29, %31 : vector<8x96xf32>
    %33 = vector.extract_strided_slice %32 {offsets = [0, 0], sizes = [8, 32], strides = [1, 1]} : vector<8x96xf32> to vector<8x32xf32>
    %34 = arith.truncf %33 : vector<8x32xf32> to vector<8x32xbf16>
    %35 = vector.extract_strided_slice %32 {offsets = [0, 32], sizes = [8, 32], strides = [1, 1]} : vector<8x96xf32> to vector<8x32xf32>
    %36 = arith.truncf %35 : vector<8x32xf32> to vector<8x32xbf16>
    %37 = vector.extract_strided_slice %32 {offsets = [0, 64], sizes = [8, 32], strides = [1, 1]} : vector<8x96xf32> to vector<8x32xf32>
    %38 = arith.truncf %37 : vector<8x32xf32> to vector<8x32xbf16>
    %cst_18 = arith.constant 0.000000e+00 : f32
    %39 = vector.broadcast %cst_18 : f32 to vector<1x8xf32>
    %40 = arith.cmpf oeq, %3, %39 : vector<1x8xf32>
    %cst_19 = arith.constant -1.000000e+09 : f32
    %cst_20 = arith.constant 0.000000e+00 : f32
    %41 = vector.broadcast %cst_19 : f32 to vector<1x8xf32>
    %42 = vector.broadcast %cst_20 : f32 to vector<1x8xf32>
    %43 = arith.select %40, %41, %42 : vector<1x8xi1>, vector<1x8xf32>
    %44 = vector.extract_strided_slice %34 {offsets = [0, 0], sizes = [8, 8], strides = [1, 1]} : vector<8x32xbf16> to vector<8x8xbf16>
    %45 = vector.extract_strided_slice %36 {offsets = [0, 0], sizes = [8, 8], strides = [1, 1]} : vector<8x32xbf16> to vector<8x8xbf16>
    %46 = vector.extract_strided_slice %38 {offsets = [0, 0], sizes = [8, 8], strides = [1, 1]} : vector<8x32xbf16> to vector<8x8xbf16>
    %cst_21 = arith.constant dense<0.000000e+00> : vector<8x8xf32>
    %47 = tpu.matmul %44, %45, %cst_21 {dimension_numbers = #tpu.dot_dimension_numbers<[1], [1], [0], [0], [0, 0, 1, 0], [], []>} : vector<8x8xbf16>, vector<8x8xbf16>, vector<8x8xf32> -> vector<8x8xf32>
    %cst_22 = arith.constant 0.353553385 : f32
    %48 = vector.broadcast %cst_22 : f32 to vector<8x8xf32>
    %49 = arith.mulf %47, %48 : vector<8x8xf32>
    %50 = vector.broadcast %43 : vector<1x8xf32> to vector<8x8xf32>
    %51 = arith.addf %49, %50 : vector<8x8xf32>
    %cst_23 = arith.constant dense<0xFF800000> : vector<8xf32>
    %52 = vector.multi_reduction <maximumf>, %51, %cst_23 [1] : vector<8x8xf32> to vector<8xf32>
    %53 = vector.shape_cast %52 : vector<8xf32> to vector<8x1xf32>
    %54 = vector.broadcast %53 : vector<8x1xf32> to vector<8x8xf32>
    %55 = arith.subf %51, %54 : vector<8x8xf32>
    %56 = math.exp %55 : vector<8x8xf32>
    %cst_24 = arith.constant dense<0.000000e+00> : vector<8xf32>
    %57 = vector.multi_reduction <add>, %56, %cst_24 [1] : vector<8x8xf32> to vector<8xf32>
    %58 = vector.shape_cast %57 : vector<8xf32> to vector<8x1xf32>
    %59 = arith.truncf %56 : vector<8x8xf32> to vector<8x8xbf16>
    %cst_25 = arith.constant dense<0.000000e+00> : vector<8x8xf32>
    %60 = tpu.matmul %59, %46, %cst_25 {dimension_numbers = #tpu.dot_dimension_numbers<[1], [0], [0], [1], [0, 0, 1, 1], [], []>} : vector<8x8xbf16>, vector<8x8xbf16>, vector<8x8xf32> -> vector<8x8xf32>
    %61 = tpu.reciprocal %58 {approx = true} : vector<8x1xf32> -> vector<8x1xf32>
    %62 = vector.broadcast %61 : vector<8x1xf32> to vector<8x8xf32>
    %63 = arith.mulf %60, %62 : vector<8x8xf32>
    %c0_26 = arith.constant 0 : index
    %c0_27 = arith.constant 0 : index
    %64 = vector.load %arg16[%c0_26, %c0_27] : memref<8x32xf32, #tpu.memory_space<vmem>>, vector<8x8xf32>
    tpu.vector_store %arg16[%c0_26, %c0_27], %63 {strides = array<i32>} : memref<8x32xf32, #tpu.memory_space<vmem>>, vector<8x8xf32>,
    %65 = vector.extract_strided_slice %34 {offsets = [0, 8], sizes = [8, 8], strides = [1, 1]} : vector<8x32xbf16> to vector<8x8xbf16>
    %66 = vector.extract_strided_slice %36 {offsets = [0, 8], sizes = [8, 8], strides = [1, 1]} : vector<8x32xbf16> to vector<8x8xbf16>
    %67 = vector.extract_strided_slice %38 {offsets = [0, 8], sizes = [8, 8], strides = [1, 1]} : vector<8x32xbf16> to vector<8x8xbf16>
    %cst_28 = arith.constant dense<0.000000e+00> : vector<8x8xf32>
    %68 = tpu.matmul %65, %66, %cst_28 {dimension_numbers = #tpu.dot_dimension_numbers<[1], [1], [0], [0], [0, 0, 1, 0], [], []>} : vector<8x8xbf16>, vector<8x8xbf16>, vector<8x8xf32> -> vector<8x8xf32>
    %cst_29 = arith.constant 0.353553385 : f32
    %69 = vector.broadcast %cst_29 : f32 to vector<8x8xf32>
    %70 = arith.mulf %68, %69 : vector<8x8xf32>
    %71 = vector.broadcast %43 : vector<1x8xf32> to vector<8x8xf32>
    %72 = arith.addf %70, %71 : vector<8x8xf32>
    %cst_30 = arith.constant dense<0xFF800000> : vector<8xf32>
    %73 = vector.multi_reduction <maximumf>, %72, %cst_30 [1] : vector<8x8xf32> to vector<8xf32>
    %74 = vector.shape_cast %73 : vector<8xf32> to vector<8x1xf32>
    %75 = vector.broadcast %74 : vector<8x1xf32> to vector<8x8xf32>
    %76 = arith.subf %72, %75 : vector<8x8xf32>
    %77 = math.exp %76 : vector<8x8xf32>
    %cst_31 = arith.constant dense<0.000000e+00> : vector<8xf32>
    %78 = vector.multi_reduction <add>, %77, %cst_31 [1] : vector<8x8xf32> to vector<8xf32>
    %79 = vector.shape_cast %78 : vector<8xf32> to vector<8x1xf32>
    %80 = arith.truncf %77 : vector<8x8xf32> to vector<8x8xbf16>
    %cst_32 = arith.constant dense<0.000000e+00> : vector<8x8xf32>
    %81 = tpu.matmul %80, %67, %cst_32 {dimension_numbers = #tpu.dot_dimension_numbers<[1], [0], [0], [1], [0, 0, 1, 1], [], []>} : vector<8x8xbf16>, vector<8x8xbf16>, vector<8x8xf32> -> vector<8x8xf32>
    %82 = tpu.reciprocal %79 {approx = true} : vector<8x1xf32> -> vector<8x1xf32>
    %83 = vector.broadcast %82 : vector<8x1xf32> to vector<8x8xf32>
    %84 = arith.mulf %81, %83 : vector<8x8xf32>
    %c0_33 = arith.constant 0 : index
    %c8 = arith.constant 8 : index
    %85 = vector.load %arg16[%c0_33, %c8] : memref<8x32xf32, #tpu.memory_space<vmem>>, vector<8x8xf32>
    tpu.vector_store %arg16[%c0_33, %c8], %84 {strides = array<i32>} : memref<8x32xf32, #tpu.memory_space<vmem>>, vector<8x8xf32>,
    %86 = vector.extract_strided_slice %34 {offsets = [0, 16], sizes = [8, 8], strides = [1, 1]} : vector<8x32xbf16> to vector<8x8xbf16>
    %87 = vector.extract_strided_slice %36 {offsets = [0, 16], sizes = [8, 8], strides = [1, 1]} : vector<8x32xbf16> to vector<8x8xbf16>
    %88 = vector.extract_strided_slice %38 {offsets = [0, 16], sizes = [8, 8], strides = [1, 1]} : vector<8x32xbf16> to vector<8x8xbf16>
    %cst_34 = arith.constant dense<0.000000e+00> : vector<8x8xf32>
    %89 = tpu.matmul %86, %87, %cst_34 {dimension_numbers = #tpu.dot_dimension_numbers<[1], [1], [0], [0], [0, 0, 1, 0], [], []>} : vector<8x8xbf16>, vector<8x8xbf16>, vector<8x8xf32> -> vector<8x8xf32>
    %cst_35 = arith.constant 0.353553385 : f32
    %90 = vector.broadcast %cst_35 : f32 to vector<8x8xf32>
    %91 = arith.mulf %89, %90 : vector<8x8xf32>
    %92 = vector.broadcast %43 : vector<1x8xf32> to vector<8x8xf32>
    %93 = arith.addf %91, %92 : vector<8x8xf32>
    %cst_36 = arith.constant dense<0xFF800000> : vector<8xf32>
    %94 = vector.multi_reduction <maximumf>, %93, %cst_36 [1] : vector<8x8xf32> to vector<8xf32>
    %95 = vector.shape_cast %94 : vector<8xf32> to vector<8x1xf32>
    %96 = vector.broadcast %95 : vector<8x1xf32> to vector<8x8xf32>
    %97 = arith.subf %93, %96 : vector<8x8xf32>
    %98 = math.exp %97 : vector<8x8xf32>
    %cst_37 = arith.constant dense<0.000000e+00> : vector<8xf32>
    %99 = vector.multi_reduction <add>, %98, %cst_37 [1] : vector<8x8xf32> to vector<8xf32>
    %100 = vector.shape_cast %99 : vector<8xf32> to vector<8x1xf32>
    %101 = arith.truncf %98 : vector<8x8xf32> to vector<8x8xbf16>
    %cst_38 = arith.constant dense<0.000000e+00> : vector<8x8xf32>
    %102 = tpu.matmul %101, %88, %cst_38 {dimension_numbers = #tpu.dot_dimension_numbers<[1], [0], [0], [1], [0, 0, 1, 1], [], []>} : vector<8x8xbf16>, vector<8x8xbf16>, vector<8x8xf32> -> vector<8x8xf32>
    %103 = tpu.reciprocal %100 {approx = true} : vector<8x1xf32> -> vector<8x1xf32>
    %104 = vector.broadcast %103 : vector<8x1xf32> to vector<8x8xf32>
    %105 = arith.mulf %102, %104 : vector<8x8xf32>
    %c0_39 = arith.constant 0 : index
    %c16 = arith.constant 16 : index
    %106 = vector.load %arg16[%c0_39, %c16] : memref<8x32xf32, #tpu.memory_space<vmem>>, vector<8x8xf32>
    tpu.vector_store %arg16[%c0_39, %c16], %105 {strides = array<i32>} : memref<8x32xf32, #tpu.memory_space<vmem>>, vector<8x8xf32>,
    %107 = vector.extract_strided_slice %34 {offsets = [0, 24], sizes = [8, 8], strides = [1, 1]} : vector<8x32xbf16> to vector<8x8xbf16>
    %108 = vector.extract_strided_slice %36 {offsets = [0, 24], sizes = [8, 8], strides = [1, 1]} : vector<8x32xbf16> to vector<8x8xbf16>
    %109 = vector.extract_strided_slice %38 {offsets = [0, 24], sizes = [8, 8], strides = [1, 1]} : vector<8x32xbf16> to vector<8x8xbf16>
    %cst_40 = arith.constant dense<0.000000e+00> : vector<8x8xf32>
    %110 = tpu.matmul %107, %108, %cst_40 {dimension_numbers = #tpu.dot_dimension_numbers<[1], [1], [0], [0], [0, 0, 1, 0], [], []>} : vector<8x8xbf16>, vector<8x8xbf16>, vector<8x8xf32> -> vector<8x8xf32>
    %cst_41 = arith.constant 0.353553385 : f32
    %111 = vector.broadcast %cst_41 : f32 to vector<8x8xf32>
    %112 = arith.mulf %110, %111 : vector<8x8xf32>
    %113 = vector.broadcast %43 : vector<1x8xf32> to vector<8x8xf32>
    %114 = arith.addf %112, %113 : vector<8x8xf32>
    %cst_42 = arith.constant dense<0xFF800000> : vector<8xf32>
    %115 = vector.multi_reduction <maximumf>, %114, %cst_42 [1] : vector<8x8xf32> to vector<8xf32>
    %116 = vector.shape_cast %115 : vector<8xf32> to vector<8x1xf32>
    %117 = vector.broadcast %116 : vector<8x1xf32> to vector<8x8xf32>
    %118 = arith.subf %114, %117 : vector<8x8xf32>
    %119 = math.exp %118 : vector<8x8xf32>
    %cst_43 = arith.constant dense<0.000000e+00> : vector<8xf32>
    %120 = vector.multi_reduction <add>, %119, %cst_43 [1] : vector<8x8xf32> to vector<8xf32>
    %121 = vector.shape_cast %120 : vector<8xf32> to vector<8x1xf32>
    %122 = arith.truncf %119 : vector<8x8xf32> to vector<8x8xbf16>
    %cst_44 = arith.constant dense<0.000000e+00> : vector<8x8xf32>
    %123 = tpu.matmul %122, %109, %cst_44 {dimension_numbers = #tpu.dot_dimension_numbers<[1], [0], [0], [1], [0, 0, 1, 1], [], []>} : vector<8x8xbf16>, vector<8x8xbf16>, vector<8x8xf32> -> vector<8x8xf32>
    %124 = tpu.reciprocal %121 {approx = true} : vector<8x1xf32> -> vector<8x1xf32>
    %125 = vector.broadcast %124 : vector<8x1xf32> to vector<8x8xf32>
    %126 = arith.mulf %123, %125 : vector<8x8xf32>
    %c0_45 = arith.constant 0 : index
    %c24 = arith.constant 24 : index
    %127 = vector.load %arg16[%c0_45, %c24] : memref<8x32xf32, #tpu.memory_space<vmem>>, vector<8x8xf32>
    tpu.vector_store %arg16[%c0_45, %c24], %126 {strides = array<i32>} : memref<8x32xf32, #tpu.memory_space<vmem>>, vector<8x8xf32>,
    %c0_46 = arith.constant 0 : index
    %c0_47 = arith.constant 0 : index
    %128 = vector.load %arg16[%c0_46, %c0_47] : memref<8x32xf32, #tpu.memory_space<vmem>>, vector<8x32xf32>
    %129 = arith.truncf %128 : vector<8x32xf32> to vector<8x32xbf16>
    %c0_48 = arith.constant 0 : index
    %c0_49 = arith.constant 0 : index
    %130 = vector.load %arg7[%c0_48, %c0_49] : memref<32x32xbf16, #tpu.memory_space<vmem>>, vector<32x32xbf16>
    %cst_50 = arith.constant dense<0.000000e+00> : vector<8x32xf32>
    %131 = tpu.matmul %129, %130, %cst_50 {dimension_numbers = #tpu.dot_dimension_numbers<[1], [0], [0], [1], [0, 0, 1, 1], [], []>} : vector<8x32xbf16>, vector<32x32xbf16>, vector<8x32xf32> -> vector<8x32xf32>
    %c0_51 = arith.constant 0 : index
    %c0_52 = arith.constant 0 : index
    %132 = vector.load %arg8[%c0_51, %c0_52] : memref<1x32xf32, #tpu.memory_space<vmem>>, vector<1x32xf32>
    %133 = vector.broadcast %132 : vector<1x32xf32> to vector<8x32xf32>
    %134 = arith.addf %131, %133 : vector<8x32xf32>
    %135 = arith.addf %1, %134 : vector<8x32xf32>
    %cst_53 = arith.constant dense<0.000000e+00> : vector<8xf32>
    %136 = vector.multi_reduction <add>, %135, %cst_53 [1] : vector<8x32xf32> to vector<8xf32>
    %137 = vector.shape_cast %136 : vector<8xf32> to vector<8x1xf32>
    %cst_54 = arith.constant 3.200000e+01 : f32
    %138 = vector.broadcast %cst_54 : f32 to vector<8x1xf32>
    %139 = arith.divf %137, %138 : vector<8x1xf32>
    %140 = vector.broadcast %139 : vector<8x1xf32> to vector<8x32xf32>
    %141 = arith.subf %135, %140 : vector<8x32xf32>
    %142 = arith.mulf %141, %141 : vector<8x32xf32>
    %cst_55 = arith.constant dense<0.000000e+00> : vector<8xf32>
    %143 = vector.multi_reduction <add>, %142, %cst_55 [1] : vector<8x32xf32> to vector<8xf32>
    %144 = vector.shape_cast %143 : vector<8xf32> to vector<8x1xf32>
    %cst_56 = arith.constant 0.0322580636 : f32
    %145 = vector.broadcast %cst_56 : f32 to vector<8x1xf32>
    %146 = arith.mulf %144, %145 : vector<8x1xf32>
    %147 = math.sqrt %146 : vector<8x1xf32>
    %cst_57 = arith.constant 9.99999997E-7 : f32
    %148 = vector.broadcast %cst_57 : f32 to vector<8x1xf32>
    %149 = arith.addf %147, %148 : vector<8x1xf32>
    %150 = tpu.reciprocal %149 {approx = true} : vector<8x1xf32> -> vector<8x1xf32>
    %c0_58 = arith.constant 0 : index
    %c0_59 = arith.constant 0 : index
    %151 = vector.load %arg9[%c0_58, %c0_59] : memref<1x32xf32, #tpu.memory_space<vmem>>, vector<1x32xf32>
    %152 = vector.broadcast %151 : vector<1x32xf32> to vector<8x32xf32>
    %153 = arith.mulf %152, %141 : vector<8x32xf32>
    %154 = vector.broadcast %150 : vector<8x1xf32> to vector<8x32xf32>
    %155 = arith.mulf %153, %154 : vector<8x32xf32>
    %c0_60 = arith.constant 0 : index
    %c0_61 = arith.constant 0 : index
    %156 = vector.load %arg10[%c0_60, %c0_61] : memref<1x32xf32, #tpu.memory_space<vmem>>, vector<1x32xf32>
    %157 = vector.broadcast %156 : vector<1x32xf32> to vector<8x32xf32>
    %158 = arith.addf %155, %157 : vector<8x32xf32>
    %159 = arith.truncf %158 : vector<8x32xf32> to vector<8x32xbf16>
    %cst_62 = arith.constant 0.000000e+00 : f32
    %160 = vector.broadcast %cst_62 : f32 to vector<8x32xf32>
    %c0_63 = arith.constant 0 : index
    %c0_64 = arith.constant 0 : index
    %161 = vector.load %arg11[%c0_63, %c0_64] : memref<32x2048xbf16, #tpu.memory_space<vmem>>, vector<32x512xbf16>
    %cst_65 = arith.constant dense<0.000000e+00> : vector<8x512xf32>
    %162 = tpu.matmul %159, %161, %cst_65 {dimension_numbers = #tpu.dot_dimension_numbers<[1], [0], [0], [1], [0, 0, 1, 1], [], []>} : vector<8x32xbf16>, vector<32x512xbf16>, vector<8x512xf32> -> vector<8x512xf32>
    %c0_66 = arith.constant 0 : index
    %c0_67 = arith.constant 0 : index
    %163 = vector.load %arg12[%c0_66, %c0_67] : memref<1x2048xf32, #tpu.memory_space<vmem>>, vector<1x512xf32>
    %164 = vector.broadcast %163 : vector<1x512xf32> to vector<8x512xf32>
    %165 = arith.addf %162, %164 : vector<8x512xf32>
    %cst_68 = arith.constant 0.000000e+00 : f32
    %166 = vector.broadcast %cst_68 : f32 to vector<8x512xf32>
    %167 = arith.maximumf %165, %166 : vector<8x512xf32>
    %168 = arith.truncf %167 : vector<8x512xf32> to vector<8x512xbf16>
    %c0_69 = arith.constant 0 : index
    %c0_70 = arith.constant 0 : index
    %169 = vector.load %arg13[%c0_69, %c0_70] : memref<2048x32xbf16, #tpu.memory_space<vmem>>, vector<512x32xbf16>
    %cst_71 = arith.constant dense<0.000000e+00> : vector<8x32xf32>
    %170 = tpu.matmul %168, %169, %cst_71 {dimension_numbers = #tpu.dot_dimension_numbers<[1], [0], [0], [1], [0, 0, 1, 1], [], []>} : vector<8x512xbf16>, vector<512x32xbf16>, vector<8x32xf32> -> vector<8x32xf32>
    %171 = arith.addf %160, %170 : vector<8x32xf32>
    %c0_72 = arith.constant 0 : index
    %c512 = arith.constant 512 : index
    %172 = vector.load %arg11[%c0_72, %c512] : memref<32x2048xbf16, #tpu.memory_space<vmem>>, vector<32x512xbf16>
    %cst_73 = arith.constant dense<0.000000e+00> : vector<8x512xf32>
    %173 = tpu.matmul %159, %172, %cst_73 {dimension_numbers = #tpu.dot_dimension_numbers<[1], [0], [0], [1], [0, 0, 1, 1], [], []>} : vector<8x32xbf16>, vector<32x512xbf16>, vector<8x512xf32> -> vector<8x512xf32>
    %c0_74 = arith.constant 0 : index
    %c512_75 = arith.constant 512 : index
    %174 = vector.load %arg12[%c0_74, %c512_75] : memref<1x2048xf32, #tpu.memory_space<vmem>>, vector<1x512xf32>
    %175 = vector.broadcast %174 : vector<1x512xf32> to vector<8x512xf32>
    %176 = arith.addf %173, %175 : vector<8x512xf32>
    %cst_76 = arith.constant 0.000000e+00 : f32
    %177 = vector.broadcast %cst_76 : f32 to vector<8x512xf32>
    %178 = arith.maximumf %176, %177 : vector<8x512xf32>
    %179 = arith.truncf %178 : vector<8x512xf32> to vector<8x512xbf16>
    %c512_77 = arith.constant 512 : index
    %c0_78 = arith.constant 0 : index
    %180 = vector.load %arg13[%c512_77, %c0_78] : memref<2048x32xbf16, #tpu.memory_space<vmem>>, vector<512x32xbf16>
    %cst_79 = arith.constant dense<0.000000e+00> : vector<8x32xf32>
    %181 = tpu.matmul %179, %180, %cst_79 {dimension_numbers = #tpu.dot_dimension_numbers<[1], [0], [0], [1], [0, 0, 1, 1], [], []>} : vector<8x512xbf16>, vector<512x32xbf16>, vector<8x32xf32> -> vector<8x32xf32>
    %182 = arith.addf %171, %181 : vector<8x32xf32>
    %c0_80 = arith.constant 0 : index
    %c1024 = arith.constant 1024 : index
    %183 = vector.load %arg11[%c0_80, %c1024] : memref<32x2048xbf16, #tpu.memory_space<vmem>>, vector<32x512xbf16>
    %cst_81 = arith.constant dense<0.000000e+00> : vector<8x512xf32>
    %184 = tpu.matmul %159, %183, %cst_81 {dimension_numbers = #tpu.dot_dimension_numbers<[1], [0], [0], [1], [0, 0, 1, 1], [], []>} : vector<8x32xbf16>, vector<32x512xbf16>, vector<8x512xf32> -> vector<8x512xf32>
    %c0_82 = arith.constant 0 : index
    %c1024_83 = arith.constant 1024 : index
    %185 = vector.load %arg12[%c0_82, %c1024_83] : memref<1x2048xf32, #tpu.memory_space<vmem>>, vector<1x512xf32>
    %186 = vector.broadcast %185 : vector<1x512xf32> to vector<8x512xf32>
    %187 = arith.addf %184, %186 : vector<8x512xf32>
    %cst_84 = arith.constant 0.000000e+00 : f32
    %188 = vector.broadcast %cst_84 : f32 to vector<8x512xf32>
    %189 = arith.maximumf %187, %188 : vector<8x512xf32>
    %190 = arith.truncf %189 : vector<8x512xf32> to vector<8x512xbf16>
    %c1024_85 = arith.constant 1024 : index
    %c0_86 = arith.constant 0 : index
    %191 = vector.load %arg13[%c1024_85, %c0_86] : memref<2048x32xbf16, #tpu.memory_space<vmem>>, vector<512x32xbf16>
    %cst_87 = arith.constant dense<0.000000e+00> : vector<8x32xf32>
    %192 = tpu.matmul %190, %191, %cst_87 {dimension_numbers = #tpu.dot_dimension_numbers<[1], [0], [0], [1], [0, 0, 1, 1], [], []>} : vector<8x512xbf16>, vector<512x32xbf16>, vector<8x32xf32> -> vector<8x32xf32>
    %193 = arith.addf %182, %192 : vector<8x32xf32>
    %c0_88 = arith.constant 0 : index
    %c1536 = arith.constant 1536 : index
    %194 = vector.load %arg11[%c0_88, %c1536] : memref<32x2048xbf16, #tpu.memory_space<vmem>>, vector<32x512xbf16>
    %cst_89 = arith.constant dense<0.000000e+00> : vector<8x512xf32>
    %195 = tpu.matmul %159, %194, %cst_89 {dimension_numbers = #tpu.dot_dimension_numbers<[1], [0], [0], [1], [0, 0, 1, 1], [], []>} : vector<8x32xbf16>, vector<32x512xbf16>, vector<8x512xf32> -> vector<8x512xf32>
    %c0_90 = arith.constant 0 : index
    %c1536_91 = arith.constant 1536 : index
    %196 = vector.load %arg12[%c0_90, %c1536_91] : memref<1x2048xf32, #tpu.memory_space<vmem>>, vector<1x512xf32>
    %197 = vector.broadcast %196 : vector<1x512xf32> to vector<8x512xf32>
    %198 = arith.addf %195, %197 : vector<8x512xf32>
    %cst_92 = arith.constant 0.000000e+00 : f32
    %199 = vector.broadcast %cst_92 : f32 to vector<8x512xf32>
    %200 = arith.maximumf %198, %199 : vector<8x512xf32>
    %201 = arith.truncf %200 : vector<8x512xf32> to vector<8x512xbf16>
    %c1536_93 = arith.constant 1536 : index
    %c0_94 = arith.constant 0 : index
    %202 = vector.load %arg13[%c1536_93, %c0_94] : memref<2048x32xbf16, #tpu.memory_space<vmem>>, vector<512x32xbf16>
    %cst_95 = arith.constant dense<0.000000e+00> : vector<8x32xf32>
    %203 = tpu.matmul %201, %202, %cst_95 {dimension_numbers = #tpu.dot_dimension_numbers<[1], [0], [0], [1], [0, 0, 1, 1], [], []>} : vector<8x512xbf16>, vector<512x32xbf16>, vector<8x32xf32> -> vector<8x32xf32>
    %204 = arith.addf %193, %203 : vector<8x32xf32>
    %205 = arith.addf %135, %204 : vector<8x32xf32>
    %c0_96 = arith.constant 0 : index
    %c0_97 = arith.constant 0 : index
    %206 = vector.load %arg14[%c0_96, %c0_97] : memref<1x32xf32, #tpu.memory_space<vmem>>, vector<1x32xf32>
    %207 = vector.broadcast %206 : vector<1x32xf32> to vector<8x32xf32>
    %208 = arith.addf %205, %207 : vector<8x32xf32>
    %c0_98 = arith.constant 0 : index
    %c0_99 = arith.constant 0 : index
    %c0_100 = arith.constant 0 : index
    %209 = vector.load %arg15[%c0_98, %c0_99, %c0_100] : memref<1x8x32xf32, #tpu.memory_space<vmem>>, vector<1x8x32xf32>
    %210 = vector.shape_cast %209 : vector<1x8x32xf32> to vector<8x32xf32>
    %211 = vector.shape_cast %208 : vector<8x32xf32> to vector<1x8x32xf32>
    tpu.vector_store %arg15[%c0_98, %c0_99, %c0_100], %211 {strides = array<i32>} : memref<1x8x32xf32, #tpu.memory_space<vmem>>, vector<1x8x32xf32>,
    return
  }
  func.func @transform_0(%arg0: i32) -> (i32, i32, i32) {
    %c0_i32 = arith.constant 0 : i32
    %c0_i32_0 = arith.constant 0 : i32
    %c0_i32_1 = arith.constant 0 : i32
    return %arg0, %c0_i32, %c0_i32_0 : i32, i32, i32
  }
  func.func @transform_1(%arg0: i32) -> (i32, i32, i32) {
    %c0_i32 = arith.constant 0 : i32
    %c0_i32_0 = arith.constant 0 : i32
    %c0_i32_1 = arith.constant 0 : i32
    return %arg0, %c0_i32, %c0_i32_0 : i32, i32, i32
  }
  func.func @transform_2(%arg0: i32) -> (i32, i32) {
    %c0_i32 = arith.constant 0 : i32
    %c0_i32_0 = arith.constant 0 : i32
    %c0_i32_1 = arith.constant 0 : i32
    return %c0_i32, %c0_i32_0 : i32, i32
  }
  func.func @transform_3(%arg0: i32) -> (i32, i32) {
    %c0_i32 = arith.constant 0 : i32
    %c0_i32_0 = arith.constant 0 : i32
    %c0_i32_1 = arith.constant 0 : i32
    return %c0_i32, %c0_i32_0 : i32, i32
  }
  func.func @transform_4(%arg0: i32) -> (i32, i32) {
    %c0_i32 = arith.constant 0 : i32
    %c0_i32_0 = arith.constant 0 : i32
    %c0_i32_1 = arith.constant 0 : i32
    return %c0_i32, %c0_i32_0 : i32, i32
  }
  func.func @transform_5(%arg0: i32) -> (i32, i32) {
    %c0_i32 = arith.constant 0 : i32
    %c0_i32_0 = arith.constant 0 : i32
    %c0_i32_1 = arith.constant 0 : i32
    return %c0_i32, %c0_i32_0 : i32, i32
  }
  func.func @transform_6(%arg0: i32) -> (i32, i32) {
    %c0_i32 = arith.constant 0 : i32
    %c0_i32_0 = arith.constant 0 : i32
    %c0_i32_1 = arith.constant 0 : i32
    return %c0_i32, %c0_i32_0 : i32, i32
  }
  func.func @transform_7(%arg0: i32) -> (i32, i32) {
    %c0_i32 = arith.constant 0 : i32
    %c0_i32_0 = arith.constant 0 : i32
    %c0_i32_1 = arith.constant 0 : i32
    return %c0_i32, %c0_i32_0 : i32, i32
  }
  func.func @transform_8(%arg0: i32) -> (i32, i32) {
    %c0_i32 = arith.constant 0 : i32
    %c0_i32_0 = arith.constant 0 : i32
    %c0_i32_1 = arith.constant 0 : i32
    return %c0_i32, %c0_i32_0 : i32, i32
  }
  func.func @transform_9(%arg0: i32) -> (i32, i32) {
    %c0_i32 = arith.constant 0 : i32
    %c0_i32_0 = arith.constant 0 : i32
    %c0_i32_1 = arith.constant 0 : i32
    return %c0_i32, %c0_i32_0 : i32, i32
  }
  func.func @transform_10(%arg0: i32) -> (i32, i32) {
    %c0_i32 = arith.constant 0 : i32
    %c0_i32_0 = arith.constant 0 : i32
    %c0_i32_1 = arith.constant 0 : i32
    return %c0_i32, %c0_i32_0 : i32, i32
  }
  func.func @transform_11(%arg0: i32) -> (i32, i32) {
    %c0_i32 = arith.constant 0 : i32
    %c0_i32_0 = arith.constant 0 : i32
    %c0_i32_1 = arith.constant 0 : i32
    return %c0_i32, %c0_i32_0 : i32, i32
  }
  func.func @transform_12(%arg0: i32) -> (i32, i32) {
    %c0_i32 = arith.constant 0 : i32
    %c0_i32_0 = arith.constant 0 : i32
    %c0_i32_1 = arith.constant 0 : i32
    return %c0_i32, %c0_i32_0 : i32, i32
  }
  func.func @transform_13(%arg0: i32) -> (i32, i32) {
    %c0_i32 = arith.constant 0 : i32
    %c0_i32_0 = arith.constant 0 : i32
    %c0_i32_1 = arith.constant 0 : i32
    return %c0_i32, %c0_i32_0 : i32, i32
  }
  func.func @transform_14(%arg0: i32) -> (i32, i32, i32) {
    %c0_i32 = arith.constant 0 : i32
    %c0_i32_0 = arith.constant 0 : i32
    %c0_i32_1 = arith.constant 0 : i32
    return %arg0, %c0_i32, %c0_i32_0 : i32, i32, i32
  }
}

module attributes {stable_mosaic.version = 11 : i64} {
  func.func @_encoder_layer_kernel(%arg0: i32, %arg1: memref<1x8x32xf32, #tpu.memory_space<vmem>>, %arg2: memref<1x1x8xf32, #tpu.memory_space<vmem>>, %arg3: memref<1x32xf32, #tpu.memory_space<vmem>>, %arg4: memref<1x32xf32, #tpu.memory_space<vmem>>, %arg5: memref<32x96xbf16, #tpu.memory_space<vmem>>, %arg6: memref<1x96xf32, #tpu.memory_space<vmem>>, %arg7: memref<32x32xbf16, #tpu.memory_space<vmem>>, %arg8: memref<1x32xf32, #tpu.memory_space<vmem>>, %arg9: memref<1x32xf32, #tpu.memory_space<vmem>>, %arg10: memref<1x32xf32, #tpu.memory_space<vmem>>, %arg11: memref<32x2048xbf16, #tpu.memory_space<vmem>>, %arg12: memref<1x2048xf32, #tpu.memory_space<vmem>>, %arg13: memref<2048x32xbf16, #tpu.memory_space<vmem>>, %arg14: memref<1x32xf32, #tpu.memory_space<vmem>>, %arg15: memref<1x8x32xf32, #tpu.memory_space<vmem>>, %arg16: memref<8x32xf32, #tpu.memory_space<vmem>>) attributes {dimension_semantics = [#tpu.dimension_semantics<parallel>], iteration_bounds = array<i64: 2>, scalar_prefetch = 0 : i64, scratch_operands = 1 : i64, tpu.core_type = #tpu.core_type<tc>, window_params = [{transform_indices = @transform_0, window_bounds = array<i64: 1, 8, 32>}, {transform_indices = @transform_1, window_bounds = array<i64: 1, 1, 8>}, {pipeline_mode = #tpu.pipeline_mode<synchronous>, transform_indices = @transform_2, window_bounds = array<i64: 1, 32>}, {pipeline_mode = #tpu.pipeline_mode<synchronous>, transform_indices = @transform_3, window_bounds = array<i64: 1, 32>}, {pipeline_mode = #tpu.pipeline_mode<synchronous>, transform_indices = @transform_4, window_bounds = array<i64: 32, 96>}, {pipeline_mode = #tpu.pipeline_mode<synchronous>, transform_indices = @transform_5, window_bounds = array<i64: 1, 96>}, {pipeline_mode = #tpu.pipeline_mode<synchronous>, transform_indices = @transform_6, window_bounds = array<i64: 32, 32>}, {pipeline_mode = #tpu.pipeline_mode<synchronous>, transform_indices = @transform_7, window_bounds = array<i64: 1, 32>}, {pipeline_mode = #tpu.pipeline_mode<synchronous>, transform_indices = @transform_8, window_bounds = array<i64: 1, 32>}, {pipeline_mode = #tpu.pipeline_mode<synchronous>, transform_indices = @transform_9, window_bounds = array<i64: 1, 32>}, {pipeline_mode = #tpu.pipeline_mode<synchronous>, transform_indices = @transform_10, window_bounds = array<i64: 32, 2048>}, {pipeline_mode = #tpu.pipeline_mode<synchronous>, transform_indices = @transform_11, window_bounds = array<i64: 1, 2048>}, {pipeline_mode = #tpu.pipeline_mode<synchronous>, transform_indices = @transform_12, window_bounds = array<i64: 2048, 32>}, {pipeline_mode = #tpu.pipeline_mode<synchronous>, transform_indices = @transform_13, window_bounds = array<i64: 1, 32>}, {transform_indices = @transform_14, window_bounds = array<i64: 1, 8, 32>}]} {
    %c0 = arith.constant 0 : index
    %c0_0 = arith.constant 0 : index
    %c0_1 = arith.constant 0 : index
    %0 = vector.load %arg1[%c0, %c0_0, %c0_1] : memref<1x8x32xf32, #tpu.memory_space<vmem>>, vector<1x8x32xf32>
    %1 = vector.shape_cast %0 : vector<1x8x32xf32> to vector<8x32xf32>
    %c0_2 = arith.constant 0 : index
    %c0_3 = arith.constant 0 : index
    %c0_4 = arith.constant 0 : index
    %2 = vector.load %arg2[%c0_2, %c0_3, %c0_4] : memref<1x1x8xf32, #tpu.memory_space<vmem>>, vector<1x1x8xf32>
    %3 = vector.shape_cast %2 : vector<1x1x8xf32> to vector<1x8xf32>
    %cst = arith.constant dense<0.000000e+00> : vector<8xf32>
    %4 = vector.multi_reduction <add>, %1, %cst [1] : vector<8x32xf32> to vector<8xf32>
    %5 = vector.shape_cast %4 : vector<8xf32> to vector<8x1xf32>
    %cst_5 = arith.constant 3.200000e+01 : f32
    %6 = vector.broadcast %cst_5 : f32 to vector<8x1xf32>
    %7 = arith.divf %5, %6 : vector<8x1xf32>
    %8 = vector.broadcast %7 : vector<8x1xf32> to vector<8x32xf32>
    %9 = arith.subf %1, %8 : vector<8x32xf32>
    %10 = arith.mulf %9, %9 : vector<8x32xf32>
    %cst_6 = arith.constant dense<0.000000e+00> : vector<8xf32>
    %11 = vector.multi_reduction <add>, %10, %cst_6 [1] : vector<8x32xf32> to vector<8xf32>
    %12 = vector.shape_cast %11 : vector<8xf32> to vector<8x1xf32>
    %cst_7 = arith.constant 0.0322580636 : f32
    %13 = vector.broadcast %cst_7 : f32 to vector<8x1xf32>
    %14 = arith.mulf %12, %13 : vector<8x1xf32>
    %15 = math.sqrt %14 : vector<8x1xf32>
    %cst_8 = arith.constant 9.99999997E-7 : f32
    %16 = vector.broadcast %cst_8 : f32 to vector<8x1xf32>
    %17 = arith.addf %15, %16 : vector<8x1xf32>
    %18 = tpu.reciprocal %17 {approx = true} : vector<8x1xf32> -> vector<8x1xf32>
    %c0_9 = arith.constant 0 : index
    %c0_10 = arith.constant 0 : index
    %19 = vector.load %arg3[%c0_9, %c0_10] : memref<1x32xf32, #tpu.memory_space<vmem>>, vector<1x32xf32>
    %20 = vector.broadcast %19 : vector<1x32xf32> to vector<8x32xf32>
    %21 = arith.mulf %20, %9 : vector<8x32xf32>
    %22 = vector.broadcast %18 : vector<8x1xf32> to vector<8x32xf32>
    %23 = arith.mulf %21, %22 : vector<8x32xf32>
    %c0_11 = arith.constant 0 : index
    %c0_12 = arith.constant 0 : index
    %24 = vector.load %arg4[%c0_11, %c0_12] : memref<1x32xf32, #tpu.memory_space<vmem>>, vector<1x32xf32>
    %25 = vector.broadcast %24 : vector<1x32xf32> to vector<8x32xf32>
    %26 = arith.addf %23, %25 : vector<8x32xf32>
    %27 = arith.truncf %26 : vector<8x32xf32> to vector<8x32xbf16>
    %c0_13 = arith.constant 0 : index
    %c0_14 = arith.constant 0 : index
    %28 = vector.load %arg5[%c0_13, %c0_14] : memref<32x96xbf16, #tpu.memory_space<vmem>>, vector<32x96xbf16>
    %cst_15 = arith.constant dense<0.000000e+00> : vector<8x96xf32>
    %29 = tpu.matmul %27, %28, %cst_15 {dimension_numbers = #tpu.dot_dimension_numbers<[1], [0], [0], [1], [0, 0, 1, 1], [], []>} : vector<8x32xbf16>, vector<32x96xbf16>, vector<8x96xf32> -> vector<8x96xf32>
    %c0_16 = arith.constant 0 : index
    %c0_17 = arith.constant 0 : index
    %30 = vector.load %arg6[%c0_16, %c0_17] : memref<1x96xf32, #tpu.memory_space<vmem>>, vector<1x96xf32>
    %31 = vector.broadcast %30 : vector<1x96xf32> to vector<8x96xf32>
    %32 = arith.addf %29, %31 : vector<8x96xf32>
    %33 = vector.extract_strided_slice %32 {offsets = [0, 0], sizes = [8, 32], strides = [1, 1]} : vector<8x96xf32> to vector<8x32xf32>
    %34 = arith.truncf %33 : vector<8x32xf32> to vector<8x32xbf16>
    %35 = vector.extract_strided_slice %32 {offsets = [0, 32], sizes = [8, 32], strides = [1, 1]} : vector<8x96xf32> to vector<8x32xf32>
    %36 = arith.truncf %35 : vector<8x32xf32> to vector<8x32xbf16>
    %37 = vector.extract_strided_slice %32 {offsets = [0, 64], sizes = [8, 32], strides = [1, 1]} : vector<8x96xf32> to vector<8x32xf32>
    %38 = arith.truncf %37 : vector<8x32xf32> to vector<8x32xbf16>
    %cst_18 = arith.constant 0.000000e+00 : f32
    %39 = vector.broadcast %cst_18 : f32 to vector<1x8xf32>
    %40 = arith.cmpf oeq, %3, %39 : vector<1x8xf32>
    %cst_19 = arith.constant -1.000000e+09 : f32
    %cst_20 = arith.constant 0.000000e+00 : f32
    %41 = vector.broadcast %cst_19 : f32 to vector<1x8xf32>
    %42 = vector.broadcast %cst_20 : f32 to vector<1x8xf32>
    %43 = arith.select %40, %41, %42 : vector<1x8xi1>, vector<1x8xf32>
    %44 = vector.extract_strided_slice %34 {offsets = [0, 0], sizes = [8, 8], strides = [1, 1]} : vector<8x32xbf16> to vector<8x8xbf16>
    %45 = vector.extract_strided_slice %36 {offsets = [0, 0], sizes = [8, 8], strides = [1, 1]} : vector<8x32xbf16> to vector<8x8xbf16>
    %46 = vector.extract_strided_slice %38 {offsets = [0, 0], sizes = [8, 8], strides = [1, 1]} : vector<8x32xbf16> to vector<8x8xbf16>
    %cst_21 = arith.constant dense<0.000000e+00> : vector<8x8xf32>
    %47 = tpu.matmul %44, %45, %cst_21 {dimension_numbers = #tpu.dot_dimension_numbers<[1], [1], [0], [0], [0, 0, 1, 0], [], []>} : vector<8x8xbf16>, vector<8x8xbf16>, vector<8x8xf32> -> vector<8x8xf32>
    %cst_22 = arith.constant 0.353553385 : f32
    %48 = vector.broadcast %cst_22 : f32 to vector<8x8xf32>
    %49 = arith.mulf %47, %48 : vector<8x8xf32>
    %50 = vector.broadcast %43 : vector<1x8xf32> to vector<8x8xf32>
    %51 = arith.addf %49, %50 : vector<8x8xf32>
    %cst_23 = arith.constant dense<0xFF800000> : vector<8xf32>
    %52 = vector.multi_reduction <maximumf>, %51, %cst_23 [1] : vector<8x8xf32> to vector<8xf32>
    %53 = vector.shape_cast %52 : vector<8xf32> to vector<8x1xf32>
    %54 = vector.broadcast %53 : vector<8x1xf32> to vector<8x8xf32>
    %55 = arith.subf %51, %54 : vector<8x8xf32>
    %56 = math.exp %55 : vector<8x8xf32>
    %cst_24 = arith.constant dense<0.000000e+00> : vector<8xf32>
    %57 = vector.multi_reduction <add>, %56, %cst_24 [1] : vector<8x8xf32> to vector<8xf32>
    %58 = vector.shape_cast %57 : vector<8xf32> to vector<8x1xf32>
    %59 = arith.truncf %56 : vector<8x8xf32> to vector<8x8xbf16>
    %cst_25 = arith.constant dense<0.000000e+00> : vector<8x8xf32>
    %60 = tpu.matmul %59, %46, %cst_25 {dimension_numbers = #tpu.dot_dimension_numbers<[1], [0], [0], [1], [0, 0, 1, 1], [], []>} : vector<8x8xbf16>, vector<8x8xbf16>, vector<8x8xf32> -> vector<8x8xf32>
    %61 = tpu.reciprocal %58 {approx = true} : vector<8x1xf32> -> vector<8x1xf32>
    %62 = vector.broadcast %61 : vector<8x1xf32> to vector<8x8xf32>
    %63 = arith.mulf %60, %62 : vector<8x8xf32>
    %c0_26 = arith.constant 0 : index
    %c0_27 = arith.constant 0 : index
    %64 = vector.load %arg16[%c0_26, %c0_27] : memref<8x32xf32, #tpu.memory_space<vmem>>, vector<8x8xf32>
    tpu.vector_store %arg16[%c0_26, %c0_27], %63 {strides = array<i32>} : memref<8x32xf32, #tpu.memory_space<vmem>>, vector<8x8xf32>,
    %65 = vector.extract_strided_slice %34 {offsets = [0, 8], sizes = [8, 8], strides = [1, 1]} : vector<8x32xbf16> to vector<8x8xbf16>
    %66 = vector.extract_strided_slice %36 {offsets = [0, 8], sizes = [8, 8], strides = [1, 1]} : vector<8x32xbf16> to vector<8x8xbf16>
    %67 = vector.extract_strided_slice %38 {offsets = [0, 8], sizes = [8, 8], strides = [1, 1]} : vector<8x32xbf16> to vector<8x8xbf16>
    %cst_28 = arith.constant dense<0.000000e+00> : vector<8x8xf32>
    %68 = tpu.matmul %65, %66, %cst_28 {dimension_numbers = #tpu.dot_dimension_numbers<[1], [1], [0], [0], [0, 0, 1, 0], [], []>} : vector<8x8xbf16>, vector<8x8xbf16>, vector<8x8xf32> -> vector<8x8xf32>
    %cst_29 = arith.constant 0.353553385 : f32
    %69 = vector.broadcast %cst_29 : f32 to vector<8x8xf32>
    %70 = arith.mulf %68, %69 : vector<8x8xf32>
    %71 = vector.broadcast %43 : vector<1x8xf32> to vector<8x8xf32>
    %72 = arith.addf %70, %71 : vector<8x8xf32>
    %cst_30 = arith.constant dense<0xFF800000> : vector<8xf32>
    %73 = vector.multi_reduction <maximumf>, %72, %cst_30 [1] : vector<8x8xf32> to vector<8xf32>
    %74 = vector.shape_cast %73 : vector<8xf32> to vector<8x1xf32>
    %75 = vector.broadcast %74 : vector<8x1xf32> to vector<8x8xf32>
    %76 = arith.subf %72, %75 : vector<8x8xf32>
    %77 = math.exp %76 : vector<8x8xf32>
    %cst_31 = arith.constant dense<0.000000e+00> : vector<8xf32>
    %78 = vector.multi_reduction <add>, %77, %cst_31 [1] : vector<8x8xf32> to vector<8xf32>
    %79 = vector.shape_cast %78 : vector<8xf32> to vector<8x1xf32>
    %80 = arith.truncf %77 : vector<8x8xf32> to vector<8x8xbf16>
    %cst_32 = arith.constant dense<0.000000e+00> : vector<8x8xf32>
    %81 = tpu.matmul %80, %67, %cst_32 {dimension_numbers = #tpu.dot_dimension_numbers<[1], [0], [0], [1], [0, 0, 1, 1], [], []>} : vector<8x8xbf16>, vector<8x8xbf16>, vector<8x8xf32> -> vector<8x8xf32>
    %82 = tpu.reciprocal %79 {approx = true} : vector<8x1xf32> -> vector<8x1xf32>
    %83 = vector.broadcast %82 : vector<8x1xf32> to vector<8x8xf32>
    %84 = arith.mulf %81, %83 : vector<8x8xf32>
    %c0_33 = arith.constant 0 : index
    %c8 = arith.constant 8 : index
    %85 = vector.load %arg16[%c0_33, %c8] : memref<8x32xf32, #tpu.memory_space<vmem>>, vector<8x8xf32>
    tpu.vector_store %arg16[%c0_33, %c8], %84 {strides = array<i32>} : memref<8x32xf32, #tpu.memory_space<vmem>>, vector<8x8xf32>,
    %86 = vector.extract_strided_slice %34 {offsets = [0, 16], sizes = [8, 8], strides = [1, 1]} : vector<8x32xbf16> to vector<8x8xbf16>
    %87 = vector.extract_strided_slice %36 {offsets = [0, 16], sizes = [8, 8], strides = [1, 1]} : vector<8x32xbf16> to vector<8x8xbf16>
    %88 = vector.extract_strided_slice %38 {offsets = [0, 16], sizes = [8, 8], strides = [1, 1]} : vector<8x32xbf16> to vector<8x8xbf16>
    %cst_34 = arith.constant dense<0.000000e+00> : vector<8x8xf32>
    %89 = tpu.matmul %86, %87, %cst_34 {dimension_numbers = #tpu.dot_dimension_numbers<[1], [1], [0], [0], [0, 0, 1, 0], [], []>} : vector<8x8xbf16>, vector<8x8xbf16>, vector<8x8xf32> -> vector<8x8xf32>
    %cst_35 = arith.constant 0.353553385 : f32
    %90 = vector.broadcast %cst_35 : f32 to vector<8x8xf32>
    %91 = arith.mulf %89, %90 : vector<8x8xf32>
    %92 = vector.broadcast %43 : vector<1x8xf32> to vector<8x8xf32>
    %93 = arith.addf %91, %92 : vector<8x8xf32>
    %cst_36 = arith.constant dense<0xFF800000> : vector<8xf32>
    %94 = vector.multi_reduction <maximumf>, %93, %cst_36 [1] : vector<8x8xf32> to vector<8xf32>
    %95 = vector.shape_cast %94 : vector<8xf32> to vector<8x1xf32>
    %96 = vector.broadcast %95 : vector<8x1xf32> to vector<8x8xf32>
    %97 = arith.subf %93, %96 : vector<8x8xf32>
    %98 = math.exp %97 : vector<8x8xf32>
    %cst_37 = arith.constant dense<0.000000e+00> : vector<8xf32>
    %99 = vector.multi_reduction <add>, %98, %cst_37 [1] : vector<8x8xf32> to vector<8xf32>
    %100 = vector.shape_cast %99 : vector<8xf32> to vector<8x1xf32>
    %101 = arith.truncf %98 : vector<8x8xf32> to vector<8x8xbf16>
    %cst_38 = arith.constant dense<0.000000e+00> : vector<8x8xf32>
    %102 = tpu.matmul %101, %88, %cst_38 {dimension_numbers = #tpu.dot_dimension_numbers<[1], [0], [0], [1], [0, 0, 1, 1], [], []>} : vector<8x8xbf16>, vector<8x8xbf16>, vector<8x8xf32> -> vector<8x8xf32>
    %103 = tpu.reciprocal %100 {approx = true} : vector<8x1xf32> -> vector<8x1xf32>
    %104 = vector.broadcast %103 : vector<8x1xf32> to vector<8x8xf32>
    %105 = arith.mulf %102, %104 : vector<8x8xf32>
    %c0_39 = arith.constant 0 : index
    %c16 = arith.constant 16 : index
    %106 = vector.load %arg16[%c0_39, %c16] : memref<8x32xf32, #tpu.memory_space<vmem>>, vector<8x8xf32>
    tpu.vector_store %arg16[%c0_39, %c16], %105 {strides = array<i32>} : memref<8x32xf32, #tpu.memory_space<vmem>>, vector<8x8xf32>,
    %107 = vector.extract_strided_slice %34 {offsets = [0, 24], sizes = [8, 8], strides = [1, 1]} : vector<8x32xbf16> to vector<8x8xbf16>
    %108 = vector.extract_strided_slice %36 {offsets = [0, 24], sizes = [8, 8], strides = [1, 1]} : vector<8x32xbf16> to vector<8x8xbf16>
    %109 = vector.extract_strided_slice %38 {offsets = [0, 24], sizes = [8, 8], strides = [1, 1]} : vector<8x32xbf16> to vector<8x8xbf16>
    %cst_40 = arith.constant dense<0.000000e+00> : vector<8x8xf32>
    %110 = tpu.matmul %107, %108, %cst_40 {dimension_numbers = #tpu.dot_dimension_numbers<[1], [1], [0], [0], [0, 0, 1, 0], [], []>} : vector<8x8xbf16>, vector<8x8xbf16>, vector<8x8xf32> -> vector<8x8xf32>
    %cst_41 = arith.constant 0.353553385 : f32
    %111 = vector.broadcast %cst_41 : f32 to vector<8x8xf32>
    %112 = arith.mulf %110, %111 : vector<8x8xf32>
    %113 = vector.broadcast %43 : vector<1x8xf32> to vector<8x8xf32>
    %114 = arith.addf %112, %113 : vector<8x8xf32>
    %cst_42 = arith.constant dense<0xFF800000> : vector<8xf32>
    %115 = vector.multi_reduction <maximumf>, %114, %cst_42 [1] : vector<8x8xf32> to vector<8xf32>
    %116 = vector.shape_cast %115 : vector<8xf32> to vector<8x1xf32>
    %117 = vector.broadcast %116 : vector<8x1xf32> to vector<8x8xf32>
    %118 = arith.subf %114, %117 : vector<8x8xf32>
    %119 = math.exp %118 : vector<8x8xf32>
    %cst_43 = arith.constant dense<0.000000e+00> : vector<8xf32>
    %120 = vector.multi_reduction <add>, %119, %cst_43 [1] : vector<8x8xf32> to vector<8xf32>
    %121 = vector.shape_cast %120 : vector<8xf32> to vector<8x1xf32>
    %122 = arith.truncf %119 : vector<8x8xf32> to vector<8x8xbf16>
    %cst_44 = arith.constant dense<0.000000e+00> : vector<8x8xf32>
    %123 = tpu.matmul %122, %109, %cst_44 {dimension_numbers = #tpu.dot_dimension_numbers<[1], [0], [0], [1], [0, 0, 1, 1], [], []>} : vector<8x8xbf16>, vector<8x8xbf16>, vector<8x8xf32> -> vector<8x8xf32>
    %124 = tpu.reciprocal %121 {approx = true} : vector<8x1xf32> -> vector<8x1xf32>
    %125 = vector.broadcast %124 : vector<8x1xf32> to vector<8x8xf32>
    %126 = arith.mulf %123, %125 : vector<8x8xf32>
    %c0_45 = arith.constant 0 : index
    %c24 = arith.constant 24 : index
    %127 = vector.load %arg16[%c0_45, %c24] : memref<8x32xf32, #tpu.memory_space<vmem>>, vector<8x8xf32>
    tpu.vector_store %arg16[%c0_45, %c24], %126 {strides = array<i32>} : memref<8x32xf32, #tpu.memory_space<vmem>>, vector<8x8xf32>,
    %c0_46 = arith.constant 0 : index
    %c0_47 = arith.constant 0 : index
    %128 = vector.load %arg16[%c0_46, %c0_47] : memref<8x32xf32, #tpu.memory_space<vmem>>, vector<8x32xf32>
    %129 = arith.truncf %128 : vector<8x32xf32> to vector<8x32xbf16>
    %c0_48 = arith.constant 0 : index
    %c0_49 = arith.constant 0 : index
    %130 = vector.load %arg7[%c0_48, %c0_49] : memref<32x32xbf16, #tpu.memory_space<vmem>>, vector<32x32xbf16>
    %cst_50 = arith.constant dense<0.000000e+00> : vector<8x32xf32>
    %131 = tpu.matmul %129, %130, %cst_50 {dimension_numbers = #tpu.dot_dimension_numbers<[1], [0], [0], [1], [0, 0, 1, 1], [], []>} : vector<8x32xbf16>, vector<32x32xbf16>, vector<8x32xf32> -> vector<8x32xf32>
    %c0_51 = arith.constant 0 : index
    %c0_52 = arith.constant 0 : index
    %132 = vector.load %arg8[%c0_51, %c0_52] : memref<1x32xf32, #tpu.memory_space<vmem>>, vector<1x32xf32>
    %133 = vector.broadcast %132 : vector<1x32xf32> to vector<8x32xf32>
    %134 = arith.addf %131, %133 : vector<8x32xf32>
    %135 = arith.addf %1, %134 : vector<8x32xf32>
    %cst_53 = arith.constant dense<0.000000e+00> : vector<8xf32>
    %136 = vector.multi_reduction <add>, %135, %cst_53 [1] : vector<8x32xf32> to vector<8xf32>
    %137 = vector.shape_cast %136 : vector<8xf32> to vector<8x1xf32>
    %cst_54 = arith.constant 3.200000e+01 : f32
    %138 = vector.broadcast %cst_54 : f32 to vector<8x1xf32>
    %139 = arith.divf %137, %138 : vector<8x1xf32>
    %140 = vector.broadcast %139 : vector<8x1xf32> to vector<8x32xf32>
    %141 = arith.subf %135, %140 : vector<8x32xf32>
    %142 = arith.mulf %141, %141 : vector<8x32xf32>
    %cst_55 = arith.constant dense<0.000000e+00> : vector<8xf32>
    %143 = vector.multi_reduction <add>, %142, %cst_55 [1] : vector<8x32xf32> to vector<8xf32>
    %144 = vector.shape_cast %143 : vector<8xf32> to vector<8x1xf32>
    %cst_56 = arith.constant 0.0322580636 : f32
    %145 = vector.broadcast %cst_56 : f32 to vector<8x1xf32>
    %146 = arith.mulf %144, %145 : vector<8x1xf32>
    %147 = math.sqrt %146 : vector<8x1xf32>
    %cst_57 = arith.constant 9.99999997E-7 : f32
    %148 = vector.broadcast %cst_57 : f32 to vector<8x1xf32>
    %149 = arith.addf %147, %148 : vector<8x1xf32>
    %150 = tpu.reciprocal %149 {approx = true} : vector<8x1xf32> -> vector<8x1xf32>
    %c0_58 = arith.constant 0 : index
    %c0_59 = arith.constant 0 : index
    %151 = vector.load %arg9[%c0_58, %c0_59] : memref<1x32xf32, #tpu.memory_space<vmem>>, vector<1x32xf32>
    %152 = vector.broadcast %151 : vector<1x32xf32> to vector<8x32xf32>
    %153 = arith.mulf %152, %141 : vector<8x32xf32>
    %154 = vector.broadcast %150 : vector<8x1xf32> to vector<8x32xf32>
    %155 = arith.mulf %153, %154 : vector<8x32xf32>
    %c0_60 = arith.constant 0 : index
    %c0_61 = arith.constant 0 : index
    %156 = vector.load %arg10[%c0_60, %c0_61] : memref<1x32xf32, #tpu.memory_space<vmem>>, vector<1x32xf32>
    %157 = vector.broadcast %156 : vector<1x32xf32> to vector<8x32xf32>
    %158 = arith.addf %155, %157 : vector<8x32xf32>
    %159 = arith.truncf %158 : vector<8x32xf32> to vector<8x32xbf16>
    %cst_62 = arith.constant 0.000000e+00 : f32
    %160 = vector.broadcast %cst_62 : f32 to vector<8x32xf32>
    %c0_63 = arith.constant 0 : index
    %c0_64 = arith.constant 0 : index
    %161 = vector.load %arg11[%c0_63, %c0_64] : memref<32x2048xbf16, #tpu.memory_space<vmem>>, vector<32x512xbf16>
    %cst_65 = arith.constant dense<0.000000e+00> : vector<8x512xf32>
    %162 = tpu.matmul %159, %161, %cst_65 {dimension_numbers = #tpu.dot_dimension_numbers<[1], [0], [0], [1], [0, 0, 1, 1], [], []>} : vector<8x32xbf16>, vector<32x512xbf16>, vector<8x512xf32> -> vector<8x512xf32>
    %c0_66 = arith.constant 0 : index
    %c0_67 = arith.constant 0 : index
    %163 = vector.load %arg12[%c0_66, %c0_67] : memref<1x2048xf32, #tpu.memory_space<vmem>>, vector<1x512xf32>
    %164 = vector.broadcast %163 : vector<1x512xf32> to vector<8x512xf32>
    %165 = arith.addf %162, %164 : vector<8x512xf32>
    %cst_68 = arith.constant 0.000000e+00 : f32
    %166 = vector.broadcast %cst_68 : f32 to vector<8x512xf32>
    %167 = arith.maximumf %165, %166 : vector<8x512xf32>
    %168 = arith.truncf %167 : vector<8x512xf32> to vector<8x512xbf16>
    %c0_69 = arith.constant 0 : index
    %c0_70 = arith.constant 0 : index
    %169 = vector.load %arg13[%c0_69, %c0_70] : memref<2048x32xbf16, #tpu.memory_space<vmem>>, vector<512x32xbf16>
    %cst_71 = arith.constant dense<0.000000e+00> : vector<8x32xf32>
    %170 = tpu.matmul %168, %169, %cst_71 {dimension_numbers = #tpu.dot_dimension_numbers<[1], [0], [0], [1], [0, 0, 1, 1], [], []>} : vector<8x512xbf16>, vector<512x32xbf16>, vector<8x32xf32> -> vector<8x32xf32>
    %171 = arith.addf %160, %170 : vector<8x32xf32>
    %c0_72 = arith.constant 0 : index
    %c512 = arith.constant 512 : index
    %172 = vector.load %arg11[%c0_72, %c512] : memref<32x2048xbf16, #tpu.memory_space<vmem>>, vector<32x512xbf16>
    %cst_73 = arith.constant dense<0.000000e+00> : vector<8x512xf32>
    %173 = tpu.matmul %159, %172, %cst_73 {dimension_numbers = #tpu.dot_dimension_numbers<[1], [0], [0], [1], [0, 0, 1, 1], [], []>} : vector<8x32xbf16>, vector<32x512xbf16>, vector<8x512xf32> -> vector<8x512xf32>
    %c0_74 = arith.constant 0 : index
    %c512_75 = arith.constant 512 : index
    %174 = vector.load %arg12[%c0_74, %c512_75] : memref<1x2048xf32, #tpu.memory_space<vmem>>, vector<1x512xf32>
    %175 = vector.broadcast %174 : vector<1x512xf32> to vector<8x512xf32>
    %176 = arith.addf %173, %175 : vector<8x512xf32>
    %cst_76 = arith.constant 0.000000e+00 : f32
    %177 = vector.broadcast %cst_76 : f32 to vector<8x512xf32>
    %178 = arith.maximumf %176, %177 : vector<8x512xf32>
    %179 = arith.truncf %178 : vector<8x512xf32> to vector<8x512xbf16>
    %c512_77 = arith.constant 512 : index
    %c0_78 = arith.constant 0 : index
    %180 = vector.load %arg13[%c512_77, %c0_78] : memref<2048x32xbf16, #tpu.memory_space<vmem>>, vector<512x32xbf16>
    %cst_79 = arith.constant dense<0.000000e+00> : vector<8x32xf32>
    %181 = tpu.matmul %179, %180, %cst_79 {dimension_numbers = #tpu.dot_dimension_numbers<[1], [0], [0], [1], [0, 0, 1, 1], [], []>} : vector<8x512xbf16>, vector<512x32xbf16>, vector<8x32xf32> -> vector<8x32xf32>
    %182 = arith.addf %171, %181 : vector<8x32xf32>
    %c0_80 = arith.constant 0 : index
    %c1024 = arith.constant 1024 : index
    %183 = vector.load %arg11[%c0_80, %c1024] : memref<32x2048xbf16, #tpu.memory_space<vmem>>, vector<32x512xbf16>
    %cst_81 = arith.constant dense<0.000000e+00> : vector<8x512xf32>
    %184 = tpu.matmul %159, %183, %cst_81 {dimension_numbers = #tpu.dot_dimension_numbers<[1], [0], [0], [1], [0, 0, 1, 1], [], []>} : vector<8x32xbf16>, vector<32x512xbf16>, vector<8x512xf32> -> vector<8x512xf32>
    %c0_82 = arith.constant 0 : index
    %c1024_83 = arith.constant 1024 : index
    %185 = vector.load %arg12[%c0_82, %c1024_83] : memref<1x2048xf32, #tpu.memory_space<vmem>>, vector<1x512xf32>
    %186 = vector.broadcast %185 : vector<1x512xf32> to vector<8x512xf32>
    %187 = arith.addf %184, %186 : vector<8x512xf32>
    %cst_84 = arith.constant 0.000000e+00 : f32
    %188 = vector.broadcast %cst_84 : f32 to vector<8x512xf32>
    %189 = arith.maximumf %187, %188 : vector<8x512xf32>
    %190 = arith.truncf %189 : vector<8x512xf32> to vector<8x512xbf16>
    %c1024_85 = arith.constant 1024 : index
    %c0_86 = arith.constant 0 : index
    %191 = vector.load %arg13[%c1024_85, %c0_86] : memref<2048x32xbf16, #tpu.memory_space<vmem>>, vector<512x32xbf16>
    %cst_87 = arith.constant dense<0.000000e+00> : vector<8x32xf32>
    %192 = tpu.matmul %190, %191, %cst_87 {dimension_numbers = #tpu.dot_dimension_numbers<[1], [0], [0], [1], [0, 0, 1, 1], [], []>} : vector<8x512xbf16>, vector<512x32xbf16>, vector<8x32xf32> -> vector<8x32xf32>
    %193 = arith.addf %182, %192 : vector<8x32xf32>
    %c0_88 = arith.constant 0 : index
    %c1536 = arith.constant 1536 : index
    %194 = vector.load %arg11[%c0_88, %c1536] : memref<32x2048xbf16, #tpu.memory_space<vmem>>, vector<32x512xbf16>
    %cst_89 = arith.constant dense<0.000000e+00> : vector<8x512xf32>
    %195 = tpu.matmul %159, %194, %cst_89 {dimension_numbers = #tpu.dot_dimension_numbers<[1], [0], [0], [1], [0, 0, 1, 1], [], []>} : vector<8x32xbf16>, vector<32x512xbf16>, vector<8x512xf32> -> vector<8x512xf32>
    %c0_90 = arith.constant 0 : index
    %c1536_91 = arith.constant 1536 : index
    %196 = vector.load %arg12[%c0_90, %c1536_91] : memref<1x2048xf32, #tpu.memory_space<vmem>>, vector<1x512xf32>
    %197 = vector.broadcast %196 : vector<1x512xf32> to vector<8x512xf32>
    %198 = arith.addf %195, %197 : vector<8x512xf32>
    %cst_92 = arith.constant 0.000000e+00 : f32
    %199 = vector.broadcast %cst_92 : f32 to vector<8x512xf32>
    %200 = arith.maximumf %198, %199 : vector<8x512xf32>
    %201 = arith.truncf %200 : vector<8x512xf32> to vector<8x512xbf16>
    %c1536_93 = arith.constant 1536 : index
    %c0_94 = arith.constant 0 : index
    %202 = vector.load %arg13[%c1536_93, %c0_94] : memref<2048x32xbf16, #tpu.memory_space<vmem>>, vector<512x32xbf16>
    %cst_95 = arith.constant dense<0.000000e+00> : vector<8x32xf32>
    %203 = tpu.matmul %201, %202, %cst_95 {dimension_numbers = #tpu.dot_dimension_numbers<[1], [0], [0], [1], [0, 0, 1, 1], [], []>} : vector<8x512xbf16>, vector<512x32xbf16>, vector<8x32xf32> -> vector<8x32xf32>
    %204 = arith.addf %193, %203 : vector<8x32xf32>
    %205 = arith.addf %135, %204 : vector<8x32xf32>
    %c0_96 = arith.constant 0 : index
    %c0_97 = arith.constant 0 : index
    %206 = vector.load %arg14[%c0_96, %c0_97] : memref<1x32xf32, #tpu.memory_space<vmem>>, vector<1x32xf32>
    %207 = vector.broadcast %206 : vector<1x32xf32> to vector<8x32xf32>
    %208 = arith.addf %205, %207 : vector<8x32xf32>
    %c0_98 = arith.constant 0 : index
    %c0_99 = arith.constant 0 : index
    %c0_100 = arith.constant 0 : index
    %209 = vector.load %arg15[%c0_98, %c0_99, %c0_100] : memref<1x8x32xf32, #tpu.memory_space<vmem>>, vector<1x8x32xf32>
    %210 = vector.shape_cast %209 : vector<1x8x32xf32> to vector<8x32xf32>
    %211 = vector.shape_cast %208 : vector<8x32xf32> to vector<1x8x32xf32>
    tpu.vector_store %arg15[%c0_98, %c0_99, %c0_100], %211 {strides = array<i32>} : memref<1x8x32xf32, #tpu.memory_space<vmem>>, vector<1x8x32xf32>,
    return
  }
  func.func @transform_0(%arg0: i32) -> (i32, i32, i32) {
    %c0_i32 = arith.constant 0 : i32
    %c0_i32_0 = arith.constant 0 : i32
    %c0_i32_1 = arith.constant 0 : i32
    return %arg0, %c0_i32, %c0_i32_0 : i32, i32, i32
  }
  func.func @transform_1(%arg0: i32) -> (i32, i32, i32) {
    %c0_i32 = arith.constant 0 : i32
    %c0_i32_0 = arith.constant 0 : i32
    %c0_i32_1 = arith.constant 0 : i32
    return %arg0, %c0_i32, %c0_i32_0 : i32, i32, i32
  }
  func.func @transform_2(%arg0: i32) -> (i32, i32) {
    %c0_i32 = arith.constant 0 : i32
    %c0_i32_0 = arith.constant 0 : i32
    %c0_i32_1 = arith.constant 0 : i32
    return %c0_i32, %c0_i32_0 : i32, i32
  }
  func.func @transform_3(%arg0: i32) -> (i32, i32) {
    %c0_i32 = arith.constant 0 : i32
    %c0_i32_0 = arith.constant 0 : i32
    %c0_i32_1 = arith.constant 0 : i32
    return %c0_i32, %c0_i32_0 : i32, i32
  }
  func.func @transform_4(%arg0: i32) -> (i32, i32) {
    %c0_i32 = arith.constant 0 : i32
    %c0_i32_0 = arith.constant 0 : i32
    %c0_i32_1 = arith.constant 0 : i32
    return %c0_i32, %c0_i32_0 : i32, i32
  }
  func.func @transform_5(%arg0: i32) -> (i32, i32) {
    %c0_i32 = arith.constant 0 : i32
    %c0_i32_0 = arith.constant 0 : i32
    %c0_i32_1 = arith.constant 0 : i32
    return %c0_i32, %c0_i32_0 : i32, i32
  }
  func.func @transform_6(%arg0: i32) -> (i32, i32) {
    %c0_i32 = arith.constant 0 : i32
    %c0_i32_0 = arith.constant 0 : i32
    %c0_i32_1 = arith.constant 0 : i32
    return %c0_i32, %c0_i32_0 : i32, i32
  }
  func.func @transform_7(%arg0: i32) -> (i32, i32) {
    %c0_i32 = arith.constant 0 : i32
    %c0_i32_0 = arith.constant 0 : i32
    %c0_i32_1 = arith.constant 0 : i32
    return %c0_i32, %c0_i32_0 : i32, i32
  }
  func.func @transform_8(%arg0: i32) -> (i32, i32) {
    %c0_i32 = arith.constant 0 : i32
    %c0_i32_0 = arith.constant 0 : i32
    %c0_i32_1 = arith.constant 0 : i32
    return %c0_i32, %c0_i32_0 : i32, i32
  }
  func.func @transform_9(%arg0: i32) -> (i32, i32) {
    %c0_i32 = arith.constant 0 : i32
    %c0_i32_0 = arith.constant 0 : i32
    %c0_i32_1 = arith.constant 0 : i32
    return %c0_i32, %c0_i32_0 : i32, i32
  }
  func.func @transform_10(%arg0: i32) -> (i32, i32) {
    %c0_i32 = arith.constant 0 : i32
    %c0_i32_0 = arith.constant 0 : i32
    %c0_i32_1 = arith.constant 0 : i32
    return %c0_i32, %c0_i32_0 : i32, i32
  }
  func.func @transform_11(%arg0: i32) -> (i32, i32) {
    %c0_i32 = arith.constant 0 : i32
    %c0_i32_0 = arith.constant 0 : i32
    %c0_i32_1 = arith.constant 0 : i32
    return %c0_i32, %c0_i32_0 : i32, i32
  }
  func.func @transform_12(%arg0: i32) -> (i32, i32) {
    %c0_i32 = arith.constant 0 : i32
    %c0_i32_0 = arith.constant 0 : i32
    %c0_i32_1 = arith.constant 0 : i32
    return %c0_i32, %c0_i32_0 : i32, i32
  }
  func.func @transform_13(%arg0: i32) -> (i32, i32) {
    %c0_i32 = arith.constant 0 : i32
    %c0_i32_0 = arith.constant 0 : i32
    %c0_i32_1 = arith.constant 0 : i32
    return %c0_i32, %c0_i32_0 : i32, i32
  }
  func.func @transform_14(%arg0: i32) -> (i32, i32, i32) {
    %c0_i32 = arith.constant 0 : i32
    %c0_i32_0 = arith.constant 0 : i32
    %c0_i32_1 = arith.constant 0 : i32
    return %arg0, %c0_i32, %c0_i32_0 : i32, i32, i32
  }
}

</mosaic_0001>

<bundles_post_ra>
// kernel: tpu_custom_call.1
= control target key start
LH: loop header
LB: loop body
LE: loop exit
PB: predicated region body
PF: predicated region fallthrough
CT: control target
= control target key end

     0   :  { %s4888_s0 = inlined_call_operand.vmem [shape: f32[2,8,32], index: 0, kind: input, shape index: {}]   ;;  %s4889_s1 = inlined_call_operand.vmem [shape: f32[2,1,8], index: 1, kind: input, shape index: {}]   ;;  %s4890_s2 = inlined_call_operand.vmem [shape: f32[1,32], index: 2, kind: input, shape index: {}]   ;;  %s4891_s3 = inlined_call_operand.vmem [shape: f32[1,32], index: 3, kind: input, shape index: {}]   ;;  %s4892_s4 = inlined_call_operand.vmem [shape: bf16[32,96], index: 4, kind: input, shape index: {}]   ;;  %s4893_s5 = inlined_call_operand.vmem [shape: f32[1,96], index: 5, kind: input, shape index: {}]   ;;  %s4894_s6 = inlined_call_operand.vmem [shape: bf16[32,32], index: 6, kind: input, shape index: {}]   ;;  %s4895_s7 = inlined_call_operand.vmem [shape: f32[1,32], index: 7, kind: input, shape index: {}]   ;;  %s4896_s8 = inlined_call_operand.vmem [shape: f32[1,32], index: 8, kind: input, shape index: {}]   ;;  %s4897_s9 = inlined_call_operand.vmem [shape: f32[1,32], index: 9, kind: input, shape index: {}]   ;;  %s4898_s10 = inlined_call_operand.vmem [shape: bf16[32,2048], index: 10, kind: input, shape index: {}]   ;;  %s4899_s11 = inlined_call_operand.vmem [shape: f32[1,2048], index: 11, kind: input, shape index: {}]   ;;  %s4900_s12 = inlined_call_operand.vmem [shape: bf16[2048,32], index: 12, kind: input, shape index: {}]   ;;  %s4901_s13 = inlined_call_operand.vmem [shape: f32[1,32], index: 13, kind: input, shape index: {}]   ;;  %s4902_s14 = inlined_call_operand.hbm [shape: f32[2,8,32], index: 14, kind: output, shape index: {}]  }
   0x1   :  { %4903 = sst [smem:[#allocation6_spill]] %s4888_s0 }
   0x2   :  { %4904 = sst [smem:[#allocation7_spill]] %s4889_s1 }
   0x3   :  { %4905 = sst [smem:[#allocation8_spill]] %s4890_s2 }
   0x4   :  { %4906 = sst [smem:[#allocation9_spill]] %s4891_s3 }
   0x5   :  { %4907 = sst [smem:[#allocation10_spill]] %s4892_s4 }
   0x6   :  { %19 = vsyncpa [#allocation4], 0 }
   0x7   :  { %21 = vsyncpa [#allocation4 + $0x1], 0  ;;  %s4079_s29 = smov 0   ;;  %s4081_s30 = smov 0  }
   0x8   :  { %s4083_s15 = smov 0   ;;  %s4085_s16 = smov 0  }
   0x9 LB: > { %s4100_s17 = sadd.s32 4294967295, %s3984_s16   ;;  %s3249_s18 = sadd.s32 4294967294, %s3984_s16   ;;  %s3984_s16 = sphi %s4085_s16, %s4918_s16   ;;  %s3980_s15 = sphi %s4083_s15, %s4917_s15   ;;  %s3976_s30 = sphi %s4081_s30, %s4916_s30   ;;  %s3972_s29 = sphi %s4079_s29, %s4915_s29  }
   0xa   : > { %s4104_s19 = sadd.s32 1, %s3984_s16   ;;  %s338_s20 = sadd.s32 1, %s3980_s15 }
   0xb   : > { %s335_s21 = ssub.s32 %s3984_s16, %s4104_s19  ;;  %p348_p0 = scmp.ne.s32.totalorder %s3980_s15, %s3976_s30 }
   0xc   : > { %p336_p1 = scmp.eq.s32.totalorder %s335_s21, 0  ;;  %p349_p2 = scmp.eq.s32.totalorder %s4100_s17, 1 }
   0xd   : > { %p354_p3 = scmp.ne.s32.totalorder %s3976_s30, %s3972_s29  ;;  %p355_p4 = scmp.eq.s32.totalorder %s3249_s18, 1 }
   0xe   : > { %s4115_s22 = scalar_select %p336_p1, %s3980_s15, %s338_s20  }
   0xf   : > { %p4117_p5 = por %p349_p2, %p348_p0  ;;  %p4121_p6 = por %p355_p4, %p354_p3 }
  0x10   : > { %p3252_p7 = scmp.ge.s32.totalorder %s3984_s16, 1  ;;  %p422_p8 = scmp.lt.s32.totalorder %s3984_s16, 3 }
  0x12   : > { %p423_p9 = pnand %p3252_p7, %p422_p8 }
  0x13   : > { %p470_p10 = scmp.lt.s32.totalorder (!%p423_p9), %s4100_s17, 1  ;;  %v3986_v0 = vmov (!%p423_p9), 0.0   ;;  %vm480_vm0 = vcmask (!%p423_p9), 261120   ;;  %s4910_s0 = sld [smem:[#allocation6_spill]] (!%p423_p9)  ;;  %vm3987_vm1 = vmmov (!%p423_p9), 0   ;;  %vm591_vm4 = vcmask (!%p423_p9), 64512  }
  0x14   : > { %426 = sbr.rel (%p423_p9) target bundleno = 2972 (0xb9c), region = 76  ;;  %3646 = vmatprep.subr.bf16.mxu0 (!%p423_p9), %v3986_v0  ;;  %3654 = vmatprep.subr.bf16.mxu1 (!%p423_p9), %v3986_v0  ;;  %s4911_s4 = sld [smem:[#allocation10_spill]] (!%p423_p9)  ;;  %v3257_v25 = vld [vmem:[%s4893_s5] ss:$0 sm:$0xff] (!%p423_p9)  ;;  %v640_v43 = vlaneseq (!%p423_p9)  ;;  %vm661_vm6 = vcmask (!%p423_p9), 1043456   ;;  %vm824_vm7 = vcmask (!%p423_p9), 130112  }
  0x15   : > { %3650 = vmatprep.mubr.msk.bf16.mxu0 (!%p423_p9), %vm3987_vm1, %v3986_v0  ;;  %3656 = vmatprep.mubr.msk.bf16.mxu1 (!%p423_p9), %vm3987_vm1, %v3986_v0  ;;  %s4912_s2 = sld [smem:[#allocation8_spill]] (!%p423_p9)  ;;  %s4913_s3 = sld [smem:[#allocation9_spill]] (!%p423_p9)  ;;  %vm942_vm8 = vcmask (!%p423_p9), 195712   ;;  %vm1060_vm9 = vcmask (!%p423_p9), 261312  }
  0x16   : > { %s3988_s28 = smov (!%p423_p9), 120   ;;  %s3990_s20 = smov (!%p423_p9), 88   ;;  %v4201_v45 = vshrl.u32 (!%p423_p9), %v640_v43, 7 }
  0x17   : > { %s3991_s21 = smov (!%p423_p9), 80   ;;  %s3993_s27 = smov (!%p423_p9), 72  }
  0x18   : > { %s4914_s1 = sld [smem:[#allocation7_spill]] (!%p423_p9)  ;;  %v4204_v46 = vsub.s32 (!%p423_p9), 0, %v4201_v45 }
  0x1a   : > { %v3766_v8 = vld [vmem:[%s4911_s4] sm:$0xff] (!%p423_p9)   ;;  %v3767_v9 = vld [vmem:[%s4911_s4 + $0x8] sm:$0xff] (!%p423_p9)  }
  0x1b   : > { %s4131_s25 = scalar_select %p470_p10, %s4100_s17, 1  ;;  %3647 = vmatpush3.bf16.msra.mxu0 %v3766_v8  ;;  %v3255_v18 = vld [vmem:[%s4912_s2] ss:$0 sm:$0xff] }
  0x1c   : > { %3648 = vmatprep.subr.bf16.mxu0 %v3986_v0  ;;  %v3256_v21 = vld [vmem:[%s4913_s3] ss:$0 sm:$0xff] }
  0x1d   : > { %s3254_s26 = sshll.u32 %s4131_s25, 3 }
  0x1e   : > { %s473_s18 = scalar_lea.vmem %s4910_s0, %s3254_s26  ;;  %s3992_s26 = smov 112  }
  0x1f   : > { %v4137_v1 = vld [vmem:[%s473_s18] sm:$0xff]  ;;  %3649 = vmatpush3.bf16.msra.mxu0 %v3767_v9  ;;  %s3989_s18 = smov 96   ;;  %s3994_s0 = smov 104  }
  0x20   : > { %v481_v2 = vsel %vm480_vm0, %v4137_v1, 0.0  ;;  %3660 = vmatprep.subr.bf16.mxu0 %v3986_v0 }
  0x21   : > { %482 = vadd.xlane.f32.xlu0 %v481_v2 }
  0xae   : > { %v483_v3 = vpop.xlane.xlu0 %482 }
  0xaf   : > { %v485_v4 = vmul.f32 0.03125, %v483_v3 }
  0xb1   : > { %v486_v5 = vsub.f32 %v4137_v1, %v485_v4 }
  0xb3   : > { %v487_v6 = vmul.f32 %v486_v5, %v486_v5  ;;  %v508_v19 = vmul.f32 %v3255_v18, %v486_v5 }
  0xb5   : > { %v488_v7 = vsel %vm480_vm0, %v487_v6, 0.0 }
  0xb6   : > { %489 = vadd.xlane.f32.xlu0 %v488_v7 }
 0x143   : > { %v490_v10 = vpop.xlane.xlu0 %489 }
 0x144   : > { %v491_v11 = vmul.f32 0.032258064, %v490_v10 }
 0x146   : > { %3898 = vrsqrt.f32 %v491_v11  ;;  %vm494_vm2 = vcmp.eq.f32.partialorder %v491_v11, inf  ;;  %v497_v14 = vand.u32 2147483648, %v491_v11  ;;  %vm496_vm3 = vcmp.eq.f32.partialorder %v491_v11, 0.0 }
 0x150   : > { %v3899_v12 = vpop.eup %3898 }
 0x151   : > { %v493_v13 = vmul.f32 %v3899_v12, %v491_v11 }
 0x153   : > { %v495_v15 = vsel %vm494_vm2, %v491_v11, %v493_v13 }
 0x154   : > { %v498_v16 = vsel %vm496_vm3, %v497_v14, %v495_v15 }
 0x155   : > { %v499_v17 = vadd.f32 1e-06, %v498_v16 }
 0x157   : > { %3900 = vrcp.f32 %v499_v17 }
 0x161   : > { %v3901_v20 = vpop.eup %3900 }
 0x162   : > { %v509_v22 = vmul.f32 %v3901_v20, %v508_v19 }
 0x164   : > { %v517_v23 = vadd.f32 %v3256_v21, %v509_v22 }
 0x166   : > { %v518_v24 = vpack.c.bf16 %v517_v23, %v517_v23 }
 0x168   : > { %3651 = vmatmul.mubr.msk.bf16.vlgmr.msra.gmra.mrb[0].mxu0 %vm480_vm0, %v518_v24 }
 0x169   : > { %3662 = vmatprep.mubr.msk.bf16.mxu0 %vm3987_vm1, %v3986_v0 }
 0x23b   : > { %v579_v26 = vpop.f32.mrb[0].mxu0 }
 0x23c   : > { %v580_v27 = vadd.f32 %v3257_v25, %v579_v26  ;;  %v3652_v28 = vpop.f32.mrb[1].mxu0 }
 0x23d   : > { %v582_v29 = vpop.f32.mrb[2].mxu0 }
 0x23e   : > { %v4167_v30 = vpack.c.bf16 %v580_v27, %v580_v27  ;;  %v3653_v31 = vpop.f32.mrb[3].mxu0 }
 0x240   : > { %708 = vrot.lane.b32.xlu0 %v4167_v30, %s3988_s28  ;;  %589 = vrot.lane.b32.xlu1 %v4167_v30, %s3989_s18  ;;  %s476_s18 = scalar_lea.vmem %s4914_s1, %s4131_s25  ;;  %s3995_s25 = smov 64  }
 0x241   : > { %v479_v44 = vld [vmem:[%s476_s18] sm:$0x1]  ;;  %s3445_s1 = sshll.u32 %s4100_s17, 7  ;;  %s4003_s17 = smov [#allocation3]  }
 0x242   : > { %vm586_vm5 = vcmp.eq.f32.partialorder %v479_v44, 0.0 }
 0x243   : > { %v587_v47 = vsel %vm586_vm5, -1e+09, %v3986_v0 }
 0x244   : > { %710 = vrot.lane.b32.xlu1 %v4167_v30, %s3990_s20  ;;  %v643_v48 = vrot.slane %v587_v47, %v4204_v46  ;;  %s3996_s20 = smov 56  }
 0x248   : > { %828 = vrot.lane.b32.xlu1 %v4167_v30, %s3991_s21  ;;  %s3997_s21 = smov 48  }
 0x24c   : > { %826 = vrot.lane.b32.xlu1 %v4167_v30, %s3992_s26  ;;  %s3998_s26 = smov 40  }
 0x250   : > { %946 = vrot.lane.b32.xlu1 %v4167_v30, %s3993_s27  ;;  %s3999_s27 = smov 8  }
 0x254   : > { %944 = vrot.lane.b32.xlu1 %v4167_v30, %s3994_s0  ;;  %s467_s0 = sand.u32 1, %s3976_s30  }
 0x255   : > { %s3253_s28 = sshll.u32 %s467_s0, 3 }
 0x256   : > { %s469_s2 = scalar_lea.vmem [#allocation3], %s3253_s28  ;;  %s3926_s28 = sshll.u32 %s4003_s17, 4  ;;  %s3927_s28 = int_to_ptr.vmem [resolvable:$false] %s3926_s28 }
 0x257   : > { %s3181_s18 = sshll.u32 %s469_s2, 4  ;;  %s3928_s3 = scalar_lea.vmem %s3927_s28, 256  ;;  %s4847_s18 = int_to_ptr.vmem [resolvable:$true] %s3181_s18 }
 0x258   : > { %p3929_p0 = scmp.lt.s32.totalorder %s4847_s18, %s3927_s28 }
 0x2b2   : > { %v590_v32 = vpop.permute.xlu1 %589  ;;  %v709_v37 = vpop.permute.xlu0 %708 }
 0x2b3   : > { %v596_v33 = vsel %vm591_vm4, %v590_v32, 0 }
 0x2b4   : > { %3655 = vmatpush3.bf16.xpose.msra.mxu1 %v596_v33 }
 0x2b5   : > { %3666 = vmatprep.subr.bf16.mxu1 %v3986_v0 }
 0x2b6   : > { %v711_v34 = vpop.permute.xlu1 %710 }
 0x2b7   : > { %v716_v35 = vsel %vm591_vm4, %v711_v34, 0 }
 0x2ba   : > { %v829_v36 = vpop.permute.xlu1 %828 }
 0x2bb   : > { %3657 = vmatmul.mubr.msk.bf16.vlgmr.msra.gmra.mrb[0].mxu1 %vm591_vm4, %v4167_v30  ;;  %v834_v39 = vsel %vm591_vm4, %v829_v36, 0 }
 0x2bc   : > { %3667 = vmatpush3.bf16.xpose.msra.mxu1 %v716_v35  ;;  %3668 = vmatprep.mubr.msk.bf16.mxu1 %vm3987_vm1, %v3986_v0 }
 0x2bd   : > { %3678 = vmatprep.subr.bf16.mxu1 %v3986_v0 }
 0x2be   : > { %v827_v38 = vpop.permute.xlu1 %826 }
 0x2c2   : > { %v947_v40 = vpop.permute.xlu1 %946 }
 0x2c3   : > { %3669 = vmatmul.mubr.msk.bf16.vlgmr.msra.gmra.mrb[4].mxu1 %vm591_vm4, %v709_v37  ;;  %v952_v41 = vsel %vm591_vm4, %v947_v40, 0 }
 0x2c4   : > { %3679 = vmatpush3.bf16.xpose.msra.mxu1 %v834_v39  ;;  %3680 = vmatprep.mubr.msk.bf16.mxu1 %vm3987_vm1, %v3986_v0 }
 0x2c5   : > { %3690 = vmatprep.subr.bf16.mxu1 %v3986_v0 }
 0x2c6   : > { %v945_v42 = vpop.permute.xlu1 %944 }
 0x2cb   : > { %3681 = vmatmul.mubr.msk.bf16.vlgmr.msra.gmra.mrb[8].mxu1 %vm591_vm4, %v827_v38 }
 0x2cc   : > { %3691 = vmatpush3.bf16.xpose.msra.mxu1 %v952_v41  ;;  %3692 = vmatprep.mubr.msk.bf16.mxu1 %vm3987_vm1, %v3986_v0 }
 0x2cd   : > { %3702 = vmatprep.subr.bf16.mxu1 %v3986_v0 }
 0x2d3   : > { %3693 = vmatmul.mubr.msk.bf16.vlgmr.msra.gmra.mrb[12].mxu1 %vm591_vm4, %v945_v42 }
 0x2d4   : > { %3706 = vmatprep.mubr.msk.bf16.mxu1 %vm3987_vm1, %v3986_v0 }
 0x38e   : > { %v632_v49 = vpop.f32.mrb[0].mxu1 }
 0x38f   : > { %v638_v50 = vmul.f32 0.35355338, %v632_v49  ;;  %v3658_v51 = vpop.f32.mrb[1].mxu1 }
 0x390   : > { %v635_v52 = vpop.f32.mrb[2].mxu1 }
 0x391   : > { %v3659_v53 = vpop.f32.mrb[3].mxu1  ;;  %v645_v54 = vadd.f32 %v643_v48, %v638_v50 }
 0x393   : > { %v646_v55 = vsel %vm591_vm4, %v645_v54, -inf }
 0x394   : > { %647 = vmax.xlane.f32.xlu1 %v646_v55 }
 0x396   : > { %v752_v56 = vpop.f32.mrb[4].mxu1 }
 0x397   : > { %v758_v57 = vmul.f32 0.35355338, %v752_v56  ;;  %v3670_v58 = vpop.f32.mrb[5].mxu1 }
 0x398   : > { %v755_v59 = vpop.f32.mrb[6].mxu1 }
 0x399   : > { %v3671_v60 = vpop.f32.mrb[7].mxu1  ;;  %v759_v61 = vadd.f32 %v758_v57, %v643_v48 }
 0x39b   : > { %v760_v62 = vsel %vm591_vm4, %v759_v61, -inf }
 0x39c   : > { %761 = vmax.xlane.f32.xlu0 %v760_v62 }
 0x39e   : > { %v870_v63 = vpop.f32.mrb[8].mxu1 }
 0x39f   : > { %v876_v2 = vmul.f32 0.35355338, %v870_v63  ;;  %v3682_v3 = vpop.f32.mrb[9].mxu1 }
 0x3a0   : > { %v873_v4 = vpop.f32.mrb[10].mxu1  ;;  %v3768_v3 = vld [vmem:[%s4894_s6] sm:$0xff]  }
 0x3a1   : > { %v3683_v5 = vpop.f32.mrb[11].mxu1  ;;  %v877_v6 = vadd.f32 %v876_v2, %v643_v48  ;;  %3703 = vmatpush3.bf16.msra.mxu1 %v3768_v3 }
 0x3a2   : > { %3704 = vmatprep.subr.bf16.mxu1 %v3986_v0 }
 0x3a3   : > { %v878_v14 = vsel %vm591_vm4, %v877_v6, -inf }
 0x3a5   : > { %656 = vrot.lane.b32.xlu1 %v4167_v30, %s3995_s25 }
 0x3a6   : > { %v988_v7 = vpop.f32.mrb[12].mxu1 }
 0x3a7   : > { %v994_v8 = vmul.f32 0.35355338, %v988_v7  ;;  %v3694_v9 = vpop.f32.mrb[13].mxu1 }
 0x3a8   : > { %v991_v10 = vpop.f32.mrb[14].mxu1 }
 0x3a9   : > { %v3695_v11 = vpop.f32.mrb[15].mxu1  ;;  %v995_v12 = vadd.f32 %v994_v8, %v643_v48 }
 0x3ab   : > { %v996_v13 = vsel %vm591_vm4, %v995_v12, -inf }
 0x3ac   : > { %997 = vmax.xlane.f32.xlu0 %v996_v13 }
 0x3c2   : > { %770 = vrot.lane.b32.xlu0 %v4167_v30, %s3996_s20  ;;  %s4000_s20 = smov 16  }
 0x3c9   : > { %879 = vmax.xlane.f32.xlu1 %v878_v14 }
 0x3da   : > { %888 = vrot.lane.b32.xlu1 %v4167_v30, %s3997_s21  ;;  %s4001_s21 = smov 24  }
 0x3de   : > { %1006 = vrot.lane.b32.xlu1 %v4167_v30, %s3998_s26  ;;  %s3168_s26 = scalar_lea.sflag [#allocation4], %s467_s0 }
 0x421   : > { %v648_v15 = vpop.xlane.xlu1 %647 }
 0x422   : > { %v649_v16 = vsub.f32 %v645_v54, %v648_v15 }
 0x424   : > { %v650_v17 = vmul.f32 1.442695, %v649_v16 }
 0x425   : > { %v657_v18 = vpop.permute.xlu1 %656 }
 0x426   : > { %3902 = vpow2.f32 %v650_v17  ;;  %v663_v19 = vsel %vm661_vm6, %v657_v18, 0 }
 0x427   : > { %3661 = vmatpush3.bf16.msra.mxu0 %v663_v19 }
 0x428   : > { %3672 = vmatprep.subr.bf16.mxu0 %v3986_v0 }
 0x429   : > { %v762_v20 = vpop.xlane.xlu0 %761 }
 0x42a   : > { %v763_v21 = vsub.f32 %v759_v61, %v762_v20 }
 0x42c   : > { %v764_v22 = vmul.f32 1.442695, %v763_v21  ;;  %v3269_v21 = vld [vmem:[%s4895_s7] ss:$0 sm:$0xff] }
 0x42e   : > { %3904 = vpow2.f32 %v764_v22 }
 0x430   : > { %v3903_v23 = vpop.eup %3902 }
 0x431   : > { %v655_v24 = vpack.c.bf16 %v3903_v23, %v3903_v23  ;;  %v652_v35 = vsel %vm591_vm4, %v3903_v23, 0.0 }
 0x433   : > { %3663 = vmatmul.mubr.msk.bf16.vlgmr.msra.gmra.mrb[4].mxu0 %vm591_vm4, %v655_v24 }
 0x434   : > { %3674 = vmatprep.mubr.msk.bf16.mxu0 %vm3987_vm1, %v3986_v0 }
 0x438   : > { %v3905_v25 = vpop.eup %3904 }
 0x439   : > { %v998_v26 = vpop.xlane.xlu0 %997  ;;  %v766_v27 = vsel %vm591_vm4, %v3905_v25, 0.0  ;;  %v769_v32 = vpack.c.bf16 %v3905_v25, %v3905_v25 }
 0x43a   : > { %v999_v28 = vsub.f32 %v995_v12, %v998_v26  ;;  %767 = vadd.xlane.f32.xlu0 %v766_v27 }
 0x43c   : > { %v1000_v29 = vmul.f32 1.442695, %v999_v28 }
 0x43d   : > { %v771_v30 = vpop.permute.xlu0 %770 }
 0x43e   : > { %3906 = vpow2.f32 %v1000_v29  ;;  %v776_v31 = vsel %vm661_vm6, %v771_v30, 0 }
 0x43f   : > { %3673 = vmatpush3.bf16.msra.mxu0 %v776_v31 }
 0x440   : > { %3684 = vmatprep.subr.bf16.mxu0 %v3986_v0 }
 0x442   : > { %3675 = vmatmul.mubr.msk.bf16.vlgmr.msra.gmra.mrb[8].mxu0 %vm591_vm4, %v769_v32 }
 0x443   : > { %3686 = vmatprep.mubr.msk.bf16.mxu0 %vm3987_vm1, %v3986_v0 }
 0x448   : > { %v3907_v33 = vpop.eup %3906 }
 0x449   : > { %v1002_v34 = vsel %vm591_vm4, %v3907_v33, 0.0  ;;  %v1005_v48 = vpack.c.bf16 %v3907_v33, %v3907_v33 }
 0x44a   : > { %1003 = vadd.xlane.f32.xlu0 %v1002_v34  ;;  %v1168_v34 = vld [vmem:[%s4898_s10] sm:$0xff] }
 0x44e   : > { %653 = vadd.xlane.f32.xlu0 %v652_v35  ;;  %v1169_v35 = vld [vmem:[%s4898_s10 + $0x8] sm:$0xff] }
 0x456   : > { %v880_v36 = vpop.xlane.xlu1 %879 }
 0x457   : > { %v881_v37 = vsub.f32 %v877_v6, %v880_v36  ;;  %v3769_v6 = vld [vmem:[%s4894_s6 + $0x8] sm:$0xff]  }
 0x458   : > { %3705 = vmatpush3.bf16.msra.mxu1 %v3769_v6  ;;  %v3273_v6 = vld [vmem:[%s4896_s8] ss:$0 sm:$0xff] }
 0x459   : > { %v882_v38 = vmul.f32 1.442695, %v881_v37  ;;  %v1171_v37 = vld [vmem:[%s4898_s10 + $0x48] sm:$0xff] }
 0x45a   : > { %v889_v39 = vpop.permute.xlu1 %888 }
 0x45b   : > { %3908 = vpow2.f32 %v882_v38  ;;  %v894_v40 = vsel %vm661_vm6, %v889_v39, 0  ;;  %v3277_v39 = vcombine.low %v1169_v35, %v1171_v37 }
 0x45c   : > { %3685 = vmatpush3.bf16.msra.mxu0 %v894_v40  ;;  %v3278_v40 = vcombine.high %v1169_v35, %v1171_v37  ;;  %v3785_v35 = vld [vmem:[%s4900_s12 + $0x198] sm:$0xff]   ;;  %v3787_v37 = vld [vmem:[%s4900_s12 + $0x1e0] sm:$0xff]  }
 0x45d   : > { %3696 = vmatprep.subr.bf16.mxu0 %v3986_v0 }
 0x45e   : > { %v1007_v42 = vpop.permute.xlu1 %1006  ;;  %1282 = vmatprep.subr.bf16.mxu1 %v3278_v40  ;;  %v3790_v40 = vld [vmem:[%s4900_s12 + $0x168] sm:$0xff]  }
 0x45f   : > { %v1012_v47 = vsel %vm661_vm6, %v1007_v42, 0  ;;  %v1174_v42 = vld [vmem:[%s4898_s10 + $0xc0] sm:$0xff] }
 0x465   : > { %v3909_v41 = vpop.eup %3908 }
 0x466   : > { %v884_v43 = vsel %vm591_vm4, %v3909_v41, 0.0  ;;  %v887_v44 = vpack.c.bf16 %v3909_v41, %v3909_v41  ;;  %v1172_v41 = vld [vmem:[%s4898_s10 + $0x80] sm:$0xff] }
 0x467   : > { %885 = vadd.xlane.f32.xlu1 %v884_v43  ;;  %v1173_v43 = vld [vmem:[%s4898_s10 + $0x88] sm:$0xff] }
 0x468   : > { %3687 = vmatmul.mubr.msk.bf16.vlgmr.msra.gmra.mrb[12].mxu0 %vm591_vm4, %v887_v44  ;;  %v3279_v44 = vcombine.low %v1172_v41, %v1174_v42 }
 0x469   : > { %3697 = vmatpush3.bf16.msra.mxu0 %v1012_v47  ;;  %3698 = vmatprep.mubr.msk.bf16.mxu0 %vm3987_vm1, %v3986_v0  ;;  %v3280_v47 = vcombine.high %v1172_v41, %v1174_v42  ;;  %v3791_v41 = vld [vmem:[%s4900_s12 + $0x1e8] sm:$0xff]  }
 0x46a   : > { %v3792_v42 = vld [vmem:[%s4900_s12 + $0x128] sm:$0xff]  }
 0x470   : > { %3699 = vmatmul.mubr.msk.bf16.vlgmr.msra.gmra.mrb[16].mxu0 %vm591_vm4, %v1005_v48  ;;  %v1175_v48 = vld [vmem:[%s4898_s10 + $0xc8] sm:$0xff] }
 0x4c7   : > { %v768_v49 = vpop.xlane.xlu0 %767 }
 0x4d7   : > { %v1004_v50 = vpop.xlane.xlu0 %1003 }
 0x4db   : > { %v654_v51 = vpop.xlane.xlu0 %653 }
 0x4dc   : > { %3910 = vrcp.f32 %v654_v51  ;;  %v3282_v51 = vcombine.high %v1173_v43, %v1175_v48 }
 0x4dd   : > { %3912 = vrcp.f32 %v768_v49  ;;  %v4002_v49 = vmov 0  }
 0x4de   : > { %1273 = vmatprep.mubr.bf16.mxu0 %v4002_v49 }
 0x4e6   : > { %v3911_v52 = vpop.eup %3910 }
 0x4e7   : > { %v3913_v58 = vpop.eup %3912 }
 0x4f4   : > { %v886_v2 = vpop.xlane.xlu1 %885 }
 0x4f5   : > { %3914 = vrcp.f32 %v886_v2 }
 0x4f6   : > { %3916 = vrcp.f32 %v1004_v50  ;;  %v3281_v50 = vcombine.low %v1173_v43, %v1175_v48  ;;  %v3793_v43 = vld [vmem:[%s4900_s12 + $0x1a8] sm:$0xff]   ;;  %v3796_v48 = vld [vmem:[%s4900_s12 + $0x130] sm:$0xff]  }
 0x4ff   : > { %v3915_v4 = vpop.eup %3914 }
 0x500   : > { %v3917_v11 = vpop.eup %3916 }
 0x506   : > { %v699_v53 = vpop.f32.mrb[4].mxu0 }
 0x507   : > { %v706_v54 = vmul.f32 %v3911_v52, %v699_v53  ;;  %v3664_v55 = vpop.f32.mrb[5].mxu0  ;;  %v1395_v52 = vld [vmem:[%s4898_s10 + $0x10] sm:$0xff] }
 0x508   : > { %v702_v56 = vpop.f32.mrb[6].mxu0  ;;  %v1397_v53 = vld [vmem:[%s4898_s10 + $0x50] sm:$0xff] }
 0x509   : > { %707 = vst.msk [vmem:[#allocation2] sm:$0xff] %vm591_vm4, %v706_v54  ;;  %v3665_v57 = vpop.f32.mrb[7].mxu0  ;;  %v1396_v54 = vld [vmem:[%s4898_s10 + $0x18] sm:$0xff]  ;;  %v3286_v55 = vcombine.high %v1395_v52, %v1397_v53 }
 0x50a   : > { %v1398_v56 = vld [vmem:[%s4898_s10 + $0x58] sm:$0xff]  ;;  %v3285_v57 = vcombine.low %v1395_v52, %v1397_v53 }
 0x50b   : > { %v3799_v52 = vld [vmem:[%s4900_s12 + $0x1f8] sm:$0xff]  }
 0x50c   : > { %v3800_v53 = vld [vmem:[%s4900_s12 + $0x138] sm:$0xff]  }
 0x515   : > { %v812_v59 = vpop.f32.mrb[8].mxu0 }
 0x516   : > { %v819_v60 = vmul.f32 %v3913_v58, %v812_v59  ;;  %v3676_v61 = vpop.f32.mrb[9].mxu0  ;;  %v3287_v58 = vcombine.low %v1396_v54, %v1398_v56  ;;  %v3288_v59 = vcombine.high %v1396_v54, %v1398_v56  ;;  %v3801_v54 = vld [vmem:[%s4900_s12 + $0x1b8] sm:$0xff]   ;;  %v3803_v56 = vld [vmem:[%s4900_s12 + $0xc0] sm:$0xff]  }
 0x517   : > { %v815_v62 = vpop.f32.mrb[10].mxu0 }
 0x518   : > { %821 = vrot.lane.b32.xlu1 %v819_v60, %s3999_s27  ;;  %v3677_v63 = vpop.f32.mrb[11].mxu0  ;;  %s3922_s27 = scalar_lea.vmem %s4847_s18, 128 }
 0x519   : > { %p3923_p11 = scmp.ne.s32.totalorder %s4847_s18, %s3922_s27  ;;  %p3930_p1 = scmp.lt.s32.totalorder %s3928_s3, %s3922_s27 }
 0x51b   : > { %p3924_p12 = pnand %p3923_p11, %p4117_p5  ;;  %p3931_p2 = por %p3930_p1, %p3929_p0 }
 0x51d   : > { %p3925_p13 = pneg %p3924_p12 }
 0x51f   : > { %p3932_p3 = pnand %p3931_p2, %p3925_p13 }
 0x53b   : > { %v930_v5 = vpop.f32.mrb[12].mxu0 }
 0x53c   : > { %v937_v7 = vmul.f32 %v3915_v4, %v930_v5  ;;  %v3688_v8 = vpop.f32.mrb[13].mxu0 }
 0x53d   : > { %v933_v9 = vpop.f32.mrb[14].mxu0 }
 0x53e   : > { %939 = vrot.lane.b32.xlu0 %v937_v7, %s4000_s20  ;;  %v3689_v10 = vpop.f32.mrb[15].mxu0  ;;  %v3274_v9 = vld [vmem:[%s4897_s9] ss:$0 sm:$0xff] }
 0x543   : > { %v1048_v12 = vpop.f32.mrb[16].mxu0 }
 0x544   : > { %v1055_v13 = vmul.f32 %v3917_v11, %v1048_v12  ;;  %v3700_v14 = vpop.f32.mrb[17].mxu0  ;;  %v1399_v11 = vld [vmem:[%s4898_s10 + $0x90] sm:$0xff] }
 0x545   : > { %v1051_v15 = vpop.f32.mrb[18].mxu0  ;;  %v1401_v12 = vld [vmem:[%s4898_s10 + $0xd0] sm:$0xff]  ;;  %v1402_v14 = vld [vmem:[%s4898_s10 + $0xd8] sm:$0xff] }
 0x546   : > { %1057 = vrot.lane.b32.xlu1 %v1055_v13, %s4001_s21  ;;  %v3701_v16 = vpop.f32.mrb[19].mxu0  ;;  %v1400_v13 = vld [vmem:[%s4898_s10 + $0x98] sm:$0xff]  ;;  %s4845_s21 = scalar_lea.hbm %s4902_s14, %s3445_s1 }
 0x58a   : > { %v822_v17 = vpop.permute.xlu1 %821 }
 0x58b   : > { %825 = vst.msk [vmem:[#allocation2] sm:$0xff] %vm824_vm7, %v822_v17  ;;  %v3290_v17 = vcombine.high %v1399_v11, %v1401_v12 }
 0x5b0   : > { %v940_v18 = vpop.permute.xlu0 %939 }
 0x5b1   : > { %943 = vst.msk [vmem:[#allocation2] sm:$0xff] %vm942_vm8, %v940_v18  ;;  %v3292_v18 = vcombine.high %v1400_v13, %v1402_v14 }
 0x5b8   : > { %v1058_v0 = vpop.permute.xlu1 %1057 }
 0x5b9   : > { %1061 = vst.msk [vmem:[#allocation2] sm:$0xff] %vm1060_vm9, %v1058_v0  ;;  %v3289_v0 = vcombine.low %v1399_v11, %v1401_v12 }
 0x5c0   : > { %v1062_v19 = vld [vmem:[#allocation2] sm:$0xff] }
 0x5c1   : > { %v1063_v20 = vpack.c.bf16 %v1062_v19, %v1062_v19  ;;  %v3291_v19 = vcombine.low %v1400_v13, %v1402_v14 }
 0x5c3   : > { %3707 = vmatmul.mubr.msk.bf16.vlgmr.msra.gmra.mrb[16].mxu1 %vm480_vm0, %v1063_v20  ;;  %v3770_v20 = vld [vmem:[%s4900_s12 + $0x140] sm:$0xff]  }
 0x5c4   : > { %1283 = vmatpush1.bf16.msra.mxu1 %v3277_v39  ;;  %1314 = vmatprep.mubr.bf16.mxu1 %v4002_v49  ;;  %v3789_v39 = vld [vmem:[%s4900_s12 + $0x1a0] sm:$0xff]  }
 0x5c5   : > { %1284 = vmatprep.subr.bf16.mxu1 %v3282_v51  ;;  %v3798_v51 = vld [vmem:[%s4900_s12 + $0x178] sm:$0xff]  }
 0x5c8   : > { %1285 = vmatpush1.bf16.msra.mxu1 %v3281_v50  ;;  %v3797_v50 = vld [vmem:[%s4900_s12 + $0x1b0] sm:$0xff]  }
 0x5c9   : > { %1506 = vmatprep.subr.bf16.mxu1 %v3288_v59  ;;  %v4431_v59 = vsub.s32 1, %v4201_v45 }
 0x696   : > { %v1124_v22 = vpop.f32.mrb[16].mxu1 }
 0x697   : > { %v1125_v23 = vadd.f32 %v3269_v21, %v1124_v22  ;;  %v3708_v24 = vpop.f32.mrb[17].mxu1  ;;  %v3771_v21 = vld [vmem:[%s4900_s12 + $0x1c0] sm:$0xff]  }
 0x698   : > { %v1127_v25 = vpop.f32.mrb[18].mxu1  ;;  %v3772_v22 = vld [vmem:[%s4900_s12 + $0x100] sm:$0xff]   ;;  %v3774_v24 = vld [vmem:[%s4900_s12 + $0x148] sm:$0xff]  }
 0x699   : > { %v4250_v26 = vadd.f32 %v1125_v23, %v4137_v1  ;;  %v3709_v27 = vpop.f32.mrb[19].mxu1  ;;  %v1170_v1 = vld [vmem:[%s4898_s10 + $0x40] sm:$0xff]  ;;  %v3775_v25 = vld [vmem:[%s4900_s12 + $0x1c8] sm:$0xff]  }
 0x69a   : > { %v3276_v36 = vcombine.high %v1168_v34, %v1170_v1  ;;  %v3275_v38 = vcombine.low %v1168_v34, %v1170_v1  ;;  %v3773_v23 = vld [vmem:[%s4900_s12 + $0x180] sm:$0xff]   ;;  %v3776_v27 = vld [vmem:[%s4900_s12 + $0x108] sm:$0xff]   ;;  %v3783_v34 = vld [vmem:[%s4900_s12 + $0x1d8] sm:$0xff]  }
 0x69b   : > { %v1131_v28 = vsel %vm480_vm0, %v4250_v26, 0.0  ;;  %v3784_v1 = vld [vmem:[%s4900_s12 + $0x118] sm:$0xff]  }
 0x69c   : > { %1132 = vadd.xlane.f32.xlu1 %v1131_v28  ;;  %1241 = vmatprep.subr.bf16.mxu0 %v3276_v36  ;;  %v3777_v28 = vld [vmem:[%s4900_s12 + $0x188] sm:$0xff]   ;;  %v3786_v36 = vld [vmem:[%s4900_s12 + $0x160] sm:$0xff]  }
 0x69d   : > { %1242 = vmatpush1.bf16.msra.mxu0 %v3275_v38  ;;  %v3788_v38 = vld [vmem:[%s4900_s12 + $0x120] sm:$0xff]  }
 0x69e   : > { %1243 = vmatprep.subr.bf16.mxu0 %v3280_v47  ;;  %v3795_v47 = vld [vmem:[%s4900_s12 + $0x1f0] sm:$0xff]  }
 0x6a1   : > { %1244 = vmatpush1.bf16.msra.mxu0 %v3279_v44  ;;  %v3794_v44 = vld [vmem:[%s4900_s12 + $0x170] sm:$0xff]  }
 0x6a2   : > { %1465 = vmatprep.subr.bf16.mxu0 %v3286_v55  ;;  %v3802_v55 = vld [vmem:[%s4900_s12 + $0x40] sm:$0xff]  }
 0x729   : > { %v1133_v29 = vpop.xlane.xlu1 %1132 }
 0x72a   : > { %v1134_v30 = vmul.f32 0.03125, %v1133_v29  ;;  %v3778_v29 = vld [vmem:[%s4900_s12 + $0x150] sm:$0xff]  }
 0x72c   : > { %v1135_v31 = vsub.f32 %v4250_v26, %v1134_v30  ;;  %v3779_v30 = vld [vmem:[%s4900_s12 + $0x1d0] sm:$0xff]  }
 0x72e   : > { %v1136_v32 = vmul.f32 %v1135_v31, %v1135_v31  ;;  %v1157_v7 = vmul.f32 %v3273_v6, %v1135_v31  ;;  %v3780_v31 = vld [vmem:[%s4900_s12 + $0x110] sm:$0xff]  }
 0x730   : > { %v1137_v33 = vsel %vm480_vm0, %v1136_v32, 0.0  ;;  %v3781_v32 = vld [vmem:[%s4900_s12 + $0x190] sm:$0xff]  }
 0x731   : > { %1138 = vadd.xlane.f32.xlu0 %v1137_v33  ;;  %v3782_v33 = vld [vmem:[%s4900_s12 + $0x158] sm:$0xff]  }
 0x7be   : > { %v1139_v60 = vpop.xlane.xlu0 %1138 }
 0x7bf   : > { %v1140_v61 = vmul.f32 0.032258064, %v1139_v60 }
 0x7c1   : > { %3918 = vrsqrt.f32 %v1140_v61  ;;  %vm1143_vm10 = vcmp.eq.f32.partialorder %v1140_v61, inf  ;;  %v1146_v2 = vand.u32 2147483648, %v1140_v61  ;;  %vm1145_vm11 = vcmp.eq.f32.partialorder %v1140_v61, 0.0 }
 0x7cb   : > { %v3919_v62 = vpop.eup %3918 }
 0x7cc   : > { %v1142_v63 = vmul.f32 %v3919_v62, %v1140_v61 }
 0x7ce   : > { %v1144_v3 = vsel %vm1143_vm10, %v1140_v61, %v1142_v63  ;;  %v4434_v61 = vsub.s32 3, %v4201_v45  ;;  %v4439_v63 = vld [vmem:[%s4899_s11] sm:$0xf] }
 0x7cf   : > { %v1147_v4 = vsel %vm1145_vm11, %v1146_v2, %v1144_v3 }
 0x7d0   : > { %v1148_v5 = vadd.f32 1e-06, %v1147_v4  ;;  %v1403_v4 = vld [vmem:[%s4899_s11 + $0x4] sm:$0xf] }
 0x7d1   : > { %v1412_v12 = vrot.slane %v1403_v4, %v4431_v59  ;;  %v1420_v13 = vrot.slane %v1403_v4, %v4434_v61 }
 0x7d2   : > { %3920 = vrcp.f32 %v1148_v5  ;;  %v4445_v5 = vsub.s32 2, %v4201_v45 }
 0x7d4   : > { %v1416_v11 = vrot.slane %v1403_v4, %v4445_v5 }
 0x7dc   : > { %v3921_v8 = vpop.eup %3920 }
 0x7dd   : > { %v1158_v10 = vmul.f32 %v3921_v8, %v1157_v7  ;;  %v1185_v8 = vrot.slane %v4439_v63, %v4431_v59 }
 0x7df   : > { %v1166_v15 = vadd.f32 %v3274_v9, %v1158_v10  ;;  %v1193_v9 = vrot.slane %v4439_v63, %v4434_v61  ;;  %v1408_v10 = vrot.slane %v1403_v4, %v4204_v46  ;;  %v3823_v4 = vld [vmem:[%s4900_s12 + $0xe8] sm:$0xff]  }
 0x7e1   : > { %v4312_v16 = vpack.c.bf16 %v1166_v15, %v1166_v15 }
 0x7e3   : > { %3283 = vmatmul.mubr.msk.bf16.vlgmr.msra.gmra.mrb[20].mxu0 %vm480_vm0, %v4312_v16  ;;  %3284 = vmatmul.mubr.msk.bf16.vlgmr.msra.gmra.mrb[20].mxu1 %vm480_vm0, %v4312_v16 }
 0x7e4   : > { %1466 = vmatpush1.bf16.msra.mxu0 %v3285_v57  ;;  %1507 = vmatpush1.bf16.msra.mxu1 %v3287_v58 }
 0x7e5   : > { %1467 = vmatprep.subr.bf16.mxu0 %v3290_v17  ;;  %1508 = vmatprep.subr.bf16.mxu1 %v3292_v18 }
 0x7e6   : > { %1497 = vmatprep.mubr.bf16.mxu0 %v4002_v49  ;;  %1538 = vmatprep.mubr.bf16.mxu1 %v4002_v49 }
 0x7e8   : > { %1468 = vmatpush1.bf16.msra.mxu0 %v3289_v0  ;;  %1509 = vmatpush1.bf16.msra.mxu1 %v3291_v19 }
 0x7e9   : > { %3470 = vmatprep.subr.bf16.mxu0 %v3770_v20  ;;  %3492 = vmatprep.subr.bf16.mxu1 %v3771_v21 }
 0x7eb   : > { %3293 = vmatmul.mubr.msk.bf16.vlgmr.msra.gmra.mrb[24].mxu0 %vm480_vm0, %v4312_v16  ;;  %3294 = vmatmul.mubr.msk.bf16.vlgmr.msra.gmra.mrb[24].mxu1 %vm480_vm0, %v4312_v16 }
 0x7ec   : > { %3471 = vmatpush3.bf16.msra.mxu0 %v3772_v22  ;;  %3493 = vmatpush3.bf16.msra.mxu1 %v3773_v23 }
 0x7ed   : > { %3472 = vmatprep.subr.bf16.mxu0 %v3774_v24  ;;  %3494 = vmatprep.subr.bf16.mxu1 %v3775_v25 }
 0x7f0   : > { %3473 = vmatpush3.bf16.msra.mxu0 %v3776_v27  ;;  %3495 = vmatpush3.bf16.msra.mxu1 %v3777_v28 }
 0x7f1   : > { %3474 = vmatprep.subr.bf16.mxu0 %v3778_v29  ;;  %3496 = vmatprep.subr.bf16.mxu1 %v3779_v30 }
 0x7f4   : > { %3475 = vmatpush3.bf16.msra.mxu0 %v3780_v31  ;;  %3497 = vmatpush3.bf16.msra.mxu1 %v3781_v32 }
 0x7f5   : > { %3476 = vmatprep.subr.bf16.mxu0 %v3782_v33  ;;  %3498 = vmatprep.subr.bf16.mxu1 %v3783_v34 }
 0x7f8   : > { %3477 = vmatpush3.bf16.msra.mxu0 %v3784_v1  ;;  %3499 = vmatpush3.bf16.msra.mxu1 %v3785_v35  ;;  %v3804_v35 = vld [vmem:[%s4900_s12] sm:$0xff]  }
 0x7f9   : > { %3478 = vmatprep.subr.bf16.mxu0 %v3786_v36  ;;  %3500 = vmatprep.subr.bf16.mxu1 %v3787_v37  ;;  %v3805_v36 = vld [vmem:[%s4900_s12 + $0x80] sm:$0xff]  }
 0x7fc   : > { %3479 = vmatpush3.bf16.msra.mxu0 %v3788_v38  ;;  %3501 = vmatpush3.bf16.msra.mxu1 %v3789_v39  ;;  %v3806_v39 = vld [vmem:[%s4900_s12 + $0x48] sm:$0xff]  }
 0x7fd   : > { %3480 = vmatprep.subr.bf16.mxu0 %v3790_v40  ;;  %3502 = vmatprep.subr.bf16.mxu1 %v3791_v41  ;;  %v3807_v40 = vld [vmem:[%s4900_s12 + $0xc8] sm:$0xff]  }
 0x800   : > { %3481 = vmatpush3.bf16.msra.mxu0 %v3792_v42  ;;  %3503 = vmatpush3.bf16.msra.mxu1 %v3793_v43  ;;  %v3808_v43 = vld [vmem:[%s4900_s12 + $0x8] sm:$0xff]  }
 0x801   : > { %3482 = vmatprep.subr.bf16.mxu0 %v3794_v44  ;;  %3504 = vmatprep.subr.bf16.mxu1 %v3795_v47  ;;  %v3809_v44 = vld [vmem:[%s4900_s12 + $0x88] sm:$0xff]   ;;  %v3810_v47 = vld [vmem:[%s4900_s12 + $0x50] sm:$0xff]  }
 0x804   : > { %3483 = vmatpush3.bf16.msra.mxu0 %v3796_v48  ;;  %3505 = vmatpush3.bf16.msra.mxu1 %v3797_v50  ;;  %v3811_v48 = vld [vmem:[%s4900_s12 + $0xd0] sm:$0xff]  }
 0x805   : > { %3484 = vmatprep.subr.bf16.mxu0 %v3798_v51  ;;  %3506 = vmatprep.subr.bf16.mxu1 %v3799_v52  ;;  %v3812_v50 = vld [vmem:[%s4900_s12 + $0x10] sm:$0xff]   ;;  %v3814_v52 = vld [vmem:[%s4900_s12 + $0x58] sm:$0xff]  }
 0x806   : > { %v3813_v51 = vld [vmem:[%s4900_s12 + $0x90] sm:$0xff]  }
 0x808   : > { %3485 = vmatpush3.bf16.msra.mxu0 %v3800_v53  ;;  %3507 = vmatpush3.bf16.msra.mxu1 %v3801_v54  ;;  %v3815_v53 = vld [vmem:[%s4900_s12 + $0xd8] sm:$0xff]  }
 0x809   : > { %3514 = vmatprep.subr.bf16.mxu0 %v3802_v55  ;;  %3536 = vmatprep.subr.bf16.mxu1 %v3803_v56  ;;  %v3816_v54 = vld [vmem:[%s4900_s12 + $0x18] sm:$0xff]   ;;  %v3818_v56 = vld [vmem:[%s4900_s12 + $0x60] sm:$0xff]  }
 0x80a   : > { %v3817_v55 = vld [vmem:[%s4900_s12 + $0x98] sm:$0xff]  }
 0x8b6   : > { %v4426_v57 = vpop.f32.mrb[20].mxu0  ;;  %v4428_v58 = vpop.f32.mrb[20].mxu1 }
 0x8b7   : > { %v1277_v60 = vpop.f32.mrb[21].mxu0  ;;  %v1318_v62 = vpop.f32.mrb[21].mxu1 }
 0x8b8   : > { %v1279_v2 = vpop.f32.mrb[22].mxu0  ;;  %v1320_v3 = vpop.f32.mrb[22].mxu1  ;;  %v1278_v45 = vadd.f32 %v1277_v60, %v1185_v8  ;;  %v1319_v17 = vadd.f32 %v1318_v62, %v1193_v9  ;;  %v3819_v60 = vld [vmem:[%s4900_s12 + $0xe0] sm:$0xff]   ;;  %v1181_v8 = vrot.slane %v4439_v63, %v4204_v46  ;;  %v1189_v9 = vrot.slane %v4439_v63, %v4445_v5  ;;  %v3829_v63 = vld [vmem:[%s4900_s12 + $0xb0] sm:$0xff]  }
 0x8b9   : > { %v1280_v6 = vpop.f32.mrb[23].mxu0  ;;  %v1321_v7 = vpop.f32.mrb[23].mxu1  ;;  %v3820_v62 = vld [vmem:[%s4900_s12 + $0x20] sm:$0xff]   ;;  %v3822_v3 = vld [vmem:[%s4900_s12 + $0x68] sm:$0xff]  }
 0x8ba   : > { %v1324_v32 = vmax.f32 %v1278_v45, 0.0  ;;  %v1326_v33 = vmax.f32 %v1319_v17, 0.0  ;;  %v3821_v2 = vld [vmem:[%s4900_s12 + $0xa0] sm:$0xff]   ;;  %v3824_v6 = vld [vmem:[%s4900_s12 + $0x28] sm:$0xff]   ;;  %v3831_v45 = vld [vmem:[%s4900_s12 + $0xf8] sm:$0xff]  }
 0x8bb   : > { %v3825_v7 = vld [vmem:[%s4900_s12 + $0xa8] sm:$0xff]   ;;  %v2163_v17 = vld [vmem:[%s4898_s10 + $0x20] sm:$0xff] }
 0x8bc   : > { %v1328_v41 = vpack.c.bf16 %v1324_v32, %v1324_v32  ;;  %v1330_v42 = vpack.c.bf16 %v1326_v33, %v1326_v33 }
 0x8be   : > { %v1499_v14 = vpop.f32.mrb[24].mxu0  ;;  %v1540_v15 = vpop.f32.mrb[24].mxu1 }
 0x8bf   : > { %v1500_v18 = vadd.f32 %v1499_v14, %v1408_v10  ;;  %v1541_v0 = vadd.f32 %v1540_v15, %v1416_v11  ;;  %v1501_v19 = vpop.f32.mrb[25].mxu0  ;;  %v1542_v20 = vpop.f32.mrb[25].mxu1  ;;  %v3826_v10 = vld [vmem:[%s4900_s12 + $0x70] sm:$0xff]   ;;  %v1317_v14 = vadd.f32 %v4428_v58, %v1189_v9  ;;  %v3830_v15 = vld [vmem:[%s4900_s12 + $0x78] sm:$0xff]   ;;  %v2164_v58 = vld [vmem:[%s4898_s10 + $0x28] sm:$0xff] }
 0x8c0   : > { %v1502_v21 = vadd.f32 %v1501_v19, %v1412_v12  ;;  %v1543_v22 = vadd.f32 %v1542_v20, %v1420_v13  ;;  %v1503_v23 = vpop.f32.mrb[26].mxu0  ;;  %v1544_v24 = vpop.f32.mrb[26].mxu1  ;;  %v3827_v11 = vld [vmem:[%s4900_s12 + $0xf0] sm:$0xff]   ;;  %v1276_v13 = vadd.f32 %v4426_v57, %v1181_v8  ;;  %v2165_v57 = vld [vmem:[%s4898_s10 + $0x60] sm:$0xff]  ;;  %v3833_v19 = vld [vmem:[%s4900_s12 + $0xb8] sm:$0xff]  }
 0x8c1   : > { %v1547_v25 = vmax.f32 %v1500_v18, 0.0  ;;  %v1549_v27 = vmax.f32 %v1541_v0, 0.0  ;;  %v1504_v28 = vpop.f32.mrb[27].mxu0  ;;  %v1545_v29 = vpop.f32.mrb[27].mxu1  ;;  %v3828_v12 = vld [vmem:[%s4900_s12 + $0x30] sm:$0xff]   ;;  %v2166_v18 = vld [vmem:[%s4898_s10 + $0x68] sm:$0xff] }
 0x8c2   : > { %v1548_v30 = vmax.f32 %v1502_v21, 0.0  ;;  %v1550_v31 = vmax.f32 %v1543_v22, 0.0  ;;  %v3832_v0 = vld [vmem:[%s4900_s12 + $0x38] sm:$0xff]   ;;  %v1323_v20 = vmax.f32 %v1276_v13, 0.0  ;;  %v1325_v21 = vmax.f32 %v1317_v14, 0.0  ;;  %v2167_v24 = vld [vmem:[%s4898_s10 + $0xa0] sm:$0xff] }
 0x8c3   : > { %v1551_v37 = vpack.c.bf16 %v1547_v25, %v1547_v25  ;;  %v1553_v38 = vpack.c.bf16 %v1549_v27, %v1549_v27  ;;  %v3360_v22 = vcombine.high %v2163_v17, %v2165_v57  ;;  %v3362_v23 = vcombine.high %v2164_v58, %v2166_v18  ;;  %v2169_v25 = vld [vmem:[%s4898_s10 + $0xe0] sm:$0xff]  ;;  %v2168_v27 = vld [vmem:[%s4898_s10 + $0xa8] sm:$0xff]  ;;  %v3859_v8 = vld [vmem:[%s4900_s12 + $0x2f0] sm:$0xff]  }
 0x8c4   : > { %v1552_v34 = vpack.c.bf16 %v1548_v30, %v1548_v30  ;;  %v1554_v1 = vpack.c.bf16 %v1550_v31, %v1550_v31  ;;  %v2170_v28 = vld [vmem:[%s4898_s10 + $0xe8] sm:$0xff]  ;;  %v3359_v29 = vcombine.low %v2163_v17, %v2165_v57  ;;  %v3361_v30 = vcombine.low %v2164_v58, %v2166_v18  ;;  %v3860_v9 = vld [vmem:[%s4900_s12 + $0x230] sm:$0xff]   ;;  %v3865_v13 = vld [vmem:[%s4900_s12 + $0x2b8] sm:$0xff]  }
 0x8c5   : > { %v3364_v31 = vcombine.high %v2167_v24, %v2169_v25  ;;  %v1327_v32 = vpack.c.bf16 %v1323_v20, %v1323_v20  ;;  %v1329_v33 = vpack.c.bf16 %v1325_v21, %v1325_v21  ;;  %v4680_v14 = vld [vmem:[%s4898_s10 + $0x30] sm:$0xff]  ;;  %v4697_v57 = vld [vmem:[%s4898_s10 + $0x78] sm:$0xff] }
 0x8c6   : > { %1843 = vmatprep.mubr.bf16.mxu0 %v1552_v34  ;;  %1883 = vmatprep.mubr.bf16.mxu1 %v1554_v1  ;;  %v3366_v34 = vcombine.high %v2168_v27, %v2170_v28  ;;  %v3363_v1 = vcombine.low %v2167_v24, %v2169_v25 }
 0x8c7   : > { %1844 = vmatmul.mubr.bf16.vlgmr.msra.gmra.mrb[28].mxu0 %v1551_v37  ;;  %1884 = vmatmul.mubr.bf16.vlgmr.msra.gmra.mrb[28].mxu1 %v1553_v38  ;;  %v3835_v37 = vld [vmem:[%s4900_s12 + $0x2c0] sm:$0xff]  }
 0x8c8   : > { %3515 = vmatpush3.bf16.msra.mxu0 %v3804_v35  ;;  %3537 = vmatpush3.bf16.msra.mxu1 %v3805_v36  ;;  %v3365_v35 = vcombine.low %v2168_v27, %v2170_v28  ;;  %v3834_v36 = vld [vmem:[%s4900_s12 + $0x240] sm:$0xff]  }
 0x8c9   : > { %2115 = vmatprep.mubr.bf16.mxu0 %v1328_v41  ;;  %2155 = vmatprep.mubr.bf16.mxu1 %v1330_v42  ;;  %v3836_v38 = vld [vmem:[%s4900_s12 + $0x200] sm:$0xff]   ;;  %v3839_v41 = vld [vmem:[%s4900_s12 + $0x2c8] sm:$0xff]  }
 0x8ca   : > { %3516 = vmatprep.subr.bf16.mxu0 %v3806_v39  ;;  %3538 = vmatprep.subr.bf16.mxu1 %v3807_v40  ;;  %v3837_v39 = vld [vmem:[%s4900_s12 + $0x280] sm:$0xff]   ;;  %v3838_v40 = vld [vmem:[%s4900_s12 + $0x248] sm:$0xff]  }
 0x8cb   : > { %v3840_v42 = vld [vmem:[%s4900_s12 + $0x208] sm:$0xff]  }
 0x8cc   : > { %3517 = vmatpush3.bf16.msra.mxu0 %v3808_v43  ;;  %3539 = vmatpush3.bf16.msra.mxu1 %v3809_v44  ;;  %v3841_v43 = vld [vmem:[%s4900_s12 + $0x288] sm:$0xff]   ;;  %v3842_v44 = vld [vmem:[%s4900_s12 + $0x250] sm:$0xff]  }
 0x8cd   : > { %3518 = vmatprep.subr.bf16.mxu0 %v3810_v47  ;;  %3540 = vmatprep.subr.bf16.mxu1 %v3811_v48  ;;  %v3843_v47 = vld [vmem:[%s4900_s12 + $0x2d0] sm:$0xff]  }
 0x8ce   : > { %v3844_v48 = vld [vmem:[%s4900_s12 + $0x210] sm:$0xff]  }
 0x8d0   : > { %3519 = vmatpush3.bf16.msra.mxu0 %v3812_v50  ;;  %3541 = vmatpush3.bf16.msra.mxu1 %v3813_v51  ;;  %v3845_v50 = vld [vmem:[%s4900_s12 + $0x290] sm:$0xff]   ;;  %v3846_v51 = vld [vmem:[%s4900_s12 + $0x258] sm:$0xff]  }
 0x8d1   : > { %3520 = vmatprep.subr.bf16.mxu0 %v3814_v52  ;;  %3542 = vmatprep.subr.bf16.mxu1 %v3815_v53  ;;  %v3847_v52 = vld [vmem:[%s4900_s12 + $0x2d8] sm:$0xff]  }
 0x8d2   : > { %v3848_v53 = vld [vmem:[%s4900_s12 + $0x218] sm:$0xff]  }
 0x8d4   : > { %3521 = vmatpush3.bf16.msra.mxu0 %v3816_v54  ;;  %3543 = vmatpush3.bf16.msra.mxu1 %v3817_v55  ;;  %v3849_v54 = vld [vmem:[%s4900_s12 + $0x298] sm:$0xff]   ;;  %v3850_v55 = vld [vmem:[%s4900_s12 + $0x260] sm:$0xff]  }
 0x8d5   : > { %3522 = vmatprep.subr.bf16.mxu0 %v3818_v56  ;;  %3544 = vmatprep.subr.bf16.mxu1 %v3819_v60  ;;  %v3851_v56 = vld [vmem:[%s4900_s12 + $0x2e0] sm:$0xff]  }
 0x8d6   : > { %v3852_v60 = vld [vmem:[%s4900_s12 + $0x220] sm:$0xff]  }
 0x8d8   : > { %3523 = vmatpush3.bf16.msra.mxu0 %v3820_v62  ;;  %3545 = vmatpush3.bf16.msra.mxu1 %v3821_v2  ;;  %v3853_v62 = vld [vmem:[%s4900_s12 + $0x2a0] sm:$0xff]   ;;  %v3854_v2 = vld [vmem:[%s4900_s12 + $0x268] sm:$0xff]  }
 0x8d9   : > { %3524 = vmatprep.subr.bf16.mxu0 %v3822_v3  ;;  %3546 = vmatprep.subr.bf16.mxu1 %v3823_v4  ;;  %v3855_v3 = vld [vmem:[%s4900_s12 + $0x2e8] sm:$0xff]  }
 0x8da   : > { %v3856_v4 = vld [vmem:[%s4900_s12 + $0x228] sm:$0xff]  }
 0x8dc   : > { %3525 = vmatpush3.bf16.msra.mxu0 %v3824_v6  ;;  %3547 = vmatpush3.bf16.msra.mxu1 %v3825_v7  ;;  %v3857_v6 = vld [vmem:[%s4900_s12 + $0x2a8] sm:$0xff]   ;;  %v3858_v7 = vld [vmem:[%s4900_s12 + $0x270] sm:$0xff]  }
 0x8dd   : > { %3526 = vmatprep.subr.bf16.mxu0 %v3826_v10  ;;  %3548 = vmatprep.subr.bf16.mxu1 %v3827_v11  ;;  %v3861_v10 = vld [vmem:[%s4900_s12 + $0x2b0] sm:$0xff]   ;;  %v3862_v11 = vld [vmem:[%s4900_s12 + $0x278] sm:$0xff]  }
 0x8e0   : > { %3527 = vmatpush3.bf16.msra.mxu0 %v3828_v12  ;;  %3549 = vmatpush3.bf16.msra.mxu1 %v3829_v63  ;;  %v3863_v12 = vld [vmem:[%s4900_s12 + $0x2f8] sm:$0xff]  }
 0x8e1   : > { %3528 = vmatprep.subr.bf16.mxu0 %v3830_v15  ;;  %3550 = vmatprep.subr.bf16.mxu1 %v3831_v45  ;;  %v3864_v63 = vld [vmem:[%s4900_s12 + $0x238] sm:$0xff]   ;;  %v4685_v15 = vld [vmem:[%s4898_s10 + $0x70] sm:$0xff] }
 0x8e2   : > { %v4690_v45 = vld [vmem:[%s4898_s10 + $0x38] sm:$0xff]  ;;  %v3402_v17 = vcombine.high %v4680_v14, %v4685_v15  ;;  %v3401_v58 = vcombine.low %v4680_v14, %v4685_v15 }
 0x8e3   : > { %v3403_v18 = vcombine.low %v4690_v45, %v4697_v57 }
 0x8e4   : > { %3529 = vmatpush3.bf16.msra.mxu0 %v3832_v0  ;;  %3551 = vmatpush3.bf16.msra.mxu1 %v3833_v19  ;;  %v3404_v0 = vcombine.high %v4690_v45, %v4697_v57 }
 0x8e5   : > { %2233 = vmatprep.subr.bf16.mxu0 %v3360_v22  ;;  %2274 = vmatprep.subr.bf16.mxu1 %v3362_v23 }
 0x8e7   : > { %2116 = vmatmul.mubr.bf16.vlgmr.msra.gmra.mrb[32].mxu0 %v1327_v32  ;;  %2156 = vmatmul.mubr.bf16.vlgmr.msra.gmra.mrb[32].mxu1 %v1329_v33 }
 0x8e8   : > { %2234 = vmatpush1.bf16.msra.mxu0 %v3359_v29  ;;  %2275 = vmatpush1.bf16.msra.mxu1 %v3361_v30 }
 0x8e9   : > { %2235 = vmatprep.subr.bf16.mxu0 %v3364_v31  ;;  %2276 = vmatprep.subr.bf16.mxu1 %v3366_v34 }
 0x8ea   : > { %2265 = vmatprep.mubr.bf16.mxu0 %v4002_v49  ;;  %2306 = vmatprep.mubr.bf16.mxu1 %v4002_v49 }
 0x8ec   : > { %2236 = vmatpush1.bf16.msra.mxu0 %v3363_v1  ;;  %2277 = vmatpush1.bf16.msra.mxu1 %v3365_v35 }
 0x8ed   : > { %3558 = vmatprep.subr.bf16.mxu0 %v3834_v36  ;;  %3580 = vmatprep.subr.bf16.mxu1 %v3835_v37 }
 0x8ef   : > { %3367 = vmatmul.mubr.msk.bf16.vlgmr.msra.gmra.mrb[36].mxu0 %vm480_vm0, %v4312_v16  ;;  %3368 = vmatmul.mubr.msk.bf16.vlgmr.msra.gmra.mrb[36].mxu1 %vm480_vm0, %v4312_v16 }
 0x8f0   : > { %3559 = vmatpush3.bf16.msra.mxu0 %v3836_v38  ;;  %3581 = vmatpush3.bf16.msra.mxu1 %v3837_v39  ;;  %v2171_v38 = vld [vmem:[%s4899_s11 + $0x8] sm:$0xf] }
 0x8f1   : > { %3560 = vmatprep.subr.bf16.mxu0 %v3838_v40  ;;  %3582 = vmatprep.subr.bf16.mxu1 %v3839_v41 }
 0x8f4   : > { %3561 = vmatpush3.bf16.msra.mxu0 %v3840_v42  ;;  %3583 = vmatpush3.bf16.msra.mxu1 %v3841_v43  ;;  %v2176_v42 = vrot.slane %v2171_v38, %v4204_v46  ;;  %v2184_v43 = vrot.slane %v2171_v38, %v4445_v5 }
 0x8f5   : > { %3562 = vmatprep.subr.bf16.mxu0 %v3842_v44  ;;  %3584 = vmatprep.subr.bf16.mxu1 %v3843_v47  ;;  %v2180_v47 = vrot.slane %v2171_v38, %v4431_v59 }
 0x8f8   : > { %3563 = vmatpush3.bf16.msra.mxu0 %v3844_v48  ;;  %3585 = vmatpush3.bf16.msra.mxu1 %v3845_v50  ;;  %v2188_v48 = vrot.slane %v2171_v38, %v4434_v61  ;;  %v3888_v38 = vld [vmem:[%s4900_s12 + $0x328] sm:$0xff]  }
 0x8f9   : > { %3564 = vmatprep.subr.bf16.mxu0 %v3846_v51  ;;  %3586 = vmatprep.subr.bf16.mxu1 %v3847_v52 }
 0x8fc   : > { %3565 = vmatpush3.bf16.msra.mxu0 %v3848_v53  ;;  %3587 = vmatpush3.bf16.msra.mxu1 %v3849_v54 }
 0x8fd   : > { %3566 = vmatprep.subr.bf16.mxu0 %v3850_v55  ;;  %3588 = vmatprep.subr.bf16.mxu1 %v3851_v56 }
 0x900   : > { %3567 = vmatpush3.bf16.msra.mxu0 %v3852_v60  ;;  %3589 = vmatpush3.bf16.msra.mxu1 %v3853_v62 }
 0x901   : > { %3568 = vmatprep.subr.bf16.mxu0 %v3854_v2  ;;  %3590 = vmatprep.subr.bf16.mxu1 %v3855_v3 }
 0x904   : > { %3569 = vmatpush3.bf16.msra.mxu0 %v3856_v4  ;;  %3591 = vmatpush3.bf16.msra.mxu1 %v3857_v6 }
 0x905   : > { %3570 = vmatprep.subr.bf16.mxu0 %v3858_v7  ;;  %3592 = vmatprep.subr.bf16.mxu1 %v3859_v8  ;;  %v2664_v8 = vld [vmem:[%s4898_s10 + $0xb0] sm:$0xff] }
 0x908   : > { %3571 = vmatpush3.bf16.msra.mxu0 %v3860_v9  ;;  %3593 = vmatpush3.bf16.msra.mxu1 %v3861_v10 }
 0x909   : > { %3572 = vmatprep.subr.bf16.mxu0 %v3862_v11  ;;  %3594 = vmatprep.subr.bf16.mxu1 %v3863_v12  ;;  %v2666_v11 = vld [vmem:[%s4898_s10 + $0xf0] sm:$0xff]  ;;  %v2665_v12 = vld [vmem:[%s4898_s10 + $0xb8] sm:$0xff] }
 0x90c   : > { %3573 = vmatpush3.bf16.msra.mxu0 %v3864_v63  ;;  %3595 = vmatpush3.bf16.msra.mxu1 %v3865_v13  ;;  %v2667_v63 = vld [vmem:[%s4898_s10 + $0xf8] sm:$0xff] }
 0x90d   : > { %2730 = vmatprep.subr.bf16.mxu0 %v3402_v17  ;;  %2771 = vmatprep.subr.bf16.mxu1 %v3404_v0  ;;  %v3406_v17 = vcombine.high %v2664_v8, %v2666_v11  ;;  %v3408_v57 = vcombine.high %v2665_v12, %v2667_v63  ;;  %v3405_v0 = vcombine.low %v2664_v8, %v2666_v11 }
 0x99a   : > { %v3486_v19 = vpop.f32.mrb[28].mxu0  ;;  %v3508_v20 = vpop.f32.mrb[28].mxu1 }
 0x99b   : > { %v3487_v21 = vpop.f32.mrb[29].mxu0  ;;  %v3509_v22 = vpop.f32.mrb[29].mxu1 }
 0x99c   : > { %v3488_v23 = vadd.f32 %v3487_v21, %v3486_v19  ;;  %v3510_v24 = vadd.f32 %v3509_v22, %v3508_v20  ;;  %v3489_v25 = vpop.f32.mrb[30].mxu0  ;;  %v3511_v27 = vpop.f32.mrb[30].mxu1  ;;  %v3407_v19 = vcombine.low %v2665_v12, %v2667_v63  ;;  %v3866_v20 = vld [vmem:[%s4900_s12 + $0x340] sm:$0xff]   ;;  %v3870_v22 = vld [vmem:[%s4900_s12 + $0x348] sm:$0xff]  }
 0x99d   : > { %v3490_v28 = vpop.f32.mrb[31].mxu0  ;;  %v3512_v29 = vpop.f32.mrb[31].mxu1  ;;  %v3867_v21 = vld [vmem:[%s4900_s12 + $0x3c0] sm:$0xff]   ;;  %v3874_v25 = vld [vmem:[%s4900_s12 + $0x350] sm:$0xff]  }
 0x99e   : > { %v1886_v30 = vadd.f32 %v3510_v24, %v3488_v23  ;;  %v3872_v23 = vld [vmem:[%s4900_s12 + $0x308] sm:$0xff]   ;;  %v3876_v27 = vld [vmem:[%s4900_s12 + $0x310] sm:$0xff]   ;;  %v3878_v29 = vld [vmem:[%s4900_s12 + $0x358] sm:$0xff]  }
 0x99f   : > { %v3873_v24 = vld [vmem:[%s4900_s12 + $0x388] sm:$0xff]   ;;  %v3877_v28 = vld [vmem:[%s4900_s12 + $0x390] sm:$0xff]  }
 0x9ba   : > { %v3530_v31 = vpop.f32.mrb[32].mxu0  ;;  %v3552_v32 = vpop.f32.mrb[32].mxu1 }
 0x9bb   : > { %v3531_v33 = vpop.f32.mrb[33].mxu0  ;;  %v3553_v34 = vpop.f32.mrb[33].mxu1 }
 0x9bc   : > { %v3532_v1 = vadd.f32 %v3531_v33, %v3530_v31  ;;  %v3554_v35 = vadd.f32 %v3553_v34, %v3552_v32  ;;  %v3533_v36 = vpop.f32.mrb[34].mxu0  ;;  %v3555_v37 = vpop.f32.mrb[34].mxu1  ;;  %v3880_v31 = vld [vmem:[%s4900_s12 + $0x318] sm:$0xff]   ;;  %v3882_v33 = vld [vmem:[%s4900_s12 + $0x360] sm:$0xff]  }
 0x9bd   : > { %v3534_v39 = vpop.f32.mrb[35].mxu0  ;;  %v3556_v40 = vpop.f32.mrb[35].mxu1  ;;  %v3881_v32 = vld [vmem:[%s4900_s12 + $0x398] sm:$0xff]   ;;  %v3883_v34 = vld [vmem:[%s4900_s12 + $0x3e0] sm:$0xff]   ;;  %v3886_v36 = vld [vmem:[%s4900_s12 + $0x368] sm:$0xff]  }
 0x9be   : > { %v2118_v41 = vadd.f32 %v3532_v1, %v1886_v30  ;;  %v3879_v30 = vld [vmem:[%s4900_s12 + $0x3d8] sm:$0xff]   ;;  %v3884_v1 = vld [vmem:[%s4900_s12 + $0x320] sm:$0xff]   ;;  %v3887_v37 = vld [vmem:[%s4900_s12 + $0x3e8] sm:$0xff]  }
 0x9bf   : > { %v3889_v39 = vld [vmem:[%s4900_s12 + $0x3a8] sm:$0xff]   ;;  %v3890_v40 = vld [vmem:[%s4900_s12 + $0x370] sm:$0xff]  }
 0x9c0   : > { %v4710_v44 = vadd.f32 %v3554_v35, %v2118_v41  ;;  %v3885_v35 = vld [vmem:[%s4900_s12 + $0x3a0] sm:$0xff]   ;;  %v3891_v41 = vld [vmem:[%s4900_s12 + $0x3f0] sm:$0xff]  }
 0x9c2   : > { %v2267_v50 = vpop.f32.mrb[36].mxu0  ;;  %v2308_v51 = vpop.f32.mrb[36].mxu1 }
 0x9c3   : > { %v2268_v52 = vadd.f32 %v2267_v50, %v2176_v42  ;;  %v2309_v53 = vadd.f32 %v2308_v51, %v2184_v43  ;;  %v2269_v54 = vpop.f32.mrb[37].mxu0  ;;  %v2310_v55 = vpop.f32.mrb[37].mxu1  ;;  %v3892_v42 = vld [vmem:[%s4900_s12 + $0x330] sm:$0xff]   ;;  %v3896_v50 = vld [vmem:[%s4900_s12 + $0x338] sm:$0xff]  }
 0x9c4   : > { %v2270_v56 = vadd.f32 %v2269_v54, %v2180_v47  ;;  %v2311_v60 = vadd.f32 %v2310_v55, %v2188_v48  ;;  %v2271_v62 = vpop.f32.mrb[38].mxu0  ;;  %v2312_v2 = vpop.f32.mrb[38].mxu1  ;;  %v3893_v43 = vld [vmem:[%s4900_s12 + $0x3b0] sm:$0xff]   ;;  %v3894_v47 = vld [vmem:[%s4900_s12 + $0x378] sm:$0xff]  }
 0x9c5   : > { %v2315_v3 = vmax.f32 %v2268_v52, 0.0  ;;  %v2317_v4 = vmax.f32 %v2309_v53, 0.0  ;;  %v2272_v6 = vpop.f32.mrb[39].mxu0  ;;  %v2313_v7 = vpop.f32.mrb[39].mxu1  ;;  %v3895_v48 = vld [vmem:[%s4900_s12 + $0x3f8] sm:$0xff]  }
 0x9c6   : > { %v2316_v9 = vmax.f32 %v2270_v56, 0.0  ;;  %v2318_v10 = vmax.f32 %v2311_v60, 0.0  ;;  %v3897_v51 = vld [vmem:[%s4900_s12 + $0x3b8] sm:$0xff]  }
 0x9c7   : > { %v2319_v15 = vpack.c.bf16 %v2315_v3, %v2315_v3  ;;  %v2321_v45 = vpack.c.bf16 %v2317_v4, %v2317_v4  ;;  %v2668_v3 = vld [vmem:[%s4899_s11 + $0xc] sm:$0xf] }
 0x9c8   : > { %v2320_v13 = vpack.c.bf16 %v2316_v9, %v2316_v9  ;;  %v2322_v14 = vpack.c.bf16 %v2318_v10, %v2318_v10  ;;  %v2673_v8 = vrot.slane %v2668_v3, %v4204_v46  ;;  %v2681_v9 = vrot.slane %v2668_v3, %v4445_v5 }
 0x9c9   : > { %v2677_v11 = vrot.slane %v2668_v3, %v4431_v59  ;;  %v2685_v12 = vrot.slane %v2668_v3, %v4434_v61 }
 0x9ca   : > { %2611 = vmatprep.mubr.bf16.mxu0 %v2320_v13  ;;  %2651 = vmatprep.mubr.bf16.mxu1 %v2322_v14 }
 0x9cb   : > { %2612 = vmatmul.mubr.bf16.vlgmr.msra.gmra.mrb[40].mxu0 %v2319_v15  ;;  %2652 = vmatmul.mubr.bf16.vlgmr.msra.gmra.mrb[40].mxu1 %v2321_v45 }
 0x9cc   : > { %2731 = vmatpush1.bf16.msra.mxu0 %v3401_v58  ;;  %2772 = vmatpush1.bf16.msra.mxu1 %v3403_v18  ;;  %v3868_v58 = vld [vmem:[%s4900_s12 + $0x300] sm:$0xff]  }
 0x9cd   : > { %2732 = vmatprep.subr.bf16.mxu0 %v3406_v17  ;;  %2773 = vmatprep.subr.bf16.mxu1 %v3408_v57  ;;  %v3869_v18 = vld [vmem:[%s4900_s12 + $0x380] sm:$0xff]  }
 0x9ce   : > { %2762 = vmatprep.mubr.bf16.mxu0 %v4002_v49  ;;  %2803 = vmatprep.mubr.bf16.mxu1 %v4002_v49  ;;  %v3871_v49 = vld [vmem:[%s4900_s12 + $0x3c8] sm:$0xff]  }
 0x9d0   : > { %2733 = vmatpush1.bf16.msra.mxu0 %v3405_v0  ;;  %2774 = vmatpush1.bf16.msra.mxu1 %v3407_v19 }
 0x9d1   : > { %3602 = vmatprep.subr.bf16.mxu0 %v3866_v20  ;;  %3624 = vmatprep.subr.bf16.mxu1 %v3867_v21 }
 0x9d3   : > { %3409 = vmatmul.mubr.msk.bf16.vlgmr.msra.gmra.mrb[44].mxu0 %vm480_vm0, %v4312_v16  ;;  %3410 = vmatmul.mubr.msk.bf16.vlgmr.msra.gmra.mrb[44].mxu1 %vm480_vm0, %v4312_v16  ;;  %v3875_v16 = vld [vmem:[%s4900_s12 + $0x3d0] sm:$0xff]  }
 0x9d4   : > { %3603 = vmatpush3.bf16.msra.mxu0 %v3868_v58  ;;  %3625 = vmatpush3.bf16.msra.mxu1 %v3869_v18 }
 0x9d5   : > { %3604 = vmatprep.subr.bf16.mxu0 %v3870_v22  ;;  %3626 = vmatprep.subr.bf16.mxu1 %v3871_v49 }
 0x9d8   : > { %3605 = vmatpush3.bf16.msra.mxu0 %v3872_v23  ;;  %3627 = vmatpush3.bf16.msra.mxu1 %v3873_v24 }
 0x9d9   : > { %3606 = vmatprep.subr.bf16.mxu0 %v3874_v25  ;;  %3628 = vmatprep.subr.bf16.mxu1 %v3875_v16 }
 0x9dc   : > { %3607 = vmatpush3.bf16.msra.mxu0 %v3876_v27  ;;  %3629 = vmatpush3.bf16.msra.mxu1 %v3877_v28 }
 0x9dd   : > { %3608 = vmatprep.subr.bf16.mxu0 %v3878_v29  ;;  %3630 = vmatprep.subr.bf16.mxu1 %v3879_v30 }
 0x9e0   : > { %3609 = vmatpush3.bf16.msra.mxu0 %v3880_v31  ;;  %3631 = vmatpush3.bf16.msra.mxu1 %v3881_v32 }
 0x9e1   : > { %3610 = vmatprep.subr.bf16.mxu0 %v3882_v33  ;;  %3632 = vmatprep.subr.bf16.mxu1 %v3883_v34 }
 0x9e4   : > { %3611 = vmatpush3.bf16.msra.mxu0 %v3884_v1  ;;  %3633 = vmatpush3.bf16.msra.mxu1 %v3885_v35  ;;  %v3443_v1 = vld [vmem:[%s4901_s13] ss:$0 sm:$0xff] }
 0x9e5   : > { %3612 = vmatprep.subr.bf16.mxu0 %v3886_v36  ;;  %3634 = vmatprep.subr.bf16.mxu1 %v3887_v37 }
 0x9e8   : > { %3613 = vmatpush3.bf16.msra.mxu0 %v3888_v38  ;;  %3635 = vmatpush3.bf16.msra.mxu1 %v3889_v39 }
 0x9e9   : > { %3614 = vmatprep.subr.bf16.mxu0 %v3890_v40  ;;  %3636 = vmatprep.subr.bf16.mxu1 %v3891_v41 }
 0x9ec   : > { %3615 = vmatpush3.bf16.msra.mxu0 %v3892_v42  ;;  %3637 = vmatpush3.bf16.msra.mxu1 %v3893_v43 }
 0x9ed   : > { %3616 = vmatprep.subr.bf16.mxu0 %v3894_v47  ;;  %3638 = vmatprep.subr.bf16.mxu1 %v3895_v48 }
 0x9f0   : > { %3617 = vmatpush3.bf16.msra.mxu0 %v3896_v50  ;;  %3639 = vmatpush3.bf16.msra.mxu1 %v3897_v51 }
 0xa9e   : > { %v3574_v52 = vpop.f32.mrb[40].mxu0  ;;  %v3596_v53 = vpop.f32.mrb[40].mxu1 }
 0xa9f   : > { %v3575_v54 = vpop.f32.mrb[41].mxu0  ;;  %v3597_v55 = vpop.f32.mrb[41].mxu1 }
 0xaa0   : > { %v3576_v56 = vadd.f32 %v3575_v54, %v3574_v52  ;;  %v3598_v60 = vadd.f32 %v3597_v55, %v3596_v53  ;;  %v3577_v62 = vpop.f32.mrb[42].mxu0  ;;  %v3599_v2 = vpop.f32.mrb[42].mxu1 }
 0xaa1   : > { %v3578_v4 = vpop.f32.mrb[43].mxu0  ;;  %v3600_v6 = vpop.f32.mrb[43].mxu1 }
 0xaa2   : > { %v2654_v7 = vadd.f32 %v3598_v60, %v3576_v56 }
 0xaa4   : > { %v2659_v10 = vadd.f32 %v2654_v7, %v4710_v44 }
 0xaa6   : > { %v2764_v63 = vpop.f32.mrb[44].mxu0  ;;  %v2805_v13 = vpop.f32.mrb[44].mxu1 }
 0xaa7   : > { %v2765_v14 = vadd.f32 %v2764_v63, %v2673_v8  ;;  %v2806_v15 = vadd.f32 %v2805_v13, %v2681_v9  ;;  %v2766_v45 = vpop.f32.mrb[45].mxu0  ;;  %v2807_v17 = vpop.f32.mrb[45].mxu1 }
 0xaa8   : > { %v2767_v57 = vadd.f32 %v2766_v45, %v2677_v11  ;;  %v2808_v0 = vadd.f32 %v2807_v17, %v2685_v12  ;;  %v2768_v19 = vpop.f32.mrb[46].mxu0  ;;  %v2809_v20 = vpop.f32.mrb[46].mxu1 }
 0xaa9   : > { %v2812_v46 = vmax.f32 %v2765_v14, 0.0  ;;  %v2814_v21 = vmax.f32 %v2806_v15, 0.0  ;;  %v2769_v5 = vpop.f32.mrb[47].mxu0  ;;  %v2810_v58 = vpop.f32.mrb[47].mxu1 }
 0xaaa   : > { %v2813_v44 = vmax.f32 %v2767_v57, 0.0  ;;  %v2815_v18 = vmax.f32 %v2808_v0, 0.0 }
 0xaab   : > { %v2816_v61 = vpack.c.bf16 %v2812_v46, %v2812_v46  ;;  %v2818_v49 = vpack.c.bf16 %v2814_v21, %v2814_v21 }
 0xaac   : > { %v2817_v59 = vpack.c.bf16 %v2813_v44, %v2813_v44  ;;  %v2819_v22 = vpack.c.bf16 %v2815_v18, %v2815_v18 }
 0xaae   : > { %3108 = vmatprep.mubr.bf16.mxu0 %v2817_v59  ;;  %3148 = vmatprep.mubr.bf16.mxu1 %v2819_v22 }
 0xaaf   : > { %3109 = vmatmul.mubr.bf16.vlgmr.msra.gmra.mrb[48].mxu0 %v2816_v61  ;;  %3149 = vmatmul.mubr.bf16.vlgmr.msra.gmra.mrb[48].mxu1 %v2818_v49 }
 0xb82   : > { %v3618_v23 = vpop.f32.mrb[48].mxu0  ;;  %v3640_v24 = vpop.f32.mrb[48].mxu1 }
 0xb83   : > { %v3619_v25 = vpop.f32.mrb[49].mxu0  ;;  %v3641_v16 = vpop.f32.mrb[49].mxu1 }
 0xb84   : > { %v3620_v27 = vadd.f32 %v3619_v25, %v3618_v23  ;;  %v3642_v28 = vadd.f32 %v3641_v16, %v3640_v24  ;;  %v3621_v29 = vpop.f32.mrb[50].mxu0  ;;  %v3643_v30 = vpop.f32.mrb[50].mxu1 }
 0xb85   : > { %v3622_v31 = vpop.f32.mrb[51].mxu0  ;;  %v3644_v32 = vpop.f32.mrb[51].mxu1 }
 0xb86   : > { %v3151_v33 = vadd.f32 %v3642_v28, %v3620_v27 }
 0xb88   : > { %v3156_v34 = vadd.f32 %v3151_v33, %v2659_v10 }
 0xb8a   : > { %v3157_v35 = vadd.f32 %v3156_v34, %v4250_v26 }
 0xb8c   : > { %v3165_v36 = vadd.f32 %v3443_v1, %v3157_v35 }
 0xb8e   : > { %3166 = vst.msk [vmem:[%s469_s2] sm:$0xff] %vm480_vm0, %v3165_v36 }
 0xb8f   : > { %3935 = shalt.err (!%p3932_p3)
}
 0xb90   : > { %s3936_s0 = scalar_lea.hbm %s4845_s21, 128  ;;  %s3940_s2 = scalar_lea.hbm %s4902_s14, 256 }
 0xb91   : > { %p3937_p4 = scmp.ne.s32.totalorder %s4845_s21, %s3936_s0  ;;  %p3941_p9 = scmp.lt.u32.totalorder %s4845_s21, %s4902_s14 }
 0xb92   : > { %p3942_p10 = scmp.lt.u32.totalorder %s3940_s2, %s3936_s0  ;;  %p3944_p12 = scmp.lt.u32.totalorder %s3936_s0, %s4845_s21 }
 0xb93   : > { %p3938_p7 = pnand %p3937_p4, %p4117_p5 }
 0xb94   : > { %p3943_p11 = por %p3942_p10, %p3941_p9 }
 0xb95   : > { %p3939_p8 = pneg %p3938_p7 }
 0xb96   : > { %p3945_p13 = por %p3944_p12, %p3943_p11 }
 0xb98   : > { %p3946_p0 = pnand %p3945_p13, %p3939_p8 }
 0xb9a   : > { %3949 = shalt.err (!%p3946_p0)
}
 0xb9b   : > { %3710 = dma.vmem_to_hbm [thread:$0]  (%p4117_p5), %s4847_s18, 128, %s4845_s21, %s3168_s26  }
 0xb9c PF: > { %p3716_p1 = scmp.ge.s32.totalorder %s3984_s16, 2  ;;  %s3193_s27 = sand.u32 1, %s3972_s29  }
 0xb9d   : > { %s3194_s17 = scalar_lea.sflag [#allocation4], %s3193_s27 }
 0xb9e   : > { %p3713_p2 = pnand %p3716_p1, %p4121_p6 }
 0xba0   : > { %3967 = dma.done.wait (!%p3713_p2), %s3194_s17, 128  }
 0xba1   : > { %3969 = vsyncadd (!%p3713_p2), %s3194_s17, 4294967168  ;;  %p24_p3 = scmp.ge.s32.totalorder %s4104_s19, 4   ;;  %s4915_s29 = smov %s3976_s30 }
 0xba2   : > { %s4916_s30 = smov %s3980_s15  ;;  %s4917_s15 = smov %s4115_s22 }
 0xba3   : > { %s4918_s16 = smov %s4104_s19  ;;  %26 = sbr.rel (!%p24_p3) target bundleno = 9 (0x9), region = 114 }
 0xbaa   :  { %3199 = vsyncpa [#allocation4], 1 }
 0xbab   :  { %3201 = vsyncpa [#allocation4 + $0x1], 1 }

// kernel: tpu_custom_call.1
= control target key start
LH: loop header
LB: loop body
LE: loop exit
PB: predicated region body
PF: predicated region fallthrough
CT: control target
= control target key end

     0   :  { %s4888_s0 = inlined_call_operand.vmem [shape: f32[2,8,32], index: 0, kind: input, shape index: {}]   ;;  %s4889_s1 = inlined_call_operand.vmem [shape: f32[2,1,8], index: 1, kind: input, shape index: {}]   ;;  %s4890_s2 = inlined_call_operand.vmem [shape: f32[1,32], index: 2, kind: input, shape index: {}]   ;;  %s4891_s3 = inlined_call_operand.vmem [shape: f32[1,32], index: 3, kind: input, shape index: {}]   ;;  %s4892_s4 = inlined_call_operand.vmem [shape: bf16[32,96], index: 4, kind: input, shape index: {}]   ;;  %s4893_s5 = inlined_call_operand.vmem [shape: f32[1,96], index: 5, kind: input, shape index: {}]   ;;  %s4894_s6 = inlined_call_operand.vmem [shape: bf16[32,32], index: 6, kind: input, shape index: {}]   ;;  %s4895_s7 = inlined_call_operand.vmem [shape: f32[1,32], index: 7, kind: input, shape index: {}]   ;;  %s4896_s8 = inlined_call_operand.vmem [shape: f32[1,32], index: 8, kind: input, shape index: {}]   ;;  %s4897_s9 = inlined_call_operand.vmem [shape: f32[1,32], index: 9, kind: input, shape index: {}]   ;;  %s4898_s10 = inlined_call_operand.vmem [shape: bf16[32,2048], index: 10, kind: input, shape index: {}]   ;;  %s4899_s11 = inlined_call_operand.vmem [shape: f32[1,2048], index: 11, kind: input, shape index: {}]   ;;  %s4900_s12 = inlined_call_operand.vmem [shape: bf16[2048,32], index: 12, kind: input, shape index: {}]   ;;  %s4901_s13 = inlined_call_operand.vmem [shape: f32[1,32], index: 13, kind: input, shape index: {}]   ;;  %s4902_s14 = inlined_call_operand.hbm [shape: f32[2,8,32], index: 14, kind: output, shape index: {}]  }
   0x1   :  { %4903 = sst [smem:[#allocation6_spill]] %s4888_s0 }
   0x2   :  { %4904 = sst [smem:[#allocation7_spill]] %s4889_s1 }
   0x3   :  { %4905 = sst [smem:[#allocation8_spill]] %s4890_s2 }
   0x4   :  { %4906 = sst [smem:[#allocation9_spill]] %s4891_s3 }
   0x5   :  { %4907 = sst [smem:[#allocation10_spill]] %s4892_s4 }
   0x6   :  { %19 = vsyncpa [#allocation4], 0 }
   0x7   :  { %21 = vsyncpa [#allocation4 + $0x1], 0  ;;  %s4079_s29 = smov 0   ;;  %s4081_s30 = smov 0  }
   0x8   :  { %s4083_s15 = smov 0   ;;  %s4085_s16 = smov 0  }
   0x9 LB: > { %s4100_s17 = sadd.s32 4294967295, %s3984_s16   ;;  %s3249_s18 = sadd.s32 4294967294, %s3984_s16   ;;  %s3984_s16 = sphi %s4085_s16, %s4918_s16   ;;  %s3980_s15 = sphi %s4083_s15, %s4917_s15   ;;  %s3976_s30 = sphi %s4081_s30, %s4916_s30   ;;  %s3972_s29 = sphi %s4079_s29, %s4915_s29  }
   0xa   : > { %s4104_s19 = sadd.s32 1, %s3984_s16   ;;  %s338_s20 = sadd.s32 1, %s3980_s15 }
   0xb   : > { %s335_s21 = ssub.s32 %s3984_s16, %s4104_s19  ;;  %p348_p0 = scmp.ne.s32.totalorder %s3980_s15, %s3976_s30 }
   0xc   : > { %p336_p1 = scmp.eq.s32.totalorder %s335_s21, 0  ;;  %p349_p2 = scmp.eq.s32.totalorder %s4100_s17, 1 }
   0xd   : > { %p354_p3 = scmp.ne.s32.totalorder %s3976_s30, %s3972_s29  ;;  %p355_p4 = scmp.eq.s32.totalorder %s3249_s18, 1 }
   0xe   : > { %s4115_s22 = scalar_select %p336_p1, %s3980_s15, %s338_s20  }
   0xf   : > { %p4117_p5 = por %p349_p2, %p348_p0  ;;  %p4121_p6 = por %p355_p4, %p354_p3 }
  0x10   : > { %p3252_p7 = scmp.ge.s32.totalorder %s3984_s16, 1  ;;  %p422_p8 = scmp.lt.s32.totalorder %s3984_s16, 3 }
  0x12   : > { %p423_p9 = pnand %p3252_p7, %p422_p8 }
  0x13   : > { %p470_p10 = scmp.lt.s32.totalorder (!%p423_p9), %s4100_s17, 1  ;;  %v3986_v0 = vmov (!%p423_p9), 0.0   ;;  %vm480_vm0 = vcmask (!%p423_p9), 261120   ;;  %s4910_s0 = sld [smem:[#allocation6_spill]] (!%p423_p9)  ;;  %vm3987_vm1 = vmmov (!%p423_p9), 0   ;;  %vm591_vm4 = vcmask (!%p423_p9), 64512  }
  0x14   : > { %426 = sbr.rel (%p423_p9) target bundleno = 2972 (0xb9c), region = 76  ;;  %3646 = vmatprep.subr.bf16.mxu0 (!%p423_p9), %v3986_v0  ;;  %3654 = vmatprep.subr.bf16.mxu1 (!%p423_p9), %v3986_v0  ;;  %s4911_s4 = sld [smem:[#allocation10_spill]] (!%p423_p9)  ;;  %v3257_v25 = vld [vmem:[%s4893_s5] ss:$0 sm:$0xff] (!%p423_p9)  ;;  %v640_v43 = vlaneseq (!%p423_p9)  ;;  %vm661_vm6 = vcmask (!%p423_p9), 1043456   ;;  %vm824_vm7 = vcmask (!%p423_p9), 130112  }
  0x15   : > { %3650 = vmatprep.mubr.msk.bf16.mxu0 (!%p423_p9), %vm3987_vm1, %v3986_v0  ;;  %3656 = vmatprep.mubr.msk.bf16.mxu1 (!%p423_p9), %vm3987_vm1, %v3986_v0  ;;  %s4912_s2 = sld [smem:[#allocation8_spill]] (!%p423_p9)  ;;  %s4913_s3 = sld [smem:[#allocation9_spill]] (!%p423_p9)  ;;  %vm942_vm8 = vcmask (!%p423_p9), 195712   ;;  %vm1060_vm9 = vcmask (!%p423_p9), 261312  }
  0x16   : > { %s3988_s28 = smov (!%p423_p9), 120   ;;  %s3990_s20 = smov (!%p423_p9), 88   ;;  %v4201_v45 = vshrl.u32 (!%p423_p9), %v640_v43, 7 }
  0x17   : > { %s3991_s21 = smov (!%p423_p9), 80   ;;  %s3993_s27 = smov (!%p423_p9), 72  }
  0x18   : > { %s4914_s1 = sld [smem:[#allocation7_spill]] (!%p423_p9)  ;;  %v4204_v46 = vsub.s32 (!%p423_p9), 0, %v4201_v45 }
  0x1a   : > { %v3766_v8 = vld [vmem:[%s4911_s4] sm:$0xff] (!%p423_p9)   ;;  %v3767_v9 = vld [vmem:[%s4911_s4 + $0x8] sm:$0xff] (!%p423_p9)  }
  0x1b   : > { %s4131_s25 = scalar_select %p470_p10, %s4100_s17, 1  ;;  %3647 = vmatpush3.bf16.msra.mxu0 %v3766_v8  ;;  %v3255_v18 = vld [vmem:[%s4912_s2] ss:$0 sm:$0xff] }
  0x1c   : > { %3648 = vmatprep.subr.bf16.mxu0 %v3986_v0  ;;  %v3256_v21 = vld [vmem:[%s4913_s3] ss:$0 sm:$0xff] }
  0x1d   : > { %s3254_s26 = sshll.u32 %s4131_s25, 3 }
  0x1e   : > { %s473_s18 = scalar_lea.vmem %s4910_s0, %s3254_s26  ;;  %s3992_s26 = smov 112  }
  0x1f   : > { %v4137_v1 = vld [vmem:[%s473_s18] sm:$0xff]  ;;  %3649 = vmatpush3.bf16.msra.mxu0 %v3767_v9  ;;  %s3989_s18 = smov 96   ;;  %s3994_s0 = smov 104  }
  0x20   : > { %v481_v2 = vsel %vm480_vm0, %v4137_v1, 0.0  ;;  %3660 = vmatprep.subr.bf16.mxu0 %v3986_v0 }
  0x21   : > { %482 = vadd.xlane.f32.xlu0 %v481_v2 }
  0xae   : > { %v483_v3 = vpop.xlane.xlu0 %482 }
  0xaf   : > { %v485_v4 = vmul.f32 0.03125, %v483_v3 }
  0xb1   : > { %v486_v5 = vsub.f32 %v4137_v1, %v485_v4 }
  0xb3   : > { %v487_v6 = vmul.f32 %v486_v5, %v486_v5  ;;  %v508_v19 = vmul.f32 %v3255_v18, %v486_v5 }
  0xb5   : > { %v488_v7 = vsel %vm480_vm0, %v487_v6, 0.0 }
  0xb6   : > { %489 = vadd.xlane.f32.xlu0 %v488_v7 }
 0x143   : > { %v490_v10 = vpop.xlane.xlu0 %489 }
 0x144   : > { %v491_v11 = vmul.f32 0.032258064, %v490_v10 }
 0x146   : > { %3898 = vrsqrt.f32 %v491_v11  ;;  %vm494_vm2 = vcmp.eq.f32.partialorder %v491_v11, inf  ;;  %v497_v14 = vand.u32 2147483648, %v491_v11  ;;  %vm496_vm3 = vcmp.eq.f32.partialorder %v491_v11, 0.0 }
 0x150   : > { %v3899_v12 = vpop.eup %3898 }
 0x151   : > { %v493_v13 = vmul.f32 %v3899_v12, %v491_v11 }
 0x153   : > { %v495_v15 = vsel %vm494_vm2, %v491_v11, %v493_v13 }
 0x154   : > { %v498_v16 = vsel %vm496_vm3, %v497_v14, %v495_v15 }
 0x155   : > { %v499_v17 = vadd.f32 1e-06, %v498_v16 }
 0x157   : > { %3900 = vrcp.f32 %v499_v17 }
 0x161   : > { %v3901_v20 = vpop.eup %3900 }
 0x162   : > { %v509_v22 = vmul.f32 %v3901_v20, %v508_v19 }
 0x164   : > { %v517_v23 = vadd.f32 %v3256_v21, %v509_v22 }
 0x166   : > { %v518_v24 = vpack.c.bf16 %v517_v23, %v517_v23 }
 0x168   : > { %3651 = vmatmul.mubr.msk.bf16.vlgmr.msra.gmra.mrb[0].mxu0 %vm480_vm0, %v518_v24 }
 0x169   : > { %3662 = vmatprep.mubr.msk.bf16.mxu0 %vm3987_vm1, %v3986_v0 }
 0x23b   : > { %v579_v26 = vpop.f32.mrb[0].mxu0 }
 0x23c   : > { %v580_v27 = vadd.f32 %v3257_v25, %v579_v26  ;;  %v3652_v28 = vpop.f32.mrb[1].mxu0 }
 0x23d   : > { %v582_v29 = vpop.f32.mrb[2].mxu0 }
 0x23e   : > { %v4167_v30 = vpack.c.bf16 %v580_v27, %v580_v27  ;;  %v3653_v31 = vpop.f32.mrb[3].mxu0 }
 0x240   : > { %708 = vrot.lane.b32.xlu0 %v4167_v30, %s3988_s28  ;;  %589 = vrot.lane.b32.xlu1 %v4167_v30, %s3989_s18  ;;  %s476_s18 = scalar_lea.vmem %s4914_s1, %s4131_s25  ;;  %s3995_s25 = smov 64  }
 0x241   : > { %v479_v44 = vld [vmem:[%s476_s18] sm:$0x1]  ;;  %s3445_s1 = sshll.u32 %s4100_s17, 7  ;;  %s4003_s17 = smov [#allocation3]  }
 0x242   : > { %vm586_vm5 = vcmp.eq.f32.partialorder %v479_v44, 0.0 }
 0x243   : > { %v587_v47 = vsel %vm586_vm5, -1e+09, %v3986_v0 }
 0x244   : > { %710 = vrot.lane.b32.xlu1 %v4167_v30, %s3990_s20  ;;  %v643_v48 = vrot.slane %v587_v47, %v4204_v46  ;;  %s3996_s20 = smov 56  }
 0x248   : > { %828 = vrot.lane.b32.xlu1 %v4167_v30, %s3991_s21  ;;  %s3997_s21 = smov 48  }
 0x24c   : > { %826 = vrot.lane.b32.xlu1 %v4167_v30, %s3992_s26  ;;  %s3998_s26 = smov 40  }
 0x250   : > { %946 = vrot.lane.b32.xlu1 %v4167_v30, %s3993_s27  ;;  %s3999_s27 = smov 8  }
 0x254   : > { %944 = vrot.lane.b32.xlu1 %v4167_v30, %s3994_s0  ;;  %s467_s0 = sand.u32 1, %s3976_s30  }
 0x255   : > { %s3253_s28 = sshll.u32 %s467_s0, 3 }
 0x256   : > { %s469_s2 = scalar_lea.vmem [#allocation3], %s3253_s28  ;;  %s3926_s28 = sshll.u32 %s4003_s17, 4  ;;  %s3927_s28 = int_to_ptr.vmem [resolvable:$false] %s3926_s28 }
 0x257   : > { %s3181_s18 = sshll.u32 %s469_s2, 4  ;;  %s3928_s3 = scalar_lea.vmem %s3927_s28, 256  ;;  %s4847_s18 = int_to_ptr.vmem [resolvable:$true] %s3181_s18 }
 0x258   : > { %p3929_p0 = scmp.lt.s32.totalorder %s4847_s18, %s3927_s28 }
 0x2b2   : > { %v590_v32 = vpop.permute.xlu1 %589  ;;  %v709_v37 = vpop.permute.xlu0 %708 }
 0x2b3   : > { %v596_v33 = vsel %vm591_vm4, %v590_v32, 0 }
 0x2b4   : > { %3655 = vmatpush3.bf16.xpose.msra.mxu1 %v596_v33 }
 0x2b5   : > { %3666 = vmatprep.subr.bf16.mxu1 %v3986_v0 }
 0x2b6   : > { %v711_v34 = vpop.permute.xlu1 %710 }
 0x2b7   : > { %v716_v35 = vsel %vm591_vm4, %v711_v34, 0 }
 0x2ba   : > { %v829_v36 = vpop.permute.xlu1 %828 }
 0x2bb   : > { %3657 = vmatmul.mubr.msk.bf16.vlgmr.msra.gmra.mrb[0].mxu1 %vm591_vm4, %v4167_v30  ;;  %v834_v39 = vsel %vm591_vm4, %v829_v36, 0 }
 0x2bc   : > { %3667 = vmatpush3.bf16.xpose.msra.mxu1 %v716_v35  ;;  %3668 = vmatprep.mubr.msk.bf16.mxu1 %vm3987_vm1, %v3986_v0 }
 0x2bd   : > { %3678 = vmatprep.subr.bf16.mxu1 %v3986_v0 }
 0x2be   : > { %v827_v38 = vpop.permute.xlu1 %826 }
 0x2c2   : > { %v947_v40 = vpop.permute.xlu1 %946 }
 0x2c3   : > { %3669 = vmatmul.mubr.msk.bf16.vlgmr.msra.gmra.mrb[4].mxu1 %vm591_vm4, %v709_v37  ;;  %v952_v41 = vsel %vm591_vm4, %v947_v40, 0 }
 0x2c4   : > { %3679 = vmatpush3.bf16.xpose.msra.mxu1 %v834_v39  ;;  %3680 = vmatprep.mubr.msk.bf16.mxu1 %vm3987_vm1, %v3986_v0 }
 0x2c5   : > { %3690 = vmatprep.subr.bf16.mxu1 %v3986_v0 }
 0x2c6   : > { %v945_v42 = vpop.permute.xlu1 %944 }
 0x2cb   : > { %3681 = vmatmul.mubr.msk.bf16.vlgmr.msra.gmra.mrb[8].mxu1 %vm591_vm4, %v827_v38 }
 0x2cc   : > { %3691 = vmatpush3.bf16.xpose.msra.mxu1 %v952_v41  ;;  %3692 = vmatprep.mubr.msk.bf16.mxu1 %vm3987_vm1, %v3986_v0 }
 0x2cd   : > { %3702 = vmatprep.subr.bf16.mxu1 %v3986_v0 }
 0x2d3   : > { %3693 = vmatmul.mubr.msk.bf16.vlgmr.msra.gmra.mrb[12].mxu1 %vm591_vm4, %v945_v42 }
 0x2d4   : > { %3706 = vmatprep.mubr.msk.bf16.mxu1 %vm3987_vm1, %v3986_v0 }
 0x38e   : > { %v632_v49 = vpop.f32.mrb[0].mxu1 }
 0x38f   : > { %v638_v50 = vmul.f32 0.35355338, %v632_v49  ;;  %v3658_v51 = vpop.f32.mrb[1].mxu1 }
 0x390   : > { %v635_v52 = vpop.f32.mrb[2].mxu1 }
 0x391   : > { %v3659_v53 = vpop.f32.mrb[3].mxu1  ;;  %v645_v54 = vadd.f32 %v643_v48, %v638_v50 }
 0x393   : > { %v646_v55 = vsel %vm591_vm4, %v645_v54, -inf }
 0x394   : > { %647 = vmax.xlane.f32.xlu1 %v646_v55 }
 0x396   : > { %v752_v56 = vpop.f32.mrb[4].mxu1 }
 0x397   : > { %v758_v57 = vmul.f32 0.35355338, %v752_v56  ;;  %v3670_v58 = vpop.f32.mrb[5].mxu1 }
 0x398   : > { %v755_v59 = vpop.f32.mrb[6].mxu1 }
 0x399   : > { %v3671_v60 = vpop.f32.mrb[7].mxu1  ;;  %v759_v61 = vadd.f32 %v758_v57, %v643_v48 }
 0x39b   : > { %v760_v62 = vsel %vm591_vm4, %v759_v61, -inf }
 0x39c   : > { %761 = vmax.xlane.f32.xlu0 %v760_v62 }
 0x39e   : > { %v870_v63 = vpop.f32.mrb[8].mxu1 }
 0x39f   : > { %v876_v2 = vmul.f32 0.35355338, %v870_v63  ;;  %v3682_v3 = vpop.f32.mrb[9].mxu1 }
 0x3a0   : > { %v873_v4 = vpop.f32.mrb[10].mxu1  ;;  %v3768_v3 = vld [vmem:[%s4894_s6] sm:$0xff]  }
 0x3a1   : > { %v3683_v5 = vpop.f32.mrb[11].mxu1  ;;  %v877_v6 = vadd.f32 %v876_v2, %v643_v48  ;;  %3703 = vmatpush3.bf16.msra.mxu1 %v3768_v3 }
 0x3a2   : > { %3704 = vmatprep.subr.bf16.mxu1 %v3986_v0 }
 0x3a3   : > { %v878_v14 = vsel %vm591_vm4, %v877_v6, -inf }
 0x3a5   : > { %656 = vrot.lane.b32.xlu1 %v4167_v30, %s3995_s25 }
 0x3a6   : > { %v988_v7 = vpop.f32.mrb[12].mxu1 }
 0x3a7   : > { %v994_v8 = vmul.f32 0.35355338, %v988_v7  ;;  %v3694_v9 = vpop.f32.mrb[13].mxu1 }
 0x3a8   : > { %v991_v10 = vpop.f32.mrb[14].mxu1 }
 0x3a9   : > { %v3695_v11 = vpop.f32.mrb[15].mxu1  ;;  %v995_v12 = vadd.f32 %v994_v8, %v643_v48 }
 0x3ab   : > { %v996_v13 = vsel %vm591_vm4, %v995_v12, -inf }
 0x3ac   : > { %997 = vmax.xlane.f32.xlu0 %v996_v13 }
 0x3c2   : > { %770 = vrot.lane.b32.xlu0 %v4167_v30, %s3996_s20  ;;  %s4000_s20 = smov 16  }
 0x3c9   : > { %879 = vmax.xlane.f32.xlu1 %v878_v14 }
 0x3da   : > { %888 = vrot.lane.b32.xlu1 %v4167_v30, %s3997_s21  ;;  %s4001_s21 = smov 24  }
 0x3de   : > { %1006 = vrot.lane.b32.xlu1 %v4167_v30, %s3998_s26  ;;  %s3168_s26 = scalar_lea.sflag [#allocation4], %s467_s0 }
 0x421   : > { %v648_v15 = vpop.xlane.xlu1 %647 }
 0x422   : > { %v649_v16 = vsub.f32 %v645_v54, %v648_v15 }
 0x424   : > { %v650_v17 = vmul.f32 1.442695, %v649_v16 }
 0x425   : > { %v657_v18 = vpop.permute.xlu1 %656 }
 0x426   : > { %3902 = vpow2.f32 %v650_v17  ;;  %v663_v19 = vsel %vm661_vm6, %v657_v18, 0 }
 0x427   : > { %3661 = vmatpush3.bf16.msra.mxu0 %v663_v19 }
 0x428   : > { %3672 = vmatprep.subr.bf16.mxu0 %v3986_v0 }
 0x429   : > { %v762_v20 = vpop.xlane.xlu0 %761 }
 0x42a   : > { %v763_v21 = vsub.f32 %v759_v61, %v762_v20 }
 0x42c   : > { %v764_v22 = vmul.f32 1.442695, %v763_v21  ;;  %v3269_v21 = vld [vmem:[%s4895_s7] ss:$0 sm:$0xff] }
 0x42e   : > { %3904 = vpow2.f32 %v764_v22 }
 0x430   : > { %v3903_v23 = vpop.eup %3902 }
 0x431   : > { %v655_v24 = vpack.c.bf16 %v3903_v23, %v3903_v23  ;;  %v652_v35 = vsel %vm591_vm4, %v3903_v23, 0.0 }
 0x433   : > { %3663 = vmatmul.mubr.msk.bf16.vlgmr.msra.gmra.mrb[4].mxu0 %vm591_vm4, %v655_v24 }
 0x434   : > { %3674 = vmatprep.mubr.msk.bf16.mxu0 %vm3987_vm1, %v3986_v0 }
 0x438   : > { %v3905_v25 = vpop.eup %3904 }
 0x439   : > { %v998_v26 = vpop.xlane.xlu0 %997  ;;  %v766_v27 = vsel %vm591_vm4, %v3905_v25, 0.0  ;;  %v769_v32 = vpack.c.bf16 %v3905_v25, %v3905_v25 }
 0x43a   : > { %v999_v28 = vsub.f32 %v995_v12, %v998_v26  ;;  %767 = vadd.xlane.f32.xlu0 %v766_v27 }
 0x43c   : > { %v1000_v29 = vmul.f32 1.442695, %v999_v28 }
 0x43d   : > { %v771_v30 = vpop.permute.xlu0 %770 }
 0x43e   : > { %3906 = vpow2.f32 %v1000_v29  ;;  %v776_v31 = vsel %vm661_vm6, %v771_v30, 0 }
 0x43f   : > { %3673 = vmatpush3.bf16.msra.mxu0 %v776_v31 }
 0x440   : > { %3684 = vmatprep.subr.bf16.mxu0 %v3986_v0 }
 0x442   : > { %3675 = vmatmul.mubr.msk.bf16.vlgmr.msra.gmra.mrb[8].mxu0 %vm591_vm4, %v769_v32 }
 0x443   : > { %3686 = vmatprep.mubr.msk.bf16.mxu0 %vm3987_vm1, %v3986_v0 }
 0x448   : > { %v3907_v33 = vpop.eup %3906 }
 0x449   : > { %v1002_v34 = vsel %vm591_vm4, %v3907_v33, 0.0  ;;  %v1005_v48 = vpack.c.bf16 %v3907_v33, %v3907_v33 }
 0x44a   : > { %1003 = vadd.xlane.f32.xlu0 %v1002_v34  ;;  %v1168_v34 = vld [vmem:[%s4898_s10] sm:$0xff] }
 0x44e   : > { %653 = vadd.xlane.f32.xlu0 %v652_v35  ;;  %v1169_v35 = vld [vmem:[%s4898_s10 + $0x8] sm:$0xff] }
 0x456   : > { %v880_v36 = vpop.xlane.xlu1 %879 }
 0x457   : > { %v881_v37 = vsub.f32 %v877_v6, %v880_v36  ;;  %v3769_v6 = vld [vmem:[%s4894_s6 + $0x8] sm:$0xff]  }
 0x458   : > { %3705 = vmatpush3.bf16.msra.mxu1 %v3769_v6  ;;  %v3273_v6 = vld [vmem:[%s4896_s8] ss:$0 sm:$0xff] }
 0x459   : > { %v882_v38 = vmul.f32 1.442695, %v881_v37  ;;  %v1171_v37 = vld [vmem:[%s4898_s10 + $0x48] sm:$0xff] }
 0x45a   : > { %v889_v39 = vpop.permute.xlu1 %888 }
 0x45b   : > { %3908 = vpow2.f32 %v882_v38  ;;  %v894_v40 = vsel %vm661_vm6, %v889_v39, 0  ;;  %v3277_v39 = vcombine.low %v1169_v35, %v1171_v37 }
 0x45c   : > { %3685 = vmatpush3.bf16.msra.mxu0 %v894_v40  ;;  %v3278_v40 = vcombine.high %v1169_v35, %v1171_v37  ;;  %v3785_v35 = vld [vmem:[%s4900_s12 + $0x198] sm:$0xff]   ;;  %v3787_v37 = vld [vmem:[%s4900_s12 + $0x1e0] sm:$0xff]  }
 0x45d   : > { %3696 = vmatprep.subr.bf16.mxu0 %v3986_v0 }
 0x45e   : > { %v1007_v42 = vpop.permute.xlu1 %1006  ;;  %1282 = vmatprep.subr.bf16.mxu1 %v3278_v40  ;;  %v3790_v40 = vld [vmem:[%s4900_s12 + $0x168] sm:$0xff]  }
 0x45f   : > { %v1012_v47 = vsel %vm661_vm6, %v1007_v42, 0  ;;  %v1174_v42 = vld [vmem:[%s4898_s10 + $0xc0] sm:$0xff] }
 0x465   : > { %v3909_v41 = vpop.eup %3908 }
 0x466   : > { %v884_v43 = vsel %vm591_vm4, %v3909_v41, 0.0  ;;  %v887_v44 = vpack.c.bf16 %v3909_v41, %v3909_v41  ;;  %v1172_v41 = vld [vmem:[%s4898_s10 + $0x80] sm:$0xff] }
 0x467   : > { %885 = vadd.xlane.f32.xlu1 %v884_v43  ;;  %v1173_v43 = vld [vmem:[%s4898_s10 + $0x88] sm:$0xff] }
 0x468   : > { %3687 = vmatmul.mubr.msk.bf16.vlgmr.msra.gmra.mrb[12].mxu0 %vm591_vm4, %v887_v44  ;;  %v3279_v44 = vcombine.low %v1172_v41, %v1174_v42 }
 0x469   : > { %3697 = vmatpush3.bf16.msra.mxu0 %v1012_v47  ;;  %3698 = vmatprep.mubr.msk.bf16.mxu0 %vm3987_vm1, %v3986_v0  ;;  %v3280_v47 = vcombine.high %v1172_v41, %v1174_v42  ;;  %v3791_v41 = vld [vmem:[%s4900_s12 + $0x1e8] sm:$0xff]  }
 0x46a   : > { %v3792_v42 = vld [vmem:[%s4900_s12 + $0x128] sm:$0xff]  }
 0x470   : > { %3699 = vmatmul.mubr.msk.bf16.vlgmr.msra.gmra.mrb[16].mxu0 %vm591_vm4, %v1005_v48  ;;  %v1175_v48 = vld [vmem:[%s4898_s10 + $0xc8] sm:$0xff] }
 0x4c7   : > { %v768_v49 = vpop.xlane.xlu0 %767 }
 0x4d7   : > { %v1004_v50 = vpop.xlane.xlu0 %1003 }
 0x4db   : > { %v654_v51 = vpop.xlane.xlu0 %653 }
 0x4dc   : > { %3910 = vrcp.f32 %v654_v51  ;;  %v3282_v51 = vcombine.high %v1173_v43, %v1175_v48 }
 0x4dd   : > { %3912 = vrcp.f32 %v768_v49  ;;  %v4002_v49 = vmov 0  }
 0x4de   : > { %1273 = vmatprep.mubr.bf16.mxu0 %v4002_v49 }
 0x4e6   : > { %v3911_v52 = vpop.eup %3910 }
 0x4e7   : > { %v3913_v58 = vpop.eup %3912 }
 0x4f4   : > { %v886_v2 = vpop.xlane.xlu1 %885 }
 0x4f5   : > { %3914 = vrcp.f32 %v886_v2 }
 0x4f6   : > { %3916 = vrcp.f32 %v1004_v50  ;;  %v3281_v50 = vcombine.low %v1173_v43, %v1175_v48  ;;  %v3793_v43 = vld [vmem:[%s4900_s12 + $0x1a8] sm:$0xff]   ;;  %v3796_v48 = vld [vmem:[%s4900_s12 + $0x130] sm:$0xff]  }
 0x4ff   : > { %v3915_v4 = vpop.eup %3914 }
 0x500   : > { %v3917_v11 = vpop.eup %3916 }
 0x506   : > { %v699_v53 = vpop.f32.mrb[4].mxu0 }
 0x507   : > { %v706_v54 = vmul.f32 %v3911_v52, %v699_v53  ;;  %v3664_v55 = vpop.f32.mrb[5].mxu0  ;;  %v1395_v52 = vld [vmem:[%s4898_s10 + $0x10] sm:$0xff] }
 0x508   : > { %v702_v56 = vpop.f32.mrb[6].mxu0  ;;  %v1397_v53 = vld [vmem:[%s4898_s10 + $0x50] sm:$0xff] }
 0x509   : > { %707 = vst.msk [vmem:[#allocation2] sm:$0xff] %vm591_vm4, %v706_v54  ;;  %v3665_v57 = vpop.f32.mrb[7].mxu0  ;;  %v1396_v54 = vld [vmem:[%s4898_s10 + $0x18] sm:$0xff]  ;;  %v3286_v55 = vcombine.high %v1395_v52, %v1397_v53 }
 0x50a   : > { %v1398_v56 = vld [vmem:[%s4898_s10 + $0x58] sm:$0xff]  ;;  %v3285_v57 = vcombine.low %v1395_v52, %v1397_v53 }
 0x50b   : > { %v3799_v52 = vld [vmem:[%s4900_s12 + $0x1f8] sm:$0xff]  }
 0x50c   : > { %v3800_v53 = vld [vmem:[%s4900_s12 + $0x138] sm:$0xff]  }
 0x515   : > { %v812_v59 = vpop.f32.mrb[8].mxu0 }
 0x516   : > { %v819_v60 = vmul.f32 %v3913_v58, %v812_v59  ;;  %v3676_v61 = vpop.f32.mrb[9].mxu0  ;;  %v3287_v58 = vcombine.low %v1396_v54, %v1398_v56  ;;  %v3288_v59 = vcombine.high %v1396_v54, %v1398_v56  ;;  %v3801_v54 = vld [vmem:[%s4900_s12 + $0x1b8] sm:$0xff]   ;;  %v3803_v56 = vld [vmem:[%s4900_s12 + $0xc0] sm:$0xff]  }
 0x517   : > { %v815_v62 = vpop.f32.mrb[10].mxu0 }
 0x518   : > { %821 = vrot.lane.b32.xlu1 %v819_v60, %s3999_s27  ;;  %v3677_v63 = vpop.f32.mrb[11].mxu0  ;;  %s3922_s27 = scalar_lea.vmem %s4847_s18, 128 }
 0x519   : > { %p3923_p11 = scmp.ne.s32.totalorder %s4847_s18, %s3922_s27  ;;  %p3930_p1 = scmp.lt.s32.totalorder %s3928_s3, %s3922_s27 }
 0x51b   : > { %p3924_p12 = pnand %p3923_p11, %p4117_p5  ;;  %p3931_p2 = por %p3930_p1, %p3929_p0 }
 0x51d   : > { %p3925_p13 = pneg %p3924_p12 }
 0x51f   : > { %p3932_p3 = pnand %p3931_p2, %p3925_p13 }
 0x53b   : > { %v930_v5 = vpop.f32.mrb[12].mxu0 }
 0x53c   : > { %v937_v7 = vmul.f32 %v3915_v4, %v930_v5  ;;  %v3688_v8 = vpop.f32.mrb[13].mxu0 }
 0x53d   : > { %v933_v9 = vpop.f32.mrb[14].mxu0 }
 0x53e   : > { %939 = vrot.lane.b32.xlu0 %v937_v7, %s4000_s20  ;;  %v3689_v10 = vpop.f32.mrb[15].mxu0  ;;  %v3274_v9 = vld [vmem:[%s4897_s9] ss:$0 sm:$0xff] }
 0x543   : > { %v1048_v12 = vpop.f32.mrb[16].mxu0 }
 0x544   : > { %v1055_v13 = vmul.f32 %v3917_v11, %v1048_v12  ;;  %v3700_v14 = vpop.f32.mrb[17].mxu0  ;;  %v1399_v11 = vld [vmem:[%s4898_s10 + $0x90] sm:$0xff] }
 0x545   : > { %v1051_v15 = vpop.f32.mrb[18].mxu0  ;;  %v1401_v12 = vld [vmem:[%s4898_s10 + $0xd0] sm:$0xff]  ;;  %v1402_v14 = vld [vmem:[%s4898_s10 + $0xd8] sm:$0xff] }
 0x546   : > { %1057 = vrot.lane.b32.xlu1 %v1055_v13, %s4001_s21  ;;  %v3701_v16 = vpop.f32.mrb[19].mxu0  ;;  %v1400_v13 = vld [vmem:[%s4898_s10 + $0x98] sm:$0xff]  ;;  %s4845_s21 = scalar_lea.hbm %s4902_s14, %s3445_s1 }
 0x58a   : > { %v822_v17 = vpop.permute.xlu1 %821 }
 0x58b   : > { %825 = vst.msk [vmem:[#allocation2] sm:$0xff] %vm824_vm7, %v822_v17  ;;  %v3290_v17 = vcombine.high %v1399_v11, %v1401_v12 }
 0x5b0   : > { %v940_v18 = vpop.permute.xlu0 %939 }
 0x5b1   : > { %943 = vst.msk [vmem:[#allocation2] sm:$0xff] %vm942_vm8, %v940_v18  ;;  %v3292_v18 = vcombine.high %v1400_v13, %v1402_v14 }
 0x5b8   : > { %v1058_v0 = vpop.permute.xlu1 %1057 }
 0x5b9   : > { %1061 = vst.msk [vmem:[#allocation2] sm:$0xff] %vm1060_vm9, %v1058_v0  ;;  %v3289_v0 = vcombine.low %v1399_v11, %v1401_v12 }
 0x5c0   : > { %v1062_v19 = vld [vmem:[#allocation2] sm:$0xff] }
 0x5c1   : > { %v1063_v20 = vpack.c.bf16 %v1062_v19, %v1062_v19  ;;  %v3291_v19 = vcombine.low %v1400_v13, %v1402_v14 }
 0x5c3   : > { %3707 = vmatmul.mubr.msk.bf16.vlgmr.msra.gmra.mrb[16].mxu1 %vm480_vm0, %v1063_v20  ;;  %v3770_v20 = vld [vmem:[%s4900_s12 + $0x140] sm:$0xff]  }
 0x5c4   : > { %1283 = vmatpush1.bf16.msra.mxu1 %v3277_v39  ;;  %1314 = vmatprep.mubr.bf16.mxu1 %v4002_v49  ;;  %v3789_v39 = vld [vmem:[%s4900_s12 + $0x1a0] sm:$0xff]  }
 0x5c5   : > { %1284 = vmatprep.subr.bf16.mxu1 %v3282_v51  ;;  %v3798_v51 = vld [vmem:[%s4900_s12 + $0x178] sm:$0xff]  }
 0x5c8   : > { %1285 = vmatpush1.bf16.msra.mxu1 %v3281_v50  ;;  %v3797_v50 = vld [vmem:[%s4900_s12 + $0x1b0] sm:$0xff]  }
 0x5c9   : > { %1506 = vmatprep.subr.bf16.mxu1 %v3288_v59  ;;  %v4431_v59 = vsub.s32 1, %v4201_v45 }
 0x696   : > { %v1124_v22 = vpop.f32.mrb[16].mxu1 }
 0x697   : > { %v1125_v23 = vadd.f32 %v3269_v21, %v1124_v22  ;;  %v3708_v24 = vpop.f32.mrb[17].mxu1  ;;  %v3771_v21 = vld [vmem:[%s4900_s12 + $0x1c0] sm:$0xff]  }
 0x698   : > { %v1127_v25 = vpop.f32.mrb[18].mxu1  ;;  %v3772_v22 = vld [vmem:[%s4900_s12 + $0x100] sm:$0xff]   ;;  %v3774_v24 = vld [vmem:[%s4900_s12 + $0x148] sm:$0xff]  }
 0x699   : > { %v4250_v26 = vadd.f32 %v1125_v23, %v4137_v1  ;;  %v3709_v27 = vpop.f32.mrb[19].mxu1  ;;  %v1170_v1 = vld [vmem:[%s4898_s10 + $0x40] sm:$0xff]  ;;  %v3775_v25 = vld [vmem:[%s4900_s12 + $0x1c8] sm:$0xff]  }
 0x69a   : > { %v3276_v36 = vcombine.high %v1168_v34, %v1170_v1  ;;  %v3275_v38 = vcombine.low %v1168_v34, %v1170_v1  ;;  %v3773_v23 = vld [vmem:[%s4900_s12 + $0x180] sm:$0xff]   ;;  %v3776_v27 = vld [vmem:[%s4900_s12 + $0x108] sm:$0xff]   ;;  %v3783_v34 = vld [vmem:[%s4900_s12 + $0x1d8] sm:$0xff]  }
 0x69b   : > { %v1131_v28 = vsel %vm480_vm0, %v4250_v26, 0.0  ;;  %v3784_v1 = vld [vmem:[%s4900_s12 + $0x118] sm:$0xff]  }
 0x69c   : > { %1132 = vadd.xlane.f32.xlu1 %v1131_v28  ;;  %1241 = vmatprep.subr.bf16.mxu0 %v3276_v36  ;;  %v3777_v28 = vld [vmem:[%s4900_s12 + $0x188] sm:$0xff]   ;;  %v3786_v36 = vld [vmem:[%s4900_s12 + $0x160] sm:$0xff]  }
 0x69d   : > { %1242 = vmatpush1.bf16.msra.mxu0 %v3275_v38  ;;  %v3788_v38 = vld [vmem:[%s4900_s12 + $0x120] sm:$0xff]  }
 0x69e   : > { %1243 = vmatprep.subr.bf16.mxu0 %v3280_v47  ;;  %v3795_v47 = vld [vmem:[%s4900_s12 + $0x1f0] sm:$0xff]  }
 0x6a1   : > { %1244 = vmatpush1.bf16.msra.mxu0 %v3279_v44  ;;  %v3794_v44 = vld [vmem:[%s4900_s12 + $0x170] sm:$0xff]  }
 0x6a2   : > { %1465 = vmatprep.subr.bf16.mxu0 %v3286_v55  ;;  %v3802_v55 = vld [vmem:[%s4900_s12 + $0x40] sm:$0xff]  }
 0x729   : > { %v1133_v29 = vpop.xlane.xlu1 %1132 }
 0x72a   : > { %v1134_v30 = vmul.f32 0.03125, %v1133_v29  ;;  %v3778_v29 = vld [vmem:[%s4900_s12 + $0x150] sm:$0xff]  }
 0x72c   : > { %v1135_v31 = vsub.f32 %v4250_v26, %v1134_v30  ;;  %v3779_v30 = vld [vmem:[%s4900_s12 + $0x1d0] sm:$0xff]  }
 0x72e   : > { %v1136_v32 = vmul.f32 %v1135_v31, %v1135_v31  ;;  %v1157_v7 = vmul.f32 %v3273_v6, %v1135_v31  ;;  %v3780_v31 = vld [vmem:[%s4900_s12 + $0x110] sm:$0xff]  }
 0x730   : > { %v1137_v33 = vsel %vm480_vm0, %v1136_v32, 0.0  ;;  %v3781_v32 = vld [vmem:[%s4900_s12 + $0x190] sm:$0xff]  }
 0x731   : > { %1138 = vadd.xlane.f32.xlu0 %v1137_v33  ;;  %v3782_v33 = vld [vmem:[%s4900_s12 + $0x158] sm:$0xff]  }
 0x7be   : > { %v1139_v60 = vpop.xlane.xlu0 %1138 }
 0x7bf   : > { %v1140_v61 = vmul.f32 0.032258064, %v1139_v60 }
 0x7c1   : > { %3918 = vrsqrt.f32 %v1140_v61  ;;  %vm1143_vm10 = vcmp.eq.f32.partialorder %v1140_v61, inf  ;;  %v1146_v2 = vand.u32 2147483648, %v1140_v61  ;;  %vm1145_vm11 = vcmp.eq.f32.partialorder %v1140_v61, 0.0 }
 0x7cb   : > { %v3919_v62 = vpop.eup %3918 }
 0x7cc   : > { %v1142_v63 = vmul.f32 %v3919_v62, %v1140_v61 }
 0x7ce   : > { %v1144_v3 = vsel %vm1143_vm10, %v1140_v61, %v1142_v63  ;;  %v4434_v61 = vsub.s32 3, %v4201_v45  ;;  %v4439_v63 = vld [vmem:[%s4899_s11] sm:$0xf] }
 0x7cf   : > { %v1147_v4 = vsel %vm1145_vm11, %v1146_v2, %v1144_v3 }
 0x7d0   : > { %v1148_v5 = vadd.f32 1e-06, %v1147_v4  ;;  %v1403_v4 = vld [vmem:[%s4899_s11 + $0x4] sm:$0xf] }
 0x7d1   : > { %v1412_v12 = vrot.slane %v1403_v4, %v4431_v59  ;;  %v1420_v13 = vrot.slane %v1403_v4, %v4434_v61 }
 0x7d2   : > { %3920 = vrcp.f32 %v1148_v5  ;;  %v4445_v5 = vsub.s32 2, %v4201_v45 }
 0x7d4   : > { %v1416_v11 = vrot.slane %v1403_v4, %v4445_v5 }
 0x7dc   : > { %v3921_v8 = vpop.eup %3920 }
 0x7dd   : > { %v1158_v10 = vmul.f32 %v3921_v8, %v1157_v7  ;;  %v1185_v8 = vrot.slane %v4439_v63, %v4431_v59 }
 0x7df   : > { %v1166_v15 = vadd.f32 %v3274_v9, %v1158_v10  ;;  %v1193_v9 = vrot.slane %v4439_v63, %v4434_v61  ;;  %v1408_v10 = vrot.slane %v1403_v4, %v4204_v46  ;;  %v3823_v4 = vld [vmem:[%s4900_s12 + $0xe8] sm:$0xff]  }
 0x7e1   : > { %v4312_v16 = vpack.c.bf16 %v1166_v15, %v1166_v15 }
 0x7e3   : > { %3283 = vmatmul.mubr.msk.bf16.vlgmr.msra.gmra.mrb[20].mxu0 %vm480_vm0, %v4312_v16  ;;  %3284 = vmatmul.mubr.msk.bf16.vlgmr.msra.gmra.mrb[20].mxu1 %vm480_vm0, %v4312_v16 }
 0x7e4   : > { %1466 = vmatpush1.bf16.msra.mxu0 %v3285_v57  ;;  %1507 = vmatpush1.bf16.msra.mxu1 %v3287_v58 }
 0x7e5   : > { %1467 = vmatprep.subr.bf16.mxu0 %v3290_v17  ;;  %1508 = vmatprep.subr.bf16.mxu1 %v3292_v18 }
 0x7e6   : > { %1497 = vmatprep.mubr.bf16.mxu0 %v4002_v49  ;;  %1538 = vmatprep.mubr.bf16.mxu1 %v4002_v49 }
 0x7e8   : > { %1468 = vmatpush1.bf16.msra.mxu0 %v3289_v0  ;;  %1509 = vmatpush1.bf16.msra.mxu1 %v3291_v19 }
 0x7e9   : > { %3470 = vmatprep.subr.bf16.mxu0 %v3770_v20  ;;  %3492 = vmatprep.subr.bf16.mxu1 %v3771_v21 }
 0x7eb   : > { %3293 = vmatmul.mubr.msk.bf16.vlgmr.msra.gmra.mrb[24].mxu0 %vm480_vm0, %v4312_v16  ;;  %3294 = vmatmul.mubr.msk.bf16.vlgmr.msra.gmra.mrb[24].mxu1 %vm480_vm0, %v4312_v16 }
 0x7ec   : > { %3471 = vmatpush3.bf16.msra.mxu0 %v3772_v22  ;;  %3493 = vmatpush3.bf16.msra.mxu1 %v3773_v23 }
 0x7ed   : > { %3472 = vmatprep.subr.bf16.mxu0 %v3774_v24  ;;  %3494 = vmatprep.subr.bf16.mxu1 %v3775_v25 }
 0x7f0   : > { %3473 = vmatpush3.bf16.msra.mxu0 %v3776_v27  ;;  %3495 = vmatpush3.bf16.msra.mxu1 %v3777_v28 }
 0x7f1   : > { %3474 = vmatprep.subr.bf16.mxu0 %v3778_v29  ;;  %3496 = vmatprep.subr.bf16.mxu1 %v3779_v30 }
 0x7f4   : > { %3475 = vmatpush3.bf16.msra.mxu0 %v3780_v31  ;;  %3497 = vmatpush3.bf16.msra.mxu1 %v3781_v32 }
 0x7f5   : > { %3476 = vmatprep.subr.bf16.mxu0 %v3782_v33  ;;  %3498 = vmatprep.subr.bf16.mxu1 %v3783_v34 }
 0x7f8   : > { %3477 = vmatpush3.bf16.msra.mxu0 %v3784_v1  ;;  %3499 = vmatpush3.bf16.msra.mxu1 %v3785_v35  ;;  %v3804_v35 = vld [vmem:[%s4900_s12] sm:$0xff]  }
 0x7f9   : > { %3478 = vmatprep.subr.bf16.mxu0 %v3786_v36  ;;  %3500 = vmatprep.subr.bf16.mxu1 %v3787_v37  ;;  %v3805_v36 = vld [vmem:[%s4900_s12 + $0x80] sm:$0xff]  }
 0x7fc   : > { %3479 = vmatpush3.bf16.msra.mxu0 %v3788_v38  ;;  %3501 = vmatpush3.bf16.msra.mxu1 %v3789_v39  ;;  %v3806_v39 = vld [vmem:[%s4900_s12 + $0x48] sm:$0xff]  }
 0x7fd   : > { %3480 = vmatprep.subr.bf16.mxu0 %v3790_v40  ;;  %3502 = vmatprep.subr.bf16.mxu1 %v3791_v41  ;;  %v3807_v40 = vld [vmem:[%s4900_s12 + $0xc8] sm:$0xff]  }
 0x800   : > { %3481 = vmatpush3.bf16.msra.mxu0 %v3792_v42  ;;  %3503 = vmatpush3.bf16.msra.mxu1 %v3793_v43  ;;  %v3808_v43 = vld [vmem:[%s4900_s12 + $0x8] sm:$0xff]  }
 0x801   : > { %3482 = vmatprep.subr.bf16.mxu0 %v3794_v44  ;;  %3504 = vmatprep.subr.bf16.mxu1 %v3795_v47  ;;  %v3809_v44 = vld [vmem:[%s4900_s12 + $0x88] sm:$0xff]   ;;  %v3810_v47 = vld [vmem:[%s4900_s12 + $0x50] sm:$0xff]  }
 0x804   : > { %3483 = vmatpush3.bf16.msra.mxu0 %v3796_v48  ;;  %3505 = vmatpush3.bf16.msra.mxu1 %v3797_v50  ;;  %v3811_v48 = vld [vmem:[%s4900_s12 + $0xd0] sm:$0xff]  }
 0x805   : > { %3484 = vmatprep.subr.bf16.mxu0 %v3798_v51  ;;  %3506 = vmatprep.subr.bf16.mxu1 %v3799_v52  ;;  %v3812_v50 = vld [vmem:[%s4900_s12 + $0x10] sm:$0xff]   ;;  %v3814_v52 = vld [vmem:[%s4900_s12 + $0x58] sm:$0xff]  }
 0x806   : > { %v3813_v51 = vld [vmem:[%s4900_s12 + $0x90] sm:$0xff]  }
 0x808   : > { %3485 = vmatpush3.bf16.msra.mxu0 %v3800_v53  ;;  %3507 = vmatpush3.bf16.msra.mxu1 %v3801_v54  ;;  %v3815_v53 = vld [vmem:[%s4900_s12 + $0xd8] sm:$0xff]  }
 0x809   : > { %3514 = vmatprep.subr.bf16.mxu0 %v3802_v55  ;;  %3536 = vmatprep.subr.bf16.mxu1 %v3803_v56  ;;  %v3816_v54 = vld [vmem:[%s4900_s12 + $0x18] sm:$0xff]   ;;  %v3818_v56 = vld [vmem:[%s4900_s12 + $0x60] sm:$0xff]  }
 0x80a   : > { %v3817_v55 = vld [vmem:[%s4900_s12 + $0x98] sm:$0xff]  }
 0x8b6   : > { %v4426_v57 = vpop.f32.mrb[20].mxu0  ;;  %v4428_v58 = vpop.f32.mrb[20].mxu1 }
 0x8b7   : > { %v1277_v60 = vpop.f32.mrb[21].mxu0  ;;  %v1318_v62 = vpop.f32.mrb[21].mxu1 }
 0x8b8   : > { %v1279_v2 = vpop.f32.mrb[22].mxu0  ;;  %v1320_v3 = vpop.f32.mrb[22].mxu1  ;;  %v1278_v45 = vadd.f32 %v1277_v60, %v1185_v8  ;;  %v1319_v17 = vadd.f32 %v1318_v62, %v1193_v9  ;;  %v3819_v60 = vld [vmem:[%s4900_s12 + $0xe0] sm:$0xff]   ;;  %v1181_v8 = vrot.slane %v4439_v63, %v4204_v46  ;;  %v1189_v9 = vrot.slane %v4439_v63, %v4445_v5  ;;  %v3829_v63 = vld [vmem:[%s4900_s12 + $0xb0] sm:$0xff]  }
 0x8b9   : > { %v1280_v6 = vpop.f32.mrb[23].mxu0  ;;  %v1321_v7 = vpop.f32.mrb[23].mxu1  ;;  %v3820_v62 = vld [vmem:[%s4900_s12 + $0x20] sm:$0xff]   ;;  %v3822_v3 = vld [vmem:[%s4900_s12 + $0x68] sm:$0xff]  }
 0x8ba   : > { %v1324_v32 = vmax.f32 %v1278_v45, 0.0  ;;  %v1326_v33 = vmax.f32 %v1319_v17, 0.0  ;;  %v3821_v2 = vld [vmem:[%s4900_s12 + $0xa0] sm:$0xff]   ;;  %v3824_v6 = vld [vmem:[%s4900_s12 + $0x28] sm:$0xff]   ;;  %v3831_v45 = vld [vmem:[%s4900_s12 + $0xf8] sm:$0xff]  }
 0x8bb   : > { %v3825_v7 = vld [vmem:[%s4900_s12 + $0xa8] sm:$0xff]   ;;  %v2163_v17 = vld [vmem:[%s4898_s10 + $0x20] sm:$0xff] }
 0x8bc   : > { %v1328_v41 = vpack.c.bf16 %v1324_v32, %v1324_v32  ;;  %v1330_v42 = vpack.c.bf16 %v1326_v33, %v1326_v33 }
 0x8be   : > { %v1499_v14 = vpop.f32.mrb[24].mxu0  ;;  %v1540_v15 = vpop.f32.mrb[24].mxu1 }
 0x8bf   : > { %v1500_v18 = vadd.f32 %v1499_v14, %v1408_v10  ;;  %v1541_v0 = vadd.f32 %v1540_v15, %v1416_v11  ;;  %v1501_v19 = vpop.f32.mrb[25].mxu0  ;;  %v1542_v20 = vpop.f32.mrb[25].mxu1  ;;  %v3826_v10 = vld [vmem:[%s4900_s12 + $0x70] sm:$0xff]   ;;  %v1317_v14 = vadd.f32 %v4428_v58, %v1189_v9  ;;  %v3830_v15 = vld [vmem:[%s4900_s12 + $0x78] sm:$0xff]   ;;  %v2164_v58 = vld [vmem:[%s4898_s10 + $0x28] sm:$0xff] }
 0x8c0   : > { %v1502_v21 = vadd.f32 %v1501_v19, %v1412_v12  ;;  %v1543_v22 = vadd.f32 %v1542_v20, %v1420_v13  ;;  %v1503_v23 = vpop.f32.mrb[26].mxu0  ;;  %v1544_v24 = vpop.f32.mrb[26].mxu1  ;;  %v3827_v11 = vld [vmem:[%s4900_s12 + $0xf0] sm:$0xff]   ;;  %v1276_v13 = vadd.f32 %v4426_v57, %v1181_v8  ;;  %v2165_v57 = vld [vmem:[%s4898_s10 + $0x60] sm:$0xff]  ;;  %v3833_v19 = vld [vmem:[%s4900_s12 + $0xb8] sm:$0xff]  }
 0x8c1   : > { %v1547_v25 = vmax.f32 %v1500_v18, 0.0  ;;  %v1549_v27 = vmax.f32 %v1541_v0, 0.0  ;;  %v1504_v28 = vpop.f32.mrb[27].mxu0  ;;  %v1545_v29 = vpop.f32.mrb[27].mxu1  ;;  %v3828_v12 = vld [vmem:[%s4900_s12 + $0x30] sm:$0xff]   ;;  %v2166_v18 = vld [vmem:[%s4898_s10 + $0x68] sm:$0xff] }
 0x8c2   : > { %v1548_v30 = vmax.f32 %v1502_v21, 0.0  ;;  %v1550_v31 = vmax.f32 %v1543_v22, 0.0  ;;  %v3832_v0 = vld [vmem:[%s4900_s12 + $0x38] sm:$0xff]   ;;  %v1323_v20 = vmax.f32 %v1276_v13, 0.0  ;;  %v1325_v21 = vmax.f32 %v1317_v14, 0.0  ;;  %v2167_v24 = vld [vmem:[%s4898_s10 + $0xa0] sm:$0xff] }
 0x8c3   : > { %v1551_v37 = vpack.c.bf16 %v1547_v25, %v1547_v25  ;;  %v1553_v38 = vpack.c.bf16 %v1549_v27, %v1549_v27  ;;  %v3360_v22 = vcombine.high %v2163_v17, %v2165_v57  ;;  %v3362_v23 = vcombine.high %v2164_v58, %v2166_v18  ;;  %v2169_v25 = vld [vmem:[%s4898_s10 + $0xe0] sm:$0xff]  ;;  %v2168_v27 = vld [vmem:[%s4898_s10 + $0xa8] sm:$0xff]  ;;  %v3859_v8 = vld [vmem:[%s4900_s12 + $0x2f0] sm:$0xff]  }
 0x8c4   : > { %v1552_v34 = vpack.c.bf16 %v1548_v30, %v1548_v30  ;;  %v1554_v1 = vpack.c.bf16 %v1550_v31, %v1550_v31  ;;  %v2170_v28 = vld [vmem:[%s4898_s10 + $0xe8] sm:$0xff]  ;;  %v3359_v29 = vcombine.low %v2163_v17, %v2165_v57  ;;  %v3361_v30 = vcombine.low %v2164_v58, %v2166_v18  ;;  %v3860_v9 = vld [vmem:[%s4900_s12 + $0x230] sm:$0xff]   ;;  %v3865_v13 = vld [vmem:[%s4900_s12 + $0x2b8] sm:$0xff]  }
 0x8c5   : > { %v3364_v31 = vcombine.high %v2167_v24, %v2169_v25  ;;  %v1327_v32 = vpack.c.bf16 %v1323_v20, %v1323_v20  ;;  %v1329_v33 = vpack.c.bf16 %v1325_v21, %v1325_v21  ;;  %v4680_v14 = vld [vmem:[%s4898_s10 + $0x30] sm:$0xff]  ;;  %v4697_v57 = vld [vmem:[%s4898_s10 + $0x78] sm:$0xff] }
 0x8c6   : > { %1843 = vmatprep.mubr.bf16.mxu0 %v1552_v34  ;;  %1883 = vmatprep.mubr.bf16.mxu1 %v1554_v1  ;;  %v3366_v34 = vcombine.high %v2168_v27, %v2170_v28  ;;  %v3363_v1 = vcombine.low %v2167_v24, %v2169_v25 }
 0x8c7   : > { %1844 = vmatmul.mubr.bf16.vlgmr.msra.gmra.mrb[28].mxu0 %v1551_v37  ;;  %1884 = vmatmul.mubr.bf16.vlgmr.msra.gmra.mrb[28].mxu1 %v1553_v38  ;;  %v3835_v37 = vld [vmem:[%s4900_s12 + $0x2c0] sm:$0xff]  }
 0x8c8   : > { %3515 = vmatpush3.bf16.msra.mxu0 %v3804_v35  ;;  %3537 = vmatpush3.bf16.msra.mxu1 %v3805_v36  ;;  %v3365_v35 = vcombine.low %v2168_v27, %v2170_v28  ;;  %v3834_v36 = vld [vmem:[%s4900_s12 + $0x240] sm:$0xff]  }
 0x8c9   : > { %2115 = vmatprep.mubr.bf16.mxu0 %v1328_v41  ;;  %2155 = vmatprep.mubr.bf16.mxu1 %v1330_v42  ;;  %v3836_v38 = vld [vmem:[%s4900_s12 + $0x200] sm:$0xff]   ;;  %v3839_v41 = vld [vmem:[%s4900_s12 + $0x2c8] sm:$0xff]  }
 0x8ca   : > { %3516 = vmatprep.subr.bf16.mxu0 %v3806_v39  ;;  %3538 = vmatprep.subr.bf16.mxu1 %v3807_v40  ;;  %v3837_v39 = vld [vmem:[%s4900_s12 + $0x280] sm:$0xff]   ;;  %v3838_v40 = vld [vmem:[%s4900_s12 + $0x248] sm:$0xff]  }
 0x8cb   : > { %v3840_v42 = vld [vmem:[%s4900_s12 + $0x208] sm:$0xff]  }
 0x8cc   : > { %3517 = vmatpush3.bf16.msra.mxu0 %v3808_v43  ;;  %3539 = vmatpush3.bf16.msra.mxu1 %v3809_v44  ;;  %v3841_v43 = vld [vmem:[%s4900_s12 + $0x288] sm:$0xff]   ;;  %v3842_v44 = vld [vmem:[%s4900_s12 + $0x250] sm:$0xff]  }
 0x8cd   : > { %3518 = vmatprep.subr.bf16.mxu0 %v3810_v47  ;;  %3540 = vmatprep.subr.bf16.mxu1 %v3811_v48  ;;  %v3843_v47 = vld [vmem:[%s4900_s12 + $0x2d0] sm:$0xff]  }
 0x8ce   : > { %v3844_v48 = vld [vmem:[%s4900_s12 + $0x210] sm:$0xff]  }
 0x8d0   : > { %3519 = vmatpush3.bf16.msra.mxu0 %v3812_v50  ;;  %3541 = vmatpush3.bf16.msra.mxu1 %v3813_v51  ;;  %v3845_v50 = vld [vmem:[%s4900_s12 + $0x290] sm:$0xff]   ;;  %v3846_v51 = vld [vmem:[%s4900_s12 + $0x258] sm:$0xff]  }
 0x8d1   : > { %3520 = vmatprep.subr.bf16.mxu0 %v3814_v52  ;;  %3542 = vmatprep.subr.bf16.mxu1 %v3815_v53  ;;  %v3847_v52 = vld [vmem:[%s4900_s12 + $0x2d8] sm:$0xff]  }
 0x8d2   : > { %v3848_v53 = vld [vmem:[%s4900_s12 + $0x218] sm:$0xff]  }
 0x8d4   : > { %3521 = vmatpush3.bf16.msra.mxu0 %v3816_v54  ;;  %3543 = vmatpush3.bf16.msra.mxu1 %v3817_v55  ;;  %v3849_v54 = vld [vmem:[%s4900_s12 + $0x298] sm:$0xff]   ;;  %v3850_v55 = vld [vmem:[%s4900_s12 + $0x260] sm:$0xff]  }
 0x8d5   : > { %3522 = vmatprep.subr.bf16.mxu0 %v3818_v56  ;;  %3544 = vmatprep.subr.bf16.mxu1 %v3819_v60  ;;  %v3851_v56 = vld [vmem:[%s4900_s12 + $0x2e0] sm:$0xff]  }
 0x8d6   : > { %v3852_v60 = vld [vmem:[%s4900_s12 + $0x220] sm:$0xff]  }
 0x8d8   : > { %3523 = vmatpush3.bf16.msra.mxu0 %v3820_v62  ;;  %3545 = vmatpush3.bf16.msra.mxu1 %v3821_v2  ;;  %v3853_v62 = vld [vmem:[%s4900_s12 + $0x2a0] sm:$0xff]   ;;  %v3854_v2 = vld [vmem:[%s4900_s12 + $0x268] sm:$0xff]  }
 0x8d9   : > { %3524 = vmatprep.subr.bf16.mxu0 %v3822_v3  ;;  %3546 = vmatprep.subr.bf16.mxu1 %v3823_v4  ;;  %v3855_v3 = vld [vmem:[%s4900_s12 + $0x2e8] sm:$0xff]  }
 0x8da   : > { %v3856_v4 = vld [vmem:[%s4900_s12 + $0x228] sm:$0xff]  }
 0x8dc   : > { %3525 = vmatpush3.bf16.msra.mxu0 %v3824_v6  ;;  %3547 = vmatpush3.bf16.msra.mxu1 %v3825_v7  ;;  %v3857_v6 = vld [vmem:[%s4900_s12 + $0x2a8] sm:$0xff]   ;;  %v3858_v7 = vld [vmem:[%s4900_s12 + $0x270] sm:$0xff]  }
 0x8dd   : > { %3526 = vmatprep.subr.bf16.mxu0 %v3826_v10  ;;  %3548 = vmatprep.subr.bf16.mxu1 %v3827_v11  ;;  %v3861_v10 = vld [vmem:[%s4900_s12 + $0x2b0] sm:$0xff]   ;;  %v3862_v11 = vld [vmem:[%s4900_s12 + $0x278] sm:$0xff]  }
 0x8e0   : > { %3527 = vmatpush3.bf16.msra.mxu0 %v3828_v12  ;;  %3549 = vmatpush3.bf16.msra.mxu1 %v3829_v63  ;;  %v3863_v12 = vld [vmem:[%s4900_s12 + $0x2f8] sm:$0xff]  }
 0x8e1   : > { %3528 = vmatprep.subr.bf16.mxu0 %v3830_v15  ;;  %3550 = vmatprep.subr.bf16.mxu1 %v3831_v45  ;;  %v3864_v63 = vld [vmem:[%s4900_s12 + $0x238] sm:$0xff]   ;;  %v4685_v15 = vld [vmem:[%s4898_s10 + $0x70] sm:$0xff] }
 0x8e2   : > { %v4690_v45 = vld [vmem:[%s4898_s10 + $0x38] sm:$0xff]  ;;  %v3402_v17 = vcombine.high %v4680_v14, %v4685_v15  ;;  %v3401_v58 = vcombine.low %v4680_v14, %v4685_v15 }
 0x8e3   : > { %v3403_v18 = vcombine.low %v4690_v45, %v4697_v57 }
 0x8e4   : > { %3529 = vmatpush3.bf16.msra.mxu0 %v3832_v0  ;;  %3551 = vmatpush3.bf16.msra.mxu1 %v3833_v19  ;;  %v3404_v0 = vcombine.high %v4690_v45, %v4697_v57 }
 0x8e5   : > { %2233 = vmatprep.subr.bf16.mxu0 %v3360_v22  ;;  %2274 = vmatprep.subr.bf16.mxu1 %v3362_v23 }
 0x8e7   : > { %2116 = vmatmul.mubr.bf16.vlgmr.msra.gmra.mrb[32].mxu0 %v1327_v32  ;;  %2156 = vmatmul.mubr.bf16.vlgmr.msra.gmra.mrb[32].mxu1 %v1329_v33 }
 0x8e8   : > { %2234 = vmatpush1.bf16.msra.mxu0 %v3359_v29  ;;  %2275 = vmatpush1.bf16.msra.mxu1 %v3361_v30 }
 0x8e9   : > { %2235 = vmatprep.subr.bf16.mxu0 %v3364_v31  ;;  %2276 = vmatprep.subr.bf16.mxu1 %v3366_v34 }
 0x8ea   : > { %2265 = vmatprep.mubr.bf16.mxu0 %v4002_v49  ;;  %2306 = vmatprep.mubr.bf16.mxu1 %v4002_v49 }
 0x8ec   : > { %2236 = vmatpush1.bf16.msra.mxu0 %v3363_v1  ;;  %2277 = vmatpush1.bf16.msra.mxu1 %v3365_v35 }
 0x8ed   : > { %3558 = vmatprep.subr.bf16.mxu0 %v3834_v36  ;;  %3580 = vmatprep.subr.bf16.mxu1 %v3835_v37 }
 0x8ef   : > { %3367 = vmatmul.mubr.msk.bf16.vlgmr.msra.gmra.mrb[36].mxu0 %vm480_vm0, %v4312_v16  ;;  %3368 = vmatmul.mubr.msk.bf16.vlgmr.msra.gmra.mrb[36].mxu1 %vm480_vm0, %v4312_v16 }
 0x8f0   : > { %3559 = vmatpush3.bf16.msra.mxu0 %v3836_v38  ;;  %3581 = vmatpush3.bf16.msra.mxu1 %v3837_v39  ;;  %v2171_v38 = vld [vmem:[%s4899_s11 + $0x8] sm:$0xf] }
 0x8f1   : > { %3560 = vmatprep.subr.bf16.mxu0 %v3838_v40  ;;  %3582 = vmatprep.subr.bf16.mxu1 %v3839_v41 }
 0x8f4   : > { %3561 = vmatpush3.bf16.msra.mxu0 %v3840_v42  ;;  %3583 = vmatpush3.bf16.msra.mxu1 %v3841_v43  ;;  %v2176_v42 = vrot.slane %v2171_v38, %v4204_v46  ;;  %v2184_v43 = vrot.slane %v2171_v38, %v4445_v5 }
 0x8f5   : > { %3562 = vmatprep.subr.bf16.mxu0 %v3842_v44  ;;  %3584 = vmatprep.subr.bf16.mxu1 %v3843_v47  ;;  %v2180_v47 = vrot.slane %v2171_v38, %v4431_v59 }
 0x8f8   : > { %3563 = vmatpush3.bf16.msra.mxu0 %v3844_v48  ;;  %3585 = vmatpush3.bf16.msra.mxu1 %v3845_v50  ;;  %v2188_v48 = vrot.slane %v2171_v38, %v4434_v61  ;;  %v3888_v38 = vld [vmem:[%s4900_s12 + $0x328] sm:$0xff]  }
 0x8f9   : > { %3564 = vmatprep.subr.bf16.mxu0 %v3846_v51  ;;  %3586 = vmatprep.subr.bf16.mxu1 %v3847_v52 }
 0x8fc   : > { %3565 = vmatpush3.bf16.msra.mxu0 %v3848_v53  ;;  %3587 = vmatpush3.bf16.msra.mxu1 %v3849_v54 }
 0x8fd   : > { %3566 = vmatprep.subr.bf16.mxu0 %v3850_v55  ;;  %3588 = vmatprep.subr.bf16.mxu1 %v3851_v56 }
 0x900   : > { %3567 = vmatpush3.bf16.msra.mxu0 %v3852_v60  ;;  %3589 = vmatpush3.bf16.msra.mxu1 %v3853_v62 }
 0x901   : > { %3568 = vmatprep.subr.bf16.mxu0 %v3854_v2  ;;  %3590 = vmatprep.subr.bf16.mxu1 %v3855_v3 }
 0x904   : > { %3569 = vmatpush3.bf16.msra.mxu0 %v3856_v4  ;;  %3591 = vmatpush3.bf16.msra.mxu1 %v3857_v6 }
 0x905   : > { %3570 = vmatprep.subr.bf16.mxu0 %v3858_v7  ;;  %3592 = vmatprep.subr.bf16.mxu1 %v3859_v8  ;;  %v2664_v8 = vld [vmem:[%s4898_s10 + $0xb0] sm:$0xff] }
 0x908   : > { %3571 = vmatpush3.bf16.msra.mxu0 %v3860_v9  ;;  %3593 = vmatpush3.bf16.msra.mxu1 %v3861_v10 }
 0x909   : > { %3572 = vmatprep.subr.bf16.mxu0 %v3862_v11  ;;  %3594 = vmatprep.subr.bf16.mxu1 %v3863_v12  ;;  %v2666_v11 = vld [vmem:[%s4898_s10 + $0xf0] sm:$0xff]  ;;  %v2665_v12 = vld [vmem:[%s4898_s10 + $0xb8] sm:$0xff] }
 0x90c   : > { %3573 = vmatpush3.bf16.msra.mxu0 %v3864_v63  ;;  %3595 = vmatpush3.bf16.msra.mxu1 %v3865_v13  ;;  %v2667_v63 = vld [vmem:[%s4898_s10 + $0xf8] sm:$0xff] }
 0x90d   : > { %2730 = vmatprep.subr.bf16.mxu0 %v3402_v17  ;;  %2771 = vmatprep.subr.bf16.mxu1 %v3404_v0  ;;  %v3406_v17 = vcombine.high %v2664_v8, %v2666_v11  ;;  %v3408_v57 = vcombine.high %v2665_v12, %v2667_v63  ;;  %v3405_v0 = vcombine.low %v2664_v8, %v2666_v11 }
 0x99a   : > { %v3486_v19 = vpop.f32.mrb[28].mxu0  ;;  %v3508_v20 = vpop.f32.mrb[28].mxu1 }
 0x99b   : > { %v3487_v21 = vpop.f32.mrb[29].mxu0  ;;  %v3509_v22 = vpop.f32.mrb[29].mxu1 }
 0x99c   : > { %v3488_v23 = vadd.f32 %v3487_v21, %v3486_v19  ;;  %v3510_v24 = vadd.f32 %v3509_v22, %v3508_v20  ;;  %v3489_v25 = vpop.f32.mrb[30].mxu0  ;;  %v3511_v27 = vpop.f32.mrb[30].mxu1  ;;  %v3407_v19 = vcombine.low %v2665_v12, %v2667_v63  ;;  %v3866_v20 = vld [vmem:[%s4900_s12 + $0x340] sm:$0xff]   ;;  %v3870_v22 = vld [vmem:[%s4900_s12 + $0x348] sm:$0xff]  }
 0x99d   : > { %v3490_v28 = vpop.f32.mrb[31].mxu0  ;;  %v3512_v29 = vpop.f32.mrb[31].mxu1  ;;  %v3867_v21 = vld [vmem:[%s4900_s12 + $0x3c0] sm:$0xff]   ;;  %v3874_v25 = vld [vmem:[%s4900_s12 + $0x350] sm:$0xff]  }
 0x99e   : > { %v1886_v30 = vadd.f32 %v3510_v24, %v3488_v23  ;;  %v3872_v23 = vld [vmem:[%s4900_s12 + $0x308] sm:$0xff]   ;;  %v3876_v27 = vld [vmem:[%s4900_s12 + $0x310] sm:$0xff]   ;;  %v3878_v29 = vld [vmem:[%s4900_s12 + $0x358] sm:$0xff]  }
 0x99f   : > { %v3873_v24 = vld [vmem:[%s4900_s12 + $0x388] sm:$0xff]   ;;  %v3877_v28 = vld [vmem:[%s4900_s12 + $0x390] sm:$0xff]  }
 0x9ba   : > { %v3530_v31 = vpop.f32.mrb[32].mxu0  ;;  %v3552_v32 = vpop.f32.mrb[32].mxu1 }
 0x9bb   : > { %v3531_v33 = vpop.f32.mrb[33].mxu0  ;;  %v3553_v34 = vpop.f32.mrb[33].mxu1 }
 0x9bc   : > { %v3532_v1 = vadd.f32 %v3531_v33, %v3530_v31  ;;  %v3554_v35 = vadd.f32 %v3553_v34, %v3552_v32  ;;  %v3533_v36 = vpop.f32.mrb[34].mxu0  ;;  %v3555_v37 = vpop.f32.mrb[34].mxu1  ;;  %v3880_v31 = vld [vmem:[%s4900_s12 + $0x318] sm:$0xff]   ;;  %v3882_v33 = vld [vmem:[%s4900_s12 + $0x360] sm:$0xff]  }
 0x9bd   : > { %v3534_v39 = vpop.f32.mrb[35].mxu0  ;;  %v3556_v40 = vpop.f32.mrb[35].mxu1  ;;  %v3881_v32 = vld [vmem:[%s4900_s12 + $0x398] sm:$0xff]   ;;  %v3883_v34 = vld [vmem:[%s4900_s12 + $0x3e0] sm:$0xff]   ;;  %v3886_v36 = vld [vmem:[%s4900_s12 + $0x368] sm:$0xff]  }
 0x9be   : > { %v2118_v41 = vadd.f32 %v3532_v1, %v1886_v30  ;;  %v3879_v30 = vld [vmem:[%s4900_s12 + $0x3d8] sm:$0xff]   ;;  %v3884_v1 = vld [vmem:[%s4900_s12 + $0x320] sm:$0xff]   ;;  %v3887_v37 = vld [vmem:[%s4900_s12 + $0x3e8] sm:$0xff]  }
 0x9bf   : > { %v3889_v39 = vld [vmem:[%s4900_s12 + $0x3a8] sm:$0xff]   ;;  %v3890_v40 = vld [vmem:[%s4900_s12 + $0x370] sm:$0xff]  }
 0x9c0   : > { %v4710_v44 = vadd.f32 %v3554_v35, %v2118_v41  ;;  %v3885_v35 = vld [vmem:[%s4900_s12 + $0x3a0] sm:$0xff]   ;;  %v3891_v41 = vld [vmem:[%s4900_s12 + $0x3f0] sm:$0xff]  }
 0x9c2   : > { %v2267_v50 = vpop.f32.mrb[36].mxu0  ;;  %v2308_v51 = vpop.f32.mrb[36].mxu1 }
 0x9c3   : > { %v2268_v52 = vadd.f32 %v2267_v50, %v2176_v42  ;;  %v2309_v53 = vadd.f32 %v2308_v51, %v2184_v43  ;;  %v2269_v54 = vpop.f32.mrb[37].mxu0  ;;  %v2310_v55 = vpop.f32.mrb[37].mxu1  ;;  %v3892_v42 = vld [vmem:[%s4900_s12 + $0x330] sm:$0xff]   ;;  %v3896_v50 = vld [vmem:[%s4900_s12 + $0x338] sm:$0xff]  }
 0x9c4   : > { %v2270_v56 = vadd.f32 %v2269_v54, %v2180_v47  ;;  %v2311_v60 = vadd.f32 %v2310_v55, %v2188_v48  ;;  %v2271_v62 = vpop.f32.mrb[38].mxu0  ;;  %v2312_v2 = vpop.f32.mrb[38].mxu1  ;;  %v3893_v43 = vld [vmem:[%s4900_s12 + $0x3b0] sm:$0xff]   ;;  %v3894_v47 = vld [vmem:[%s4900_s12 + $0x378] sm:$0xff]  }
 0x9c5   : > { %v2315_v3 = vmax.f32 %v2268_v52, 0.0  ;;  %v2317_v4 = vmax.f32 %v2309_v53, 0.0  ;;  %v2272_v6 = vpop.f32.mrb[39].mxu0  ;;  %v2313_v7 = vpop.f32.mrb[39].mxu1  ;;  %v3895_v48 = vld [vmem:[%s4900_s12 + $0x3f8] sm:$0xff]  }
 0x9c6   : > { %v2316_v9 = vmax.f32 %v2270_v56, 0.0  ;;  %v2318_v10 = vmax.f32 %v2311_v60, 0.0  ;;  %v3897_v51 = vld [vmem:[%s4900_s12 + $0x3b8] sm:$0xff]  }
 0x9c7   : > { %v2319_v15 = vpack.c.bf16 %v2315_v3, %v2315_v3  ;;  %v2321_v45 = vpack.c.bf16 %v2317_v4, %v2317_v4  ;;  %v2668_v3 = vld [vmem:[%s4899_s11 + $0xc] sm:$0xf] }
 0x9c8   : > { %v2320_v13 = vpack.c.bf16 %v2316_v9, %v2316_v9  ;;  %v2322_v14 = vpack.c.bf16 %v2318_v10, %v2318_v10  ;;  %v2673_v8 = vrot.slane %v2668_v3, %v4204_v46  ;;  %v2681_v9 = vrot.slane %v2668_v3, %v4445_v5 }
 0x9c9   : > { %v2677_v11 = vrot.slane %v2668_v3, %v4431_v59  ;;  %v2685_v12 = vrot.slane %v2668_v3, %v4434_v61 }
 0x9ca   : > { %2611 = vmatprep.mubr.bf16.mxu0 %v2320_v13  ;;  %2651 = vmatprep.mubr.bf16.mxu1 %v2322_v14 }
 0x9cb   : > { %2612 = vmatmul.mubr.bf16.vlgmr.msra.gmra.mrb[40].mxu0 %v2319_v15  ;;  %2652 = vmatmul.mubr.bf16.vlgmr.msra.gmra.mrb[40].mxu1 %v2321_v45 }
 0x9cc   : > { %2731 = vmatpush1.bf16.msra.mxu0 %v3401_v58  ;;  %2772 = vmatpush1.bf16.msra.mxu1 %v3403_v18  ;;  %v3868_v58 = vld [vmem:[%s4900_s12 + $0x300] sm:$0xff]  }
 0x9cd   : > { %2732 = vmatprep.subr.bf16.mxu0 %v3406_v17  ;;  %2773 = vmatprep.subr.bf16.mxu1 %v3408_v57  ;;  %v3869_v18 = vld [vmem:[%s4900_s12 + $0x380] sm:$0xff]  }
 0x9ce   : > { %2762 = vmatprep.mubr.bf16.mxu0 %v4002_v49  ;;  %2803 = vmatprep.mubr.bf16.mxu1 %v4002_v49  ;;  %v3871_v49 = vld [vmem:[%s4900_s12 + $0x3c8] sm:$0xff]  }
 0x9d0   : > { %2733 = vmatpush1.bf16.msra.mxu0 %v3405_v0  ;;  %2774 = vmatpush1.bf16.msra.mxu1 %v3407_v19 }
 0x9d1   : > { %3602 = vmatprep.subr.bf16.mxu0 %v3866_v20  ;;  %3624 = vmatprep.subr.bf16.mxu1 %v3867_v21 }
 0x9d3   : > { %3409 = vmatmul.mubr.msk.bf16.vlgmr.msra.gmra.mrb[44].mxu0 %vm480_vm0, %v4312_v16  ;;  %3410 = vmatmul.mubr.msk.bf16.vlgmr.msra.gmra.mrb[44].mxu1 %vm480_vm0, %v4312_v16  ;;  %v3875_v16 = vld [vmem:[%s4900_s12 + $0x3d0] sm:$0xff]  }
 0x9d4   : > { %3603 = vmatpush3.bf16.msra.mxu0 %v3868_v58  ;;  %3625 = vmatpush3.bf16.msra.mxu1 %v3869_v18 }
 0x9d5   : > { %3604 = vmatprep.subr.bf16.mxu0 %v3870_v22  ;;  %3626 = vmatprep.subr.bf16.mxu1 %v3871_v49 }
 0x9d8   : > { %3605 = vmatpush3.bf16.msra.mxu0 %v3872_v23  ;;  %3627 = vmatpush3.bf16.msra.mxu1 %v3873_v24 }
 0x9d9   : > { %3606 = vmatprep.subr.bf16.mxu0 %v3874_v25  ;;  %3628 = vmatprep.subr.bf16.mxu1 %v3875_v16 }
 0x9dc   : > { %3607 = vmatpush3.bf16.msra.mxu0 %v3876_v27  ;;  %3629 = vmatpush3.bf16.msra.mxu1 %v3877_v28 }
 0x9dd   : > { %3608 = vmatprep.subr.bf16.mxu0 %v3878_v29  ;;  %3630 = vmatprep.subr.bf16.mxu1 %v3879_v30 }
 0x9e0   : > { %3609 = vmatpush3.bf16.msra.mxu0 %v3880_v31  ;;  %3631 = vmatpush3.bf16.msra.mxu1 %v3881_v32 }
 0x9e1   : > { %3610 = vmatprep.subr.bf16.mxu0 %v3882_v33  ;;  %3632 = vmatprep.subr.bf16.mxu1 %v3883_v34 }
 0x9e4   : > { %3611 = vmatpush3.bf16.msra.mxu0 %v3884_v1  ;;  %3633 = vmatpush3.bf16.msra.mxu1 %v3885_v35  ;;  %v3443_v1 = vld [vmem:[%s4901_s13] ss:$0 sm:$0xff] }
 0x9e5   : > { %3612 = vmatprep.subr.bf16.mxu0 %v3886_v36  ;;  %3634 = vmatprep.subr.bf16.mxu1 %v3887_v37 }
 0x9e8   : > { %3613 = vmatpush3.bf16.msra.mxu0 %v3888_v38  ;;  %3635 = vmatpush3.bf16.msra.mxu1 %v3889_v39 }
 0x9e9   : > { %3614 = vmatprep.subr.bf16.mxu0 %v3890_v40  ;;  %3636 = vmatprep.subr.bf16.mxu1 %v3891_v41 }
 0x9ec   : > { %3615 = vmatpush3.bf16.msra.mxu0 %v3892_v42  ;;  %3637 = vmatpush3.bf16.msra.mxu1 %v3893_v43 }
 0x9ed   : > { %3616 = vmatprep.subr.bf16.mxu0 %v3894_v47  ;;  %3638 = vmatprep.subr.bf16.mxu1 %v3895_v48 }
 0x9f0   : > { %3617 = vmatpush3.bf16.msra.mxu0 %v3896_v50  ;;  %3639 = vmatpush3.bf16.msra.mxu1 %v3897_v51 }
 0xa9e   : > { %v3574_v52 = vpop.f32.mrb[40].mxu0  ;;  %v3596_v53 = vpop.f32.mrb[40].mxu1 }
 0xa9f   : > { %v3575_v54 = vpop.f32.mrb[41].mxu0  ;;  %v3597_v55 = vpop.f32.mrb[41].mxu1 }
 0xaa0   : > { %v3576_v56 = vadd.f32 %v3575_v54, %v3574_v52  ;;  %v3598_v60 = vadd.f32 %v3597_v55, %v3596_v53  ;;  %v3577_v62 = vpop.f32.mrb[42].mxu0  ;;  %v3599_v2 = vpop.f32.mrb[42].mxu1 }
 0xaa1   : > { %v3578_v4 = vpop.f32.mrb[43].mxu0  ;;  %v3600_v6 = vpop.f32.mrb[43].mxu1 }
 0xaa2   : > { %v2654_v7 = vadd.f32 %v3598_v60, %v3576_v56 }
 0xaa4   : > { %v2659_v10 = vadd.f32 %v2654_v7, %v4710_v44 }
 0xaa6   : > { %v2764_v63 = vpop.f32.mrb[44].mxu0  ;;  %v2805_v13 = vpop.f32.mrb[44].mxu1 }
 0xaa7   : > { %v2765_v14 = vadd.f32 %v2764_v63, %v2673_v8  ;;  %v2806_v15 = vadd.f32 %v2805_v13, %v2681_v9  ;;  %v2766_v45 = vpop.f32.mrb[45].mxu0  ;;  %v2807_v17 = vpop.f32.mrb[45].mxu1 }
 0xaa8   : > { %v2767_v57 = vadd.f32 %v2766_v45, %v2677_v11  ;;  %v2808_v0 = vadd.f32 %v2807_v17, %v2685_v12  ;;  %v2768_v19 = vpop.f32.mrb[46].mxu0  ;;  %v2809_v20 = vpop.f32.mrb[46].mxu1 }
 0xaa9   : > { %v2812_v46 = vmax.f32 %v2765_v14, 0.0  ;;  %v2814_v21 = vmax.f32 %v2806_v15, 0.0  ;;  %v2769_v5 = vpop.f32.mrb[47].mxu0  ;;  %v2810_v58 = vpop.f32.mrb[47].mxu1 }
 0xaaa   : > { %v2813_v44 = vmax.f32 %v2767_v57, 0.0  ;;  %v2815_v18 = vmax.f32 %v2808_v0, 0.0 }
 0xaab   : > { %v2816_v61 = vpack.c.bf16 %v2812_v46, %v2812_v46  ;;  %v2818_v49 = vpack.c.bf16 %v2814_v21, %v2814_v21 }
 0xaac   : > { %v2817_v59 = vpack.c.bf16 %v2813_v44, %v2813_v44  ;;  %v2819_v22 = vpack.c.bf16 %v2815_v18, %v2815_v18 }
 0xaae   : > { %3108 = vmatprep.mubr.bf16.mxu0 %v2817_v59  ;;  %3148 = vmatprep.mubr.bf16.mxu1 %v2819_v22 }
 0xaaf   : > { %3109 = vmatmul.mubr.bf16.vlgmr.msra.gmra.mrb[48].mxu0 %v2816_v61  ;;  %3149 = vmatmul.mubr.bf16.vlgmr.msra.gmra.mrb[48].mxu1 %v2818_v49 }
 0xb82   : > { %v3618_v23 = vpop.f32.mrb[48].mxu0  ;;  %v3640_v24 = vpop.f32.mrb[48].mxu1 }
 0xb83   : > { %v3619_v25 = vpop.f32.mrb[49].mxu0  ;;  %v3641_v16 = vpop.f32.mrb[49].mxu1 }
 0xb84   : > { %v3620_v27 = vadd.f32 %v3619_v25, %v3618_v23  ;;  %v3642_v28 = vadd.f32 %v3641_v16, %v3640_v24  ;;  %v3621_v29 = vpop.f32.mrb[50].mxu0  ;;  %v3643_v30 = vpop.f32.mrb[50].mxu1 }
 0xb85   : > { %v3622_v31 = vpop.f32.mrb[51].mxu0  ;;  %v3644_v32 = vpop.f32.mrb[51].mxu1 }
 0xb86   : > { %v3151_v33 = vadd.f32 %v3642_v28, %v3620_v27 }
 0xb88   : > { %v3156_v34 = vadd.f32 %v3151_v33, %v2659_v10 }
 0xb8a   : > { %v3157_v35 = vadd.f32 %v3156_v34, %v4250_v26 }
 0xb8c   : > { %v3165_v36 = vadd.f32 %v3443_v1, %v3157_v35 }
 0xb8e   : > { %3166 = vst.msk [vmem:[%s469_s2] sm:$0xff] %vm480_vm0, %v3165_v36 }
 0xb8f   : > { %3935 = shalt.err (!%p3932_p3)
}
 0xb90   : > { %s3936_s0 = scalar_lea.hbm %s4845_s21, 128  ;;  %s3940_s2 = scalar_lea.hbm %s4902_s14, 256 }
 0xb91   : > { %p3937_p4 = scmp.ne.s32.totalorder %s4845_s21, %s3936_s0  ;;  %p3941_p9 = scmp.lt.u32.totalorder %s4845_s21, %s4902_s14 }
 0xb92   : > { %p3942_p10 = scmp.lt.u32.totalorder %s3940_s2, %s3936_s0  ;;  %p3944_p12 = scmp.lt.u32.totalorder %s3936_s0, %s4845_s21 }
 0xb93   : > { %p3938_p7 = pnand %p3937_p4, %p4117_p5 }
 0xb94   : > { %p3943_p11 = por %p3942_p10, %p3941_p9 }
 0xb95   : > { %p3939_p8 = pneg %p3938_p7 }
 0xb96   : > { %p3945_p13 = por %p3944_p12, %p3943_p11 }
 0xb98   : > { %p3946_p0 = pnand %p3945_p13, %p3939_p8 }
 0xb9a   : > { %3949 = shalt.err (!%p3946_p0)
}
 0xb9b   : > { %3710 = dma.vmem_to_hbm [thread:$0]  (%p4117_p5), %s4847_s18, 128, %s4845_s21, %s3168_s26  }
 0xb9c PF: > { %p3716_p1 = scmp.ge.s32.totalorder %s3984_s16, 2  ;;  %s3193_s27 = sand.u32 1, %s3972_s29  }
 0xb9d   : > { %s3194_s17 = scalar_lea.sflag [#allocation4], %s3193_s27 }
 0xb9e   : > { %p3713_p2 = pnand %p3716_p1, %p4121_p6 }
 0xba0   : > { %3967 = dma.done.wait (!%p3713_p2), %s3194_s17, 128  }
 0xba1   : > { %3969 = vsyncadd (!%p3713_p2), %s3194_s17, 4294967168  ;;  %p24_p3 = scmp.ge.s32.totalorder %s4104_s19, 4   ;;  %s4915_s29 = smov %s3976_s30 }
 0xba2   : > { %s4916_s30 = smov %s3980_s15  ;;  %s4917_s15 = smov %s4115_s22 }
 0xba3   : > { %s4918_s16 = smov %s4104_s19  ;;  %26 = sbr.rel (!%p24_p3) target bundleno = 9 (0x9), region = 114 }
 0xbaa   :  { %3199 = vsyncpa [#allocation4], 1 }
 0xbab   :  { %3201 = vsyncpa [#allocation4 + $0x1], 1 }

</bundles_post_ra>
